<compile_context>
chip_gen: v7x
topology: tpu7x:2x2x1
jax: 0.10.0
libtpu: 0.0.40
codegen_flags: <defaults>
</compile_context>

<pallas_src>
import math

import numpy as np
import jax
import jax.numpy as jnp
from jax.experimental import pallas as pl
from jax.experimental.pallas import tpu as pltpu

# ----------------------------- configuration --------------------------------
N = 8                         # demo batch (number of extra rotation vectors produced)
T_IN = 2                      # raw t-conditioning dim
P_IN = 6                      # raw p-conditioning dim
N_FREQ = 4                    # sinusoidal embedding frequencies
RAW_IN = T_IN + P_IN          # 8
EMB = RAW_IN * 2 * N_FREQ     # 64  (== p_dim + t_dim in the torch module)
MLP_WIDTH = 128               # one MXU / lane tile (small-shape demo width)
MLP_DEPTH = 4                 # Linear(EMB,W)+ReLU, 3x Linear(W,W)+ReLU, then Linear(W,3)
LANES = 128
R_LANE0 = 3                   # output slab: lanes 0..2 = rvec, lanes 3..11 = row-major R
ROW_TILE = 256                # rows per grid step for large batches (multiple of 8)

# weight-stack plane indices
PLANE_W0 = 0                              # W0 (zero-row-padded), then W1..W3
PLANE_WLAST = MLP_DEPTH                   # 4: final Linear (zero-col-padded)
PLANE_PA = PLANE_WLAST + 1                # 5: lane k=3+3i+j -> r_i
PLANE_PB = PLANE_PA + 1                   # 6: lane k=3+3i+j -> r_j
PLANE_PS = PLANE_PB + 1                   # 7: lane k=3+3i+j -> signed skew component
N_WPLANES = PLANE_PS + 1                  # 8

# bias-slab row indices
ROW_BLAST = MLP_DEPTH                     # 4: final-layer bias (3 lanes, rest zero)
ROW_EYE = 5                               # identity pattern (1.0 at lanes 3,7,11)
ROW_SINMASK = 6                           # 1.0 on sin lanes, 0.0 on cos lanes
ROW_FREQ = 7                              # 2**(q%4) on embedding lanes, 0 elsewhere
B_ROWS = 8


# --------------------------- embedder (reference / spec glue) ----------------
def sinusoidal_embed(x, n_freq=N_FREQ):
    # TODO(synk): t_embedder / p_embedder are undefined external globals in the source repo;
    # this deterministic sinusoidal frequency encoding stands in for them (kernel and reference
    # implement the exact same encoding).
    freqs = 2.0 ** jnp.arange(n_freq, dtype=jnp.float32)          # (L,)
    xf = x[..., :, None] * freqs[None, None, :]                   # (N, D, L)
    emb = jnp.concatenate([jnp.sin(xf), jnp.cos(xf)], axis=-1)    # (N, D, 2L)
    return emb.reshape(x.shape[0], -1)                            # (N, D*2L)


# --------------------------- parameter initialization ------------------------
def xavier_uniform_linear(key, fan_in, fan_out, gain):
    # matches torch: std = gain*sqrt(2/(n1+n2)); uniform(-std*sqrt(3), std*sqrt(3))
    bound = gain * math.sqrt(2.0 / (fan_in + fan_out)) * math.sqrt(3.0)
    return jax.random.uniform(key, (fan_in, fan_out), jnp.float32, -bound, bound)


def init_params(key):
    gain_relu = math.sqrt(2.0)  # nn.init.calculate_gain('relu')
    dims = [EMB] + [MLP_WIDTH] * MLP_DEPTH
    ws, bs = [], []
    keys = jax.random.split(key, MLP_DEPTH + 1)
    for i in range(MLP_DEPTH):
        ws.append(xavier_uniform_linear(keys[i], dims[i], dims[i + 1], gain_relu))
        bs.append(jnp.zeros((1, dims[i + 1]), jnp.float32))
    # last layer: Linear(W, 3), overridden with uniform(-0.01, 0.01), zero bias
    ws.append(jax.random.uniform(keys[-1], (MLP_WIDTH, 3), jnp.float32, -0.01, 0.01))
    bs.append(jnp.zeros((1, 3), jnp.float32))
    return ws, bs


# --------------------------- constant matrices & packing ---------------------
def _rodrigues_selectors():
    # For output lane k = 3 + 3*i + j:  Pa picks r_i, Pb picks r_j, Ps picks the signed
    # cross-product component of [r]_x (zero on the diagonal).
    Pa = np.zeros((LANES, LANES), np.float32)
    Pb = np.zeros((LANES, LANES), np.float32)
    Ps = np.zeros((LANES, LANES), np.float32)
    skew = {(0, 1): (2, -1.0), (0, 2): (1, 1.0), (1, 0): (2, 1.0),
            (1, 2): (0, -1.0), (2, 0): (1, -1.0), (2, 1): (0, 1.0)}
    for i in range(3):
        for j in range(3):
            k = R_LANE0 + 3 * i + j
            Pa[i, k] = 1.0
            Pb[j, k] = 1.0
            if (i, j) in skew:
                comp, sgn = skew[(i, j)]
                Ps[comp, k] = sgn
    return Pa, Pb, Ps


def pack_params(ws, bs):
    """Pack all MLP weights/biases + kernel constants into (8,128,128) + (8,128). Done once."""
    w0p = jnp.zeros((LANES, LANES), jnp.float32).at[:EMB, :].set(ws[0])       # zero rows 64..127
    wlp = jnp.zeros((LANES, LANES), jnp.float32).at[:, :3].set(ws[-1])        # zero cols 3..127
    Pa, Pb, Ps = _rodrigues_selectors()
    w_stack = jnp.stack(
        [w0p] + list(ws[1:MLP_DEPTH]) +
        [wlp, jnp.asarray(Pa), jnp.asarray(Pb), jnp.asarray(Ps)], axis=0)     # (8,128,128)

    b_slab = np.zeros((B_ROWS, LANES), np.float32)
    for l in range(MLP_DEPTH):
        b_slab[l, :] = np.asarray(bs[l][0])
    b_slab[ROW_BLAST, :3] = np.asarray(bs[-1][0])
    b_slab[ROW_EYE, [R_LANE0, R_LANE0 + 4, R_LANE0 + 8]] = 1.0
    lanes = np.arange(LANES)
    b_slab[ROW_SINMASK, :] = ((lanes % (2 * N_FREQ)) < N_FREQ).astype(np.float32)
    # frequency row: lane d*8+q -> 2**(q%4) for the 64 embedding lanes, 0 on padding lanes
    b_slab[ROW_FREQ, :] = np.where(
        lanes < EMB, 2.0 ** ((lanes % (2 * N_FREQ)) % N_FREQ), 0.0).astype(np.float32)
    return w_stack, jnp.asarray(b_slab)


# ------------------------------- Pallas kernel -------------------------------
def pose_tuner_kernel(tp_ref, w_ref, b_ref, out_ref):
    hp = jax.lax.Precision.HIGHEST
    dot = lambda a, b: jnp.dot(a, b, precision=hp, preferred_element_type=jnp.float32)

    # In-kernel sinusoidal embedding (no weight plane, no matmul): the wrapper lane-replicates
    # the raw (t,p) conditioning, so xf[:, d*8+q] = tp[:, d] * 2**(q%4) via a single constant-row
    # VPU multiply (exact powers of two); sin on lanes with (lane%8)<4, cos elsewhere (EUP).
    xf = tp_ref[...] * b_ref[ROW_FREQ:ROW_FREQ + 1, :]                       # (TM, 128)
    sin_m = b_ref[ROW_SINMASK:ROW_SINMASK + 1, :]                            # (1, 128)
    x = sin_m * jnp.sin(xf) + (1.0 - sin_m) * jnp.cos(xf)                    # (TM, 128)

    # MLP: 4 x (Linear + ReLU). W0 is zero-row-padded, so the garbage lanes >=64 of x are inert.
    h = x
    for l in range(MLP_DEPTH):
        h = jnp.maximum(dot(h, w_ref[PLANE_W0 + l]) + b_ref[l:l + 1, :], 0.0)

    # Final Linear: rvec lives in lanes 0..2 of a full tile; lanes 3..127 are exact zeros
    # (zero weight columns + zero bias), so the full-lane reduction below equals sum(rvec**2).
    rvec = dot(h, w_ref[PLANE_WLAST]) + b_ref[ROW_BLAST:ROW_BLAST + 1, :]    # (TM, 128)

    theta = jnp.sqrt(1e-05 + jnp.sum(rvec * rvec, axis=1, keepdims=True))    # (TM, 1)
    r = rvec / theta
    costh = jnp.cos(theta)
    sinth = jnp.sin(theta)

    # Lane-dense Rodrigues: R = (1-c)*r_i*r_j + c*I + s*[r]_x assembled on lanes 3..11 via
    # constant 0/+-1 selection matmuls -- no lane slicing, no 9-way concatenate.
    a_vec = dot(r, w_ref[PLANE_PA])                                          # lane k -> r_i
    b_vec = dot(r, w_ref[PLANE_PB])                                          # lane k -> r_j
    s_vec = dot(r, w_ref[PLANE_PS])                                          # lane k -> +-r_comp
    eye_v = b_ref[ROW_EYE:ROW_EYE + 1, :]                                    # (1, 128)

    # Single unmasked full-tile store: lanes 0..2 = rvec, 3..11 = R (row-major), 12..127 = 0.
    out_ref[...] = rvec + (1.0 - costh) * (a_vec * b_vec) + costh * eye_v + sinth * s_vec


def _pose_tuner_call(tp_full, w_stack, b_slab, row_tile):
    n_pad = tp_full.shape[0]
    grid = (n_pad // row_tile,)
    return pl.pallas_call(
        pose_tuner_kernel,
        out_shape=jax.ShapeDtypeStruct((n_pad, LANES), jnp.float32),
        grid=grid,
        in_specs=[pl.BlockSpec((row_tile, LANES), lambda i: (i, 0)),
                  pl.BlockSpec((N_WPLANES, LANES, LANES), lambda i: (0, 0, 0)),
                  pl.BlockSpec((B_ROWS, LANES), lambda i: (0, 0))],
        out_specs=pl.BlockSpec((row_tile, LANES), lambda i: (i, 0)),
        compiler_params=pltpu.CompilerParams(dimension_semantics=("parallel",)),
    )(tp_full, w_stack, b_slab)


def _round_up(x, m):
    return ((x + m - 1) // m) * m


@jax.jit
def extra_pose_tuner(t, p, w_stack, b_slab):
    """Forward pass. Returns dict with 'Rs_extra' (N,3,3) and 'rvec_extra' (N,3)."""
    n = t.shape[0]
    if n <= ROW_TILE:
        n_pad = max(8, _round_up(n, 8))     # sublane-aligned single tile
        tile = n_pad
    else:
        n_pad = _round_up(n, ROW_TILE)      # multi-tile "parallel" grid over row tiles
        tile = ROW_TILE
    tp = jnp.concatenate((t, p), axis=-1)                              # (n, 8) raw conditioning
    tp_rep = jnp.repeat(tp, 2 * N_FREQ, axis=1)                        # (n, 64) lane-replicated
    tp_full = jnp.zeros((n_pad, LANES), jnp.float32).at[:n, :EMB].set(tp_rep)
    out = _pose_tuner_call(tp_full, w_stack, b_slab, tile)             # (n_pad, 128)
    rvec = out[:n, :3]
    Rs = out[:n, R_LANE0:R_LANE0 + 9].reshape(-1, 3, 3)
    return {"Rs_extra": Rs, "rvec_extra": rvec}


# ------------------------------ pure-JAX reference ---------------------------
def reference(t, p, ws, bs):
    hp = jax.lax.Precision.HIGHEST
    x = jnp.concatenate((sinusoidal_embed(t), sinusoidal_embed(p)), axis=-1)
    h = x
    for w, b in zip(ws[:-1], bs[:-1]):
        h = jnp.maximum(jnp.dot(h, w, precision=hp) + b, 0.0)
    rvec = jnp.dot(h, ws[-1], precision=hp) + bs[-1]
    theta = jnp.sqrt(1e-05 + jnp.sum(rvec ** 2, axis=1))
    r = rvec / theta[:, None]
    c, s = jnp.cos(theta), jnp.sin(theta)
    rx, ry, rz = r[:, 0], r[:, 1], r[:, 2]
    Rs = jnp.stack((rx ** 2 + (1 - rx ** 2) * c, rx * ry * (1 - c) - rz * s, rx * rz * (1 - c) + ry * s,
                    rx * ry * (1 - c) + rz * s, ry ** 2 + (1 - ry ** 2) * c, ry * rz * (1 - c) - rx * s,
                    rx * rz * (1 - c) - ry * s, ry * rz * (1 - c) + rx * s, rz ** 2 + (1 - rz ** 2) * c),
                   axis=1).reshape(-1, 3, 3)
    return {"Rs_extra": Rs, "rvec_extra": rvec}


# ----------------------------------- main ------------------------------------
if __name__ == "__main__":
    key = jax.random.PRNGKey(0)
    k_t, k_p, k_w, k_t2, k_p2 = jax.random.split(key, 5)
    t = jax.random.normal(k_t, (N, T_IN), jnp.float32)
    p = jax.random.normal(k_p, (N, P_IN), jnp.float32)
    ws, bs = init_params(k_w)
    w_stack, b_slab = pack_params(ws, bs)          # packed once, reused across calls

    out = extra_pose_tuner(t, p, w_stack, b_slab)
    jax.block_until_ready(out)

    ref = reference(t, p, ws, bs)
    assert out["Rs_extra"].shape == (N, 3, 3) and out["rvec_extra"].shape == (N, 3)
    # tolerance leaves a small margin for Mosaic-vs-XLA sin/cos implementation differences
    # propagated through the 5-layer MLP (observed mismatch is O(1e-6) on O(0.01..1) values).
    assert jnp.allclose(out["rvec_extra"], ref["rvec_extra"], atol=2e-5, rtol=2e-5)
    assert jnp.allclose(out["Rs_extra"], ref["Rs_extra"], atol=2e-5, rtol=2e-5)

    # Multi-tile path: exercises the "parallel" row-tile grid (2 tiles of 256 rows).
    N2 = 300
    t2 = jax.random.normal(k_t2, (N2, T_IN), jnp.float32)
    p2 = jax.random.normal(k_p2, (N2, P_IN), jnp.float32)
    out2 = extra_pose_tuner(t2, p2, w_stack, b_slab)
    jax.block_until_ready(out2)
    ref2 = reference(t2, p2, ws, bs)
    assert out2["Rs_extra"].shape == (N2, 3, 3) and out2["rvec_extra"].shape == (N2, 3)
    assert jnp.allclose(out2["rvec_extra"], ref2["rvec_extra"], atol=1e-4, rtol=1e-4)
    assert jnp.allclose(out2["Rs_extra"], ref2["Rs_extra"], atol=1e-4, rtol=1e-4)

    print("KERNEL_OK")
</pallas_src>

<mosaic_0001>
module attributes {stable_mosaic.version = 11 : i64} {
  func.func @pose_tuner_kernel(%arg0: i32, %arg1: memref<8x128xf32, #tpu.memory_space<vmem>>, %arg2: memref<8x128x128xf32, #tpu.memory_space<vmem>>, %arg3: memref<8x128xf32, #tpu.memory_space<vmem>>, %arg4: memref<8x128xf32, #tpu.memory_space<vmem>>) attributes {dimension_semantics = [#tpu.dimension_semantics<parallel>], iteration_bounds = array<i64: 1>, scalar_prefetch = 0 : i64, scratch_operands = 0 : i64, tpu.core_type = #tpu.core_type<tc>, window_params = [{transform_indices = @transform_0, window_bounds = array<i64: 8, 128>}, {pipeline_mode = #tpu.pipeline_mode<synchronous>, transform_indices = @transform_1, window_bounds = array<i64: 8, 128, 128>}, {pipeline_mode = #tpu.pipeline_mode<synchronous>, transform_indices = @transform_2, window_bounds = array<i64: 8, 128>}, {transform_indices = @transform_3, window_bounds = array<i64: 8, 128>}]} {
    %c0 = arith.constant 0 : index
    %c0_0 = arith.constant 0 : index
    %0 = vector.load %arg1[%c0, %c0_0] : memref<8x128xf32, #tpu.memory_space<vmem>>, vector<8x128xf32>
    %c7 = arith.constant 7 : index
    %c0_1 = arith.constant 0 : index
    %1 = vector.load %arg3[%c7, %c0_1] : memref<8x128xf32, #tpu.memory_space<vmem>>, vector<1x128xf32>
    %2 = vector.broadcast %1 : vector<1x128xf32> to vector<8x128xf32>
    %3 = arith.mulf %0, %2 : vector<8x128xf32>
    %c6 = arith.constant 6 : index
    %c0_2 = arith.constant 0 : index
    %4 = vector.load %arg3[%c6, %c0_2] : memref<8x128xf32, #tpu.memory_space<vmem>>, vector<1x128xf32>
    %5 = math.sin %3 : vector<8x128xf32>
    %6 = vector.broadcast %4 : vector<1x128xf32> to vector<8x128xf32>
    %7 = arith.mulf %6, %5 : vector<8x128xf32>
    %cst = arith.constant 1.000000e+00 : f32
    %8 = vector.broadcast %cst : f32 to vector<1x128xf32>
    %9 = arith.subf %8, %4 : vector<1x128xf32>
    %10 = math.cos %3 : vector<8x128xf32>
    %11 = vector.broadcast %9 : vector<1x128xf32> to vector<8x128xf32>
    %12 = arith.mulf %11, %10 : vector<8x128xf32>
    %13 = arith.addf %7, %12 : vector<8x128xf32>
    %c0_3 = arith.constant 0 : index
    %c0_4 = arith.constant 0 : index
    %c0_5 = arith.constant 0 : index
    %14 = vector.load %arg2[%c0_3, %c0_4, %c0_5] : memref<8x128x128xf32, #tpu.memory_space<vmem>>, vector<1x128x128xf32>
    %15 = vector.shape_cast %14 : vector<1x128x128xf32> to vector<128x128xf32>
    %cst_6 = arith.constant dense<0.000000e+00> : vector<8x128xf32>
    %16 = tpu.matmul %13, %15, %cst_6 {dimension_numbers = #tpu.dot_dimension_numbers<[1], [0], [0], [1], [0, 0, 1, 1], [], []>, precision = #tpu.contract_precision<fp32>} : vector<8x128xf32>, vector<128x128xf32>, vector<8x128xf32> -> vector<8x128xf32>
    %c0_7 = arith.constant 0 : index
    %c0_8 = arith.constant 0 : index
    %17 = vector.load %arg3[%c0_7, %c0_8] : memref<8x128xf32, #tpu.memory_space<vmem>>, vector<1x128xf32>
    %18 = vector.broadcast %17 : vector<1x128xf32> to vector<8x128xf32>
    %19 = arith.addf %16, %18 : vector<8x128xf32>
    %cst_9 = arith.constant 0.000000e+00 : f32
    %20 = vector.broadcast %cst_9 : f32 to vector<8x128xf32>
    %21 = arith.maximumf %19, %20 : vector<8x128xf32>
    %c1 = arith.constant 1 : index
    %c0_10 = arith.constant 0 : index
    %c0_11 = arith.constant 0 : index
    %22 = vector.load %arg2[%c1, %c0_10, %c0_11] : memref<8x128x128xf32, #tpu.memory_space<vmem>>, vector<1x128x128xf32>
    %23 = vector.shape_cast %22 : vector<1x128x128xf32> to vector<128x128xf32>
    %cst_12 = arith.constant dense<0.000000e+00> : vector<8x128xf32>
    %24 = tpu.matmul %21, %23, %cst_12 {dimension_numbers = #tpu.dot_dimension_numbers<[1], [0], [0], [1], [0, 0, 1, 1], [], []>, precision = #tpu.contract_precision<fp32>} : vector<8x128xf32>, vector<128x128xf32>, vector<8x128xf32> -> vector<8x128xf32>
    %c1_13 = arith.constant 1 : index
    %c0_14 = arith.constant 0 : index
    %25 = vector.load %arg3[%c1_13, %c0_14] : memref<8x128xf32, #tpu.memory_space<vmem>>, vector<1x128xf32>
    %26 = vector.broadcast %25 : vector<1x128xf32> to vector<8x128xf32>
    %27 = arith.addf %24, %26 : vector<8x128xf32>
    %cst_15 = arith.constant 0.000000e+00 : f32
    %28 = vector.broadcast %cst_15 : f32 to vector<8x128xf32>
    %29 = arith.maximumf %27, %28 : vector<8x128xf32>
    %c2 = arith.constant 2 : index
    %c0_16 = arith.constant 0 : index
    %c0_17 = arith.constant 0 : index
    %30 = vector.load %arg2[%c2, %c0_16, %c0_17] : memref<8x128x128xf32, #tpu.memory_space<vmem>>, vector<1x128x128xf32>
    %31 = vector.shape_cast %30 : vector<1x128x128xf32> to vector<128x128xf32>
    %cst_18 = arith.constant dense<0.000000e+00> : vector<8x128xf32>
    %32 = tpu.matmul %29, %31, %cst_18 {dimension_numbers = #tpu.dot_dimension_numbers<[1], [0], [0], [1], [0, 0, 1, 1], [], []>, precision = #tpu.contract_precision<fp32>} : vector<8x128xf32>, vector<128x128xf32>, vector<8x128xf32> -> vector<8x128xf32>
    %c2_19 = arith.constant 2 : index
    %c0_20 = arith.constant 0 : index
    %33 = vector.load %arg3[%c2_19, %c0_20] : memref<8x128xf32, #tpu.memory_space<vmem>>, vector<1x128xf32>
    %34 = vector.broadcast %33 : vector<1x128xf32> to vector<8x128xf32>
    %35 = arith.addf %32, %34 : vector<8x128xf32>
    %cst_21 = arith.constant 0.000000e+00 : f32
    %36 = vector.broadcast %cst_21 : f32 to vector<8x128xf32>
    %37 = arith.maximumf %35, %36 : vector<8x128xf32>
    %c3 = arith.constant 3 : index
    %c0_22 = arith.constant 0 : index
    %c0_23 = arith.constant 0 : index
    %38 = vector.load %arg2[%c3, %c0_22, %c0_23] : memref<8x128x128xf32, #tpu.memory_space<vmem>>, vector<1x128x128xf32>
    %39 = vector.shape_cast %38 : vector<1x128x128xf32> to vector<128x128xf32>
    %cst_24 = arith.constant dense<0.000000e+00> : vector<8x128xf32>
    %40 = tpu.matmul %37, %39, %cst_24 {dimension_numbers = #tpu.dot_dimension_numbers<[1], [0], [0], [1], [0, 0, 1, 1], [], []>, precision = #tpu.contract_precision<fp32>} : vector<8x128xf32>, vector<128x128xf32>, vector<8x128xf32> -> vector<8x128xf32>
    %c3_25 = arith.constant 3 : index
    %c0_26 = arith.constant 0 : index
    %41 = vector.load %arg3[%c3_25, %c0_26] : memref<8x128xf32, #tpu.memory_space<vmem>>, vector<1x128xf32>
    %42 = vector.broadcast %41 : vector<1x128xf32> to vector<8x128xf32>
    %43 = arith.addf %40, %42 : vector<8x128xf32>
    %cst_27 = arith.constant 0.000000e+00 : f32
    %44 = vector.broadcast %cst_27 : f32 to vector<8x128xf32>
    %45 = arith.maximumf %43, %44 : vector<8x128xf32>
    %c4 = arith.constant 4 : index
    %c0_28 = arith.constant 0 : index
    %c0_29 = arith.constant 0 : index
    %46 = vector.load %arg2[%c4, %c0_28, %c0_29] : memref<8x128x128xf32, #tpu.memory_space<vmem>>, vector<1x128x128xf32>
    %47 = vector.shape_cast %46 : vector<1x128x128xf32> to vector<128x128xf32>
    %cst_30 = arith.constant dense<0.000000e+00> : vector<8x128xf32>
    %48 = tpu.matmul %45, %47, %cst_30 {dimension_numbers = #tpu.dot_dimension_numbers<[1], [0], [0], [1], [0, 0, 1, 1], [], []>, precision = #tpu.contract_precision<fp32>} : vector<8x128xf32>, vector<128x128xf32>, vector<8x128xf32> -> vector<8x128xf32>
    %c4_31 = arith.constant 4 : index
    %c0_32 = arith.constant 0 : index
    %49 = vector.load %arg3[%c4_31, %c0_32] : memref<8x128xf32, #tpu.memory_space<vmem>>, vector<1x128xf32>
    %50 = vector.broadcast %49 : vector<1x128xf32> to vector<8x128xf32>
    %51 = arith.addf %48, %50 : vector<8x128xf32>
    %52 = arith.mulf %51, %51 : vector<8x128xf32>
    %cst_33 = arith.constant dense<0.000000e+00> : vector<8xf32>
    %53 = vector.multi_reduction <add>, %52, %cst_33 [1] : vector<8x128xf32> to vector<8xf32>
    %54 = vector.shape_cast %53 : vector<8xf32> to vector<8x1xf32>
    %cst_34 = arith.constant 9.99999974E-6 : f32
    %55 = vector.broadcast %cst_34 : f32 to vector<8x1xf32>
    %56 = arith.addf %55, %54 : vector<8x1xf32>
    %57 = math.sqrt %56 : vector<8x1xf32>
    %58 = vector.broadcast %57 : vector<8x1xf32> to vector<8x128xf32>
    %59 = arith.divf %51, %58 : vector<8x128xf32>
    %60 = math.cos %57 : vector<8x1xf32>
    %61 = math.sin %57 : vector<8x1xf32>
    %c5 = arith.constant 5 : index
    %c0_35 = arith.constant 0 : index
    %c0_36 = arith.constant 0 : index
    %62 = vector.load %arg2[%c5, %c0_35, %c0_36] : memref<8x128x128xf32, #tpu.memory_space<vmem>>, vector<1x128x128xf32>
    %63 = vector.shape_cast %62 : vector<1x128x128xf32> to vector<128x128xf32>
    %cst_37 = arith.constant dense<0.000000e+00> : vector<8x128xf32>
    %64 = tpu.matmul %59, %63, %cst_37 {dimension_numbers = #tpu.dot_dimension_numbers<[1], [0], [0], [1], [0, 0, 1, 1], [], []>, precision = #tpu.contract_precision<fp32>} : vector<8x128xf32>, vector<128x128xf32>, vector<8x128xf32> -> vector<8x128xf32>
    %c6_38 = arith.constant 6 : index
    %c0_39 = arith.constant 0 : index
    %c0_40 = arith.constant 0 : index
    %65 = vector.load %arg2[%c6_38, %c0_39, %c0_40] : memref<8x128x128xf32, #tpu.memory_space<vmem>>, vector<1x128x128xf32>
    %66 = vector.shape_cast %65 : vector<1x128x128xf32> to vector<128x128xf32>
    %cst_41 = arith.constant dense<0.000000e+00> : vector<8x128xf32>
    %67 = tpu.matmul %59, %66, %cst_41 {dimension_numbers = #tpu.dot_dimension_numbers<[1], [0], [0], [1], [0, 0, 1, 1], [], []>, precision = #tpu.contract_precision<fp32>} : vector<8x128xf32>, vector<128x128xf32>, vector<8x128xf32> -> vector<8x128xf32>
    %c7_42 = arith.constant 7 : index
    %c0_43 = arith.constant 0 : index
    %c0_44 = arith.constant 0 : index
    %68 = vector.load %arg2[%c7_42, %c0_43, %c0_44] : memref<8x128x128xf32, #tpu.memory_space<vmem>>, vector<1x128x128xf32>
    %69 = vector.shape_cast %68 : vector<1x128x128xf32> to vector<128x128xf32>
    %cst_45 = arith.constant dense<0.000000e+00> : vector<8x128xf32>
    %70 = tpu.matmul %59, %69, %cst_45 {dimension_numbers = #tpu.dot_dimension_numbers<[1], [0], [0], [1], [0, 0, 1, 1], [], []>, precision = #tpu.contract_precision<fp32>} : vector<8x128xf32>, vector<128x128xf32>, vector<8x128xf32> -> vector<8x128xf32>
    %c5_46 = arith.constant 5 : index
    %c0_47 = arith.constant 0 : index
    %71 = vector.load %arg3[%c5_46, %c0_47] : memref<8x128xf32, #tpu.memory_space<vmem>>, vector<1x128xf32>
    %cst_48 = arith.constant 1.000000e+00 : f32
    %72 = vector.broadcast %cst_48 : f32 to vector<8x1xf32>
    %73 = arith.subf %72, %60 : vector<8x1xf32>
    %74 = arith.mulf %64, %67 : vector<8x128xf32>
    %75 = vector.broadcast %73 : vector<8x1xf32> to vector<8x128xf32>
    %76 = arith.mulf %75, %74 : vector<8x128xf32>
    %77 = arith.addf %51, %76 : vector<8x128xf32>
    %78 = vector.broadcast %60 : vector<8x1xf32> to vector<8x128xf32>
    %79 = vector.broadcast %71 : vector<1x128xf32> to vector<8x128xf32>
    %80 = arith.mulf %78, %79 : vector<8x128xf32>
    %81 = arith.addf %77, %80 : vector<8x128xf32>
    %82 = vector.broadcast %61 : vector<8x1xf32> to vector<8x128xf32>
    %83 = arith.mulf %82, %70 : vector<8x128xf32>
    %84 = arith.addf %81, %83 : vector<8x128xf32>
    %c0_49 = arith.constant 0 : index
    %c0_50 = arith.constant 0 : index
    %85 = vector.load %arg4[%c0_49, %c0_50] : memref<8x128xf32, #tpu.memory_space<vmem>>, vector<8x128xf32>
    tpu.vector_store %arg4[%c0_49, %c0_50], %84 {strides = array<i32>} : memref<8x128xf32, #tpu.memory_space<vmem>>, vector<8x128xf32>,
    return
  }
  func.func @transform_0(%arg0: i32) -> (i32, i32) {
    %c0_i32 = arith.constant 0 : i32
    %c0_i32_0 = arith.constant 0 : i32
    return %arg0, %c0_i32 : i32, i32
  }
  func.func @transform_1(%arg0: i32) -> (i32, i32, i32) {
    %c0_i32 = arith.constant 0 : i32
    %c0_i32_0 = arith.constant 0 : i32
    %c0_i32_1 = arith.constant 0 : i32
    %c0_i32_2 = arith.constant 0 : i32
    return %c0_i32, %c0_i32_0, %c0_i32_1 : i32, i32, i32
  }
  func.func @transform_2(%arg0: i32) -> (i32, i32) {
    %c0_i32 = arith.constant 0 : i32
    %c0_i32_0 = arith.constant 0 : i32
    %c0_i32_1 = arith.constant 0 : i32
    return %c0_i32, %c0_i32_0 : i32, i32
  }
  func.func @transform_3(%arg0: i32) -> (i32, i32) {
    %c0_i32 = arith.constant 0 : i32
    %c0_i32_0 = arith.constant 0 : i32
    return %arg0, %c0_i32 : i32, i32
  }
}

</mosaic_0001>

<bundles_post_ra>
// kernel: extra_pose_tuner.1
= control target key start
LH: loop header
LB: loop body
LE: loop exit
PB: predicated region body
PF: predicated region fallthrough
CT: control target
= control target key end

     0   :  { %8 = vsyncpa [#allocation3], 0  ;;  %s9598_s12 = smov [#allocation2]   ;;  %s12123_s0 = inlined_call_operand.vmem [shape: f32[8,128], index: 0, kind: input, shape index: {}]   ;;  %s12124_s1 = inlined_call_operand.hbm [shape: f32[8,128,128], index: 1, kind: input, shape index: {}]   ;;  %s12125_s2 = inlined_call_operand.vmem [shape: f32[8,128], index: 2, kind: input, shape index: {}]   ;;  %s12126_s3 = inlined_call_operand.vmem [shape: f32[8,128], index: 3, kind: output, shape index: {}]  }
   0x1   :  { %s16_s13 = sshll.u32 %s9598_s12, 4  ;;  %s9574_s16 = scalar_lea.hbm %s12124_s1, 16384  ;;  %s17_s13 = int_to_ptr.vmem [resolvable:$true] %s16_s13 }
   0x2   :  { %p9575_p0 = scmp.ne.s32.totalorder %s12124_s1, %s9574_s16  ;;  %p9578_p1 = scmp.lt.u32.totalorder %s9574_s16, %s12124_s1 }
   0x4   :  { %p9580_p2 = pnand %p9578_p1, %p9575_p0 }
   0x6   :  { %9583 = shalt.err (!%p9580_p2)
}
   0x7   :  { %s9584_s21 = scalar_lea.vmem %s17_s13, 16384  ;;  %p9589_p4 = scmp.lt.s32.totalorder %s17_s13, %s17_s13 }
   0x8   :  { %p9585_p3 = scmp.ne.s32.totalorder %s17_s13, %s9584_s21  ;;  %p9590_p5 = scmp.lt.s32.totalorder %s9584_s21, %s9584_s21 }
   0xa   :  { %p9591_p6 = por %p9590_p5, %p9589_p4 }
   0xc   :  { %p9592_p7 = pnand %p9591_p6, %p9585_p3 }
   0xe   :  { %9595 = shalt.err (!%p9592_p7)
}
   0xf   :  { %s9599_s22 = smov 128   ;;  %s9600_s23 = smov 8  }
  0x10   :  { %22 = dma.hbm_to_vmem [thread:$0]  %s12124_s1, 16384, %s17_s13, [#allocation3], %s9599_s22, %s9599_s22, %s9600_s23  }
  0x11   :  { %9596 = dma.done.wait [#allocation3], 16384  }
  0x12   :  { %9597 = vsyncadd [#allocation3], 4294950912  ;;  %v12198_v0 = vmov 0.0|0.0   ;;  %vm9602_vm0 = vmmov 0   ;;  %v12133_v1 = vmov 0.0   ;;  %v255_v2 = vld [vmem:[#allocation2] sm:$0xff] }
  0x13   :  { %8305 = vmatprep.subr.bf16.mxu0 %v12198_v0  ;;  %6657 = vmatprep.mubr.msk.f32.mxu0 %vm9602_vm0, %v12133_v1  ;;  %v256_v3 = vld [vmem:[#allocation2 + $0x8] sm:$0xff]  ;;  %v257_v4 = vld [vmem:[#allocation2 + $0x10] sm:$0xff]  ;;  %v277_v5 = vand.u32 4294901760, %v255_v2  ;;  %v258_v7 = vld [vmem:[#allocation2 + $0x18] sm:$0xff] }
  0x14   :  { %8449 = vmatprep.subr.bf16.mxu1 %v12198_v0  ;;  %6867 = vmatprep.mubr.msk.f32.mxu1 %vm9602_vm0, %v12133_v1  ;;  %v280_v6 = vand.u32 4294901760, %v256_v3  ;;  %v283_v8 = vand.u32 4294901760, %v257_v4  ;;  %v259_v9 = vld [vmem:[#allocation2 + $0x20] sm:$0xff]  ;;  %v260_v10 = vld [vmem:[#allocation2 + $0x28] sm:$0xff]  ;;  %v286_v11 = vand.u32 4294901760, %v258_v7  ;;  %v261_v14 = vld [vmem:[#allocation2 + $0x30] sm:$0xff] }
  0x15   :  { %v289_v12 = vand.u32 4294901760, %v259_v9  ;;  %v292_v13 = vand.u32 4294901760, %v260_v10  ;;  %v262_v15 = vld [vmem:[#allocation2 + $0x38] sm:$0xff]  ;;  %v263_v16 = vld [vmem:[#allocation2 + $0x40] sm:$0xff]  ;;  %v9650_v18 = vsub.f32 %v255_v2, %v277_v5  ;;  %v264_v21 = vld [vmem:[#allocation2 + $0x48] sm:$0xff]  ;;  %v295_v29 = vand.u32 4294901760, %v261_v14 }
  0x16   :  { %v9648_v17 = vpack.c.bf16 %v280_v6, %v277_v5  ;;  %v9652_v19 = vsub.f32 %v256_v3, %v280_v6  ;;  %v9654_v20 = vsub.f32 %v257_v4, %v283_v8  ;;  %v265_v22 = vld [vmem:[#allocation2 + $0x50] sm:$0xff]  ;;  %v266_v23 = vld [vmem:[#allocation2 + $0x58] sm:$0xff]  ;;  %v9656_v24 = vpack.c.bf16 %v286_v11, %v283_v8  ;;  %v267_v27 = vld [vmem:[#allocation2 + $0x60] sm:$0xff] }
  0x17   :  { %v9658_v25 = vsub.f32 %v258_v7, %v286_v11  ;;  %v9660_v26 = vsub.f32 %v259_v9, %v289_v12  ;;  %v9663_v28 = vsub.f32 %v260_v10, %v292_v13  ;;  %v298_v30 = vand.u32 4294901760, %v262_v15  ;;  %v268_v35 = vld [vmem:[#allocation2 + $0x68] sm:$0xff]  ;;  %v269_v36 = vld [vmem:[#allocation2 + $0x70] sm:$0xff]  ;;  %v270_v41 = vld [vmem:[#allocation2 + $0x78] sm:$0xff] }
  0x18   :  { %8307 = vmatpush3.bf16.msra.mxu0 %v9648_v17  ;;  %v301_v31 = vand.u32 4294901760, %v263_v16  ;;  %v304_v32 = vand.u32 4294901760, %v264_v21  ;;  %v307_v33 = vand.u32 4294901760, %v265_v22  ;;  %v310_v34 = vand.u32 4294901760, %v266_v23  ;;  %v28_v42 = vld [vmem:[%s12123_s0] sm:$0xff] }
  0x19   :  { %8308 = vmatprep.subr.bf16.mxu0 %v12198_v0  ;;  %v9666_v37 = vsub.f32 %v261_v14, %v295_v29  ;;  %v9668_v38 = vsub.f32 %v262_v15, %v298_v30  ;;  %v313_v40 = vand.u32 4294901760, %v267_v27  ;;  %v5786_v43 = vld [vmem:[%s12125_s2 + $0x7] ss:$0 sm:$0xff]  ;;  %v9678_v44 = vpack.c.bf16 %v292_v13, %v289_v12 }
  0x1a   :  { %v9670_v39 = vsub.f32 %v263_v16, %v301_v31  ;;  %v9680_v45 = vsub.f32 %v264_v21, %v304_v32  ;;  %v9682_v46 = vsub.f32 %v265_v22, %v307_v33  ;;  %v9685_v47 = vsub.f32 %v266_v23, %v310_v34 }
  0x1b   :  { %v316_v48 = vand.u32 4294901760, %v268_v35  ;;  %v9687_v49 = vsub.f32 %v267_v27, %v313_v40  ;;  %v319_v50 = vand.u32 4294901760, %v269_v36  ;;  %v322_v51 = vand.u32 4294901760, %v270_v41 }
  0x1c   :  { %8310 = vmatpush3.bf16.msra.mxu0 %v9656_v24  ;;  %v9690_v52 = vmul.f32 %v5786_v43, %v28_v42  ;;  %v370_v55 = vand.u32 4294901760, %v9650_v18  ;;  %v9697_v56 = vpack.c.bf16 %v298_v30, %v295_v29  ;;  %v9699_v57 = vpack.c.bf16 %v304_v32, %v301_v31 }
  0x1d   :  { %8311 = vmatprep.subr.bf16.mxu0 %v12198_v0  ;;  %v9692_v53 = vsub.f32 %v268_v35, %v316_v48  ;;  %v9694_v54 = vsub.f32 %v269_v36, %v319_v50  ;;  %v9701_v58 = vsub.f32 %v270_v41, %v322_v51  ;;  %v9705_v60 = vpack.c.bf16 %v310_v34, %v307_v33 }
  0x1e   :  { %v36_v59 = vand.u32 2147483647, %v9690_v52  ;;  %v9707_v61 = vpack.c.bf16 %v316_v48, %v313_v40  ;;  %v39_v62 = vand.u32 2139095040, %v9690_v52  ;;  %v371_v63 = vsub.f32 %v9650_v18, %v370_v55 }
  0x1f   :  { %v9714_v2 = vpack.c.bf16 %v322_v51, %v319_v50  ;;  %v377_v4 = vand.u32 4294901760, %v9652_v19  ;;  %v384_v5 = vand.u32 4294901760, %v9654_v20  ;;  %v12135_v8 = vand.u32 4294901760, %v9658_v25 }
  0x20   :  { %8313 = vmatpush3.bf16.msra.mxu0 %v9678_v44  ;;  %v43_v3 = vand.u32 8388607, %v36_v59  ;;  %v40_v6 = vshrl.u32 %v39_v62, 23  ;;  %v372_v7 = vand.u32 4294901760, %v371_v63  ;;  %v12132_v9 = vand.u32 4294901760, %v9660_v26 }
  0x21   :  { %8314 = vmatprep.subr.bf16.mxu0 %v12198_v0  ;;  %v378_v11 = vsub.f32 %v9652_v19, %v377_v4  ;;  %v385_v12 = vsub.f32 %v9654_v20, %v384_v5  ;;  %v12131_v13 = vand.u32 4294901760, %v9663_v28  ;;  %v392_v15 = vsub.f32 %v9658_v25, %v12135_v8 }
  0x22   :  { %v44_v10 = vor.u32 8388608, %v43_v3  ;;  %v5787_v14 = vadd.s32 4294967169, %v40_v6  ;;  %v399_v16 = vsub.f32 %v9660_v26, %v12132_v9  ;;  %v12130_v21 = vand.u32 4294901760, %v9666_v37 }
  0x23   :  { %v379_v23 = vand.u32 4294901760, %v378_v11  ;;  %v386_v27 = vand.u32 4294901760, %v385_v12  ;;  %v406_v29 = vsub.f32 %v9663_v28, %v12131_v13  ;;  %v393_v31 = vand.u32 4294901760, %v392_v15 }
  0x24   :  { %8316 = vmatpush3.bf16.msra.mxu0 %v9697_v56  ;;  %v9738_v22 = vshll.u32 %v44_v10, 8  ;;  %v46_v30 = vadd.s32 1, %v5787_v14  ;;  %v400_v32 = vand.u32 4294901760, %v399_v16  ;;  %v413_v33 = vsub.f32 %v9666_v37, %v12130_v21 }
  0x25   :  { %8317 = vmatprep.subr.bf16.mxu0 %v12198_v0  ;;  %v9746_v34 = vpack.c.bf16 %v379_v23, %v372_v7  ;;  %v407_v35 = vand.u32 4294901760, %v406_v29  ;;  %v12129_v36 = vand.u32 4294901760, %v9668_v38  ;;  %v12128_v40 = vand.u32 4294901760, %v9670_v39 }
  0x26   :  { %vm47_vm1 = vcmp.gt.s32.totalorder %v46_v30, 0  ;;  %v9751_v41 = vpack.c.bf16 %v393_v31, %v386_v27  ;;  %v414_v42 = vand.u32 4294901760, %v413_v33  ;;  %v12127_v43 = vand.u32 4294901760, %v9680_v45 }
  0x27   :  { %v48_v48 = vsel %vm47_vm1, %v46_v30, 0  ;;  %v9755_v50 = vpack.c.bf16 %v407_v35, %v400_v32  ;;  %v420_v51 = vsub.f32 %v9668_v38, %v12129_v36  ;;  %v427_v62 = vsub.f32 %v9670_v39, %v12128_v40 }
  0x28   :  { %8319 = vmatpush3.bf16.msra.mxu0 %v9699_v57  ;;  %v49_v63 = vshrl.u32 %v48_v48, 5  ;;  %v50_v3 = vand.u32 31, %v48_v48  ;;  %v434_v6 = vsub.f32 %v9680_v45, %v12127_v43  ;;  %v12150_v7 = vand.u32 4294901760, %v9682_v46 }
  0x29   :  { %8320 = vmatprep.subr.bf16.mxu0 %v12198_v0  ;;  %v421_v10 = vand.u32 4294901760, %v420_v51  ;;  %v428_v11 = vand.u32 4294901760, %v427_v62  ;;  %v12149_v12 = vand.u32 4294901760, %v9685_v47  ;;  %v454_v14 = vand.u32 4294901760, %v9687_v49 }
  0x2a   :  { %v51_v15 = vsub.s32 32, %v50_v3  ;;  %v12136_v16 = vmov 683565275   ;;  %v12140_v27 = vmov 2475754826   ;;  %vm68_vm2 = vcmp.lt.s32.totalorder %v49_v63, 1 }
  0x2b   :  { %v53_v23 = vshll.u32 %v12136_v16, %v50_v3  ;;  %v56_v29 = vshll.u32 %v12140_v27, %v50_v3  ;;  %v12138_v30 = vmov 2131351028   ;;  %v12142_v32 = vmov 2102212464  }
  0x2c   :  { %8322 = vmatpush3.bf16.msra.mxu0 %v9705_v60  ;;  %v59_v31 = vshll.u32 %v12138_v30, %v50_v3  ;;  %v62_v33 = vshll.u32 %v12142_v32, %v50_v3  ;;  %v12145_v35 = vmov 920167782   ;;  %vm69_vm3 = vcmp.lt.s32.totalorder %v49_v63, 2 }
  0x2d   :  { %8323 = vmatprep.subr.bf16.mxu0 %v12198_v0  ;;  %v65_v48 = vshll.u32 %v12145_v35, %v50_v3  ;;  %v52_v51 = vshrl.u32 %v12136_v16, %v51_v15  ;;  %v54_v62 = vshrl.u32 %v12140_v27, %v51_v15  ;;  %v57_v43 = vshrl.u32 %v12138_v30, %v51_v15 }
  0x2e   :  { %v60_v40 = vshrl.u32 %v12142_v32, %v51_v15  ;;  %v63_v36 = vshrl.u32 %v12145_v35, %v51_v15  ;;  %v12144_v21 = vmov 1326507024   ;;  %vm70_vm4 = vcmp.lt.s32.totalorder %v49_v63, 3 }
  0x2f   :  { %v66_v13 = vshrl.u32 %v12144_v21, %v51_v15  ;;  %vm71_vm5 = vcmp.lt.s32.totalorder %v49_v63, 4  ;;  %v55_v3 = vor.u32 %v54_v62, %v53_v23  ;;  %v58_v9 = vor.u32 %v57_v43, %v56_v29 }
  0x30   :  { %8325 = vmatpush3.bf16.msra.mxu0 %v9707_v61  ;;  %v61_v1 = vor.u32 %v60_v40, %v59_v31  ;;  %v9783_v8 = vpack.c.bf16 %v421_v10, %v414_v42  ;;  %v64_v16 = vor.u32 %v63_v36, %v62_v33  ;;  %v435_v27 = vand.u32 4294901760, %v434_v6 }
  0x31   :  { %8326 = vmatprep.subr.bf16.mxu0 %v12198_v0  ;;  %v67_v30 = vor.u32 %v66_v13, %v65_v48  ;;  %v441_v32 = vsub.f32 %v9682_v46, %v12150_v7  ;;  %v72_v15 = vsel %vm68_vm2, %v52_v51, %v55_v3  ;;  %v76_v35 = vsel %vm68_vm2, %v55_v3, %v58_v9 }
  0x32   :  { %v73_v21 = vsel %vm71_vm5, %v61_v1, 2102212464  ;;  %v80_v43 = vsel %vm68_vm2, %v58_v9, %v61_v1  ;;  %v77_v42 = vsel %vm71_vm5, %v64_v16, 920167782  ;;  %v9796_v13 = vpack.c.bf16 %v435_v27, %v428_v11 }
  0x33   :  { %v74_v40 = vsel %vm70_vm4, %v58_v9, %v73_v21  ;;  %v81_v36 = vsel %vm71_vm5, %v67_v30, 1326507024  ;;  %v78_v10 = vsel %vm70_vm4, %v61_v1, %v77_v42  ;;  %v442_v29 = vand.u32 4294901760, %v441_v32 }
  0x34   :  { %8328 = vmatpush3.bf16.msra.mxu0 %v9714_v2  ;;  %v75_v6 = vsel %vm69_vm3, %v72_v15, %v74_v40  ;;  %v82_v23 = vsel %vm70_vm4, %v64_v16, %v81_v36  ;;  %v79_v31 = vsel %vm69_vm3, %v76_v35, %v78_v10  ;;  %v448_v11 = vsub.f32 %v9685_v47, %v12149_v12 }
  0x35   :  { %8329 = vmatprep.subr.bf16.mxu0 %v12198_v0  ;;  %v83_v9 = vsel %vm69_vm3, %v80_v43, %v82_v23  ;;  %v91_v21 = vmul.u32 %v9738_v22, %v75_v6  ;;  %v9814_v1 = vmul.u32.u64.low %v9738_v22, %v79_v31  ;;  %v9815_v16 = vmul.u32.u64.high %v9738_v22, %v79_v31, %v9814_v1 }
  0x36   :  { %v9810_v27 = vmul.u32.u64.low %v9738_v22, %v83_v9  ;;  %v9811_v30 = vmul.u32.u64.high %v9738_v22, %v83_v9, %v9810_v27  ;;  %v449_v32 = vand.u32 4294901760, %v448_v11  ;;  %v455_v63 = vsub.f32 %v9687_v49, %v454_v14 }
  0x37   :  { %v461_v33 = vand.u32 4294901760, %v9692_v53  ;;  %v12148_v35 = vand.u32 4294901760, %v9694_v54  ;;  %v12147_v48 = vand.u32 4294901760, %v9701_v58  ;;  %v8354_v51 = vpack.c.bf16 %v9652_v19, %v9650_v18 }
  0x38   :  { %v9829_v3 = vpack.c.bf16 %v449_v32, %v442_v29  ;;  %v456_v15 = vand.u32 4294901760, %v455_v63  ;;  %vm93_vm6 = vc.u32 %v9811_v30, %v9814_v1  ;;  %v94_v42 = vadd.s32 1, %v9815_v16 }
  0x39   :  { %v462_v43 = vsub.f32 %v9692_v53, %v461_v33  ;;  %v469_v40 = vsub.f32 %v9694_v54, %v12148_v35  ;;  %v476_v36 = vsub.f32 %v9701_v58, %v12147_v48  ;;  %v92_v11 = vadd.s32 %v9814_v1, %v9811_v30 }
  0x3a   :  { %v95_v31 = vsel %vm93_vm6, %v94_v42, %v9815_v16  ;;  %vm38_vm8 = vcmp.lt.s32.totalorder %v9690_v52, 0  ;;  %vm37_vm9 = vcmp.le.f32.partialorder %v36_v59, 0.7853982  ;;  %vm128_vm1 = vweird.f32 %v9690_v52 }
  0x3b   :  { %v463_v6 = vand.u32 4294901760, %v462_v43  ;;  %v470_v10 = vand.u32 4294901760, %v469_v40  ;;  %v477_v9 = vand.u32 4294901760, %v476_v36  ;;  %v96_v32 = vadd.s32 %v95_v31, %v91_v21 }
  0x3d   :  { %v9851_v63 = vpack.c.bf16 %v463_v6, %v456_v15  ;;  %v9855_v40 = vpack.c.bf16 %v477_v9, %v470_v10  ;;  %v97_v48 = vadd.s32 536870912, %v96_v32 }
  0x3f   :  { %v98_v35 = vshrl.u32 %v97_v48, 30 }
  0x41   :  { %v99_v12 = vshll.u32 %v98_v35, 30  ;;  %v122_v62 = vsub.s32 4, %v98_v35 }
  0x43   :  { %v100_v7 = vsub.s32 %v96_v32, %v99_v12  ;;  %v123_v1 = vsel %vm38_vm8, %v122_v62, %v98_v35  ;;  %v35_v32 = vld [vmem:[%s12125_s2 + $0x6] sm:$0x1] }
  0x45   :  { %v102_v16 = vsub.s32 0, %v100_v7 }
  0x47   :  { %v5788_v42 = vmin.u32 %v102_v16, %v100_v7  ;;  %v145_v16 = vsub.f32 1.0, %v35_v32 }
  0x49   :  { %v104_v36 = vclz %v5788_v42 }
  0x4b   :  { %v5789_v29 = vadd.s32 4294967294, %v104_v36 }
  0x4d   :  { %vm5790_vm7 = vcmp.lt.s32.totalorder %v5789_v29, 0 }
  0x4e   :  { %v107_v27 = vsel %vm5790_vm7, 0, %v5789_v29 }
  0x4f   :  { %v108_v21 = vsub.s32 32, %v107_v27  ;;  %v109_v15 = vshll.u32 %v100_v7, %v107_v27  ;;  %v112_v6 = vsub.s32 4294967266, %v107_v27  ;;  %v9865_v7 = vpack.c.bf16 %v377_v4, %v370_v55 }
  0x50   :  { %v140_v27 = vlaneseq }
  0x51   :  { %v110_v31 = vshrl.u32 %v92_v11, %v108_v21  ;;  %v113_v23 = vadd.s32 127, %v112_v6  ;;  %v125_v11 = vsel %vm37_vm9, 0, %v123_v1 }
  0x52   :  { %v129_v35 = vadd.s32 3, %v125_v11  ;;  %v141_v62 = vshrl.u32 %v140_v27, 7  ;;  %v239_v4 = vand.u32 3, %v125_v11 }
  0x53   :  { %v111_v43 = vor.u32 %v110_v31, %v109_v15  ;;  %v114_v10 = vshll.u32 %v113_v23, 23 }
  0x54   :  { %v130_v55 = vand.u32 3, %v129_v35  ;;  %vm244_vm11 = vcmp.eq.s32.totalorder %v239_v4, 2  ;;  %vm241_vm13 = vcmp.eq.s32.totalorder %v239_v4, 0  ;;  %vm240_vm15 = vcmp.lt.s32.totalorder %v239_v4, 2 }
  0x55   :  { %v115_v9 = vor.u32 4788187, %v114_v10  ;;  %v118_v22 = vcvt.s32.f32 %v111_v43  ;;  %v142_v43 = vsub.s32 0, %v141_v62  ;;  %v9884_v35 = vpack.c.bf16 %v461_v33, %v454_v14 }
  0x56   :  { %vm135_vm10 = vcmp.eq.s32.totalorder %v130_v55, 2  ;;  %vm132_vm12 = vcmp.eq.s32.totalorder %v130_v55, 0  ;;  %vm131_vm14 = vcmp.lt.s32.totalorder %v130_v55, 2  ;;  %v12265_v4 = vmov 0.0  }
  0x57   :  { %v116_v48 = vand.u32 2147483647, %v115_v9  ;;  %v143_v15 = vrot.slane %v35_v32, %v142_v43  ;;  %v252_v10 = vrot.slane %v145_v16, %v142_v43 }
  0x59   :  { %v119_v12 = vmul.f32 %v118_v22, %v116_v48  ;;  %v12264_v22 = vand.u32 4294901760, %v9658_v25 }
  0x5b   :  { %v120_v30 = vxor.u32 2147483648, %v119_v12  ;;  %v9872_v59 = vpack.c.bf16 %v12264_v22, %v384_v5 }
  0x5d   :  { %v121_v29 = vsel %vm38_vm8, %v120_v30, %v119_v12 }
  0x5e   :  { %v124_v23 = vsel %vm37_vm9, %v9690_v52, %v121_v29 }
  0x5f   :  { %9562 = vcosq.f32 %v124_v23 }
  0x60   :  { %9564 = vsinq.f32 %v124_v23 }
  0x69   :  { %v9563_v42 = vpop.eup %9562 }
  0x6a   :  { %v9565_v36 = vpop.eup %9564  ;;  %v136_v21 = vxor.u32 2147483648, %v9563_v42 }
  0x6b   :  { %v133_v5 = vxor.u32 2147483648, %v9565_v36 }
  0x6c   :  { %v137_v6 = vsel %vm135_vm10, %v136_v21, %v9565_v36  ;;  %v246_v31 = vsel %vm244_vm11, %v136_v21, %v9565_v36  ;;  %v926_v36 = vld [vmem:[#allocation2 + $0xb8] sm:$0xff]  ;;  %v927_v21 = vld [vmem:[#allocation2 + $0xc0] sm:$0xff] }
  0x6d   :  { %v134_v9 = vsel %vm132_vm12, %v9563_v42, %v133_v5  ;;  %v243_v48 = vsel %vm241_vm13, %v9563_v42, %v133_v5  ;;  %v925_v42 = vld [vmem:[#allocation2 + $0xb0] sm:$0xff] }
  0x6e   :  { %v138_v12 = vsel %vm131_vm14, %v134_v9, %v137_v6  ;;  %v247_v30 = vsel %vm240_vm15, %v243_v48, %v246_v31  ;;  %v12266_v9 = vpack.c.bf16 %v9658_v25, %v9654_v20  ;;  %v12267_v25 = vpack.c.bf16 %v9663_v28, %v9660_v26 }
  0x6f   :  { %v139_v1 = vsel %vm128_vm1, nan, %v138_v12  ;;  %v248_v29 = vsel %vm128_vm1, nan, %v247_v30  ;;  %v959_v12 = vand.u32 4294901760, %v925_v42  ;;  %v962_v30 = vand.u32 4294901760, %v926_v36 }
  0x70   :  { %v144_v23 = vmul.f32 %v143_v15, %v139_v1  ;;  %v253_v11 = vmul.f32 %v252_v10, %v248_v29  ;;  %v928_v15 = vld [vmem:[#allocation2 + $0xc8] sm:$0xff]  ;;  %v965_v1 = vand.u32 4294901760, %v927_v21 }
  0x71   :  { %v968_v29 = vand.u32 4294901760, %v928_v15 }
  0x72   :  { %v254_v27 = vadd.f32 %v253_v11, %v144_v23  ;;  %v9940_v23 = vsub.f32 %v925_v42, %v959_v12  ;;  %v9942_v11 = vsub.f32 %v926_v36, %v962_v30 }
  0x73   :  { %v9946_v20 = vsub.f32 %v928_v15, %v968_v29 }
  0x74   :  { %v9878_v22 = vand.u32 4294901760, %v254_v27 }
  0x76   :  { %v9887_v52 = vsub.f32 %v254_v27, %v9878_v22  ;;  %v9944_v27 = vsub.f32 %v927_v21, %v965_v1 }
  0x78   :  { %v359_v62 = vand.u32 4294901760, %v9887_v52 }
  0x7a   :  { %v360_v32 = vsub.f32 %v9887_v52, %v359_v62 }
  0x7c   :  { %v361_v55 = vand.u32 4294901760, %v360_v32 }
  0x7e   :  { %6658 = vmatmul.mubr.f32.vlgmr.msra.gmra.mrb[0].mxu0 %v361_v55  ;;  %v12268_v55 = vpack.c.bf16 %v9668_v38, %v9666_v37 }
  0x7f   :  { %8331 = vmatpush3.bf16.msra.mxu0 %v9746_v34  ;;  %6692 = vmatprep.mubr.msk.f32.mxu0 %vm9602_vm0, %v12265_v4  ;;  %v920_v34 = vld [vmem:[#allocation2 + $0x88] sm:$0xff] }
  0x80   :  { %8332 = vmatprep.subr.bf16.mxu0 %v12198_v0  ;;  %v944_v14 = vand.u32 4294901760, %v920_v34 }
  0x82   :  { %v9922_v19 = vsub.f32 %v920_v34, %v944_v14  ;;  %v12269_v34 = vpack.c.bf16 %v9680_v45, %v9670_v39 }
  0x83   :  { %8334 = vmatpush3.bf16.msra.mxu0 %v9751_v41  ;;  %v921_v41 = vld [vmem:[#allocation2 + $0x90] sm:$0xff] }
  0x84   :  { %8335 = vmatprep.subr.bf16.mxu0 %v12198_v0  ;;  %v947_v33 = vand.u32 4294901760, %v921_v41  ;;  %v1041_v21 = vand.u32 4294901760, %v9922_v19 }
  0x87   :  { %8337 = vmatpush3.bf16.msra.mxu0 %v9755_v50 }
  0x88   :  { %8338 = vmatprep.subr.bf16.mxu0 %v12198_v0 }
  0x8b   :  { %8340 = vmatpush3.bf16.msra.mxu0 %v9783_v8  ;;  %v919_v8 = vld [vmem:[#allocation2 + $0x80] sm:$0xff] }
  0x8c   :  { %8341 = vmatprep.subr.bf16.mxu0 %v12198_v0  ;;  %v941_v50 = vand.u32 4294901760, %v919_v8 }
  0x8e   :  { %v9918_v5 = vpack.c.bf16 %v944_v14, %v941_v50  ;;  %v9920_v18 = vsub.f32 %v919_v8, %v941_v50  ;;  %v9960_v8 = vpack.c.bf16 %v962_v30, %v959_v12  ;;  %v12270_v50 = vpack.c.bf16 %v9685_v47, %v9682_v46 }
  0x8f   :  { %8343 = vmatpush3.bf16.msra.mxu0 %v9796_v13  ;;  %v922_v13 = vld [vmem:[#allocation2 + $0x98] sm:$0xff]  ;;  %v12271_v14 = vpack.c.bf16 %v9692_v53, %v9687_v49  ;;  %v12273_v49 = vand.u32 4294901760, %v9660_v26  ;;  %v12274_v53 = vand.u32 4294901760, %v9663_v28  ;;  %v12279_v26 = vand.u32 4294901760, %v9682_v46 }
  0x90   :  { %8344 = vmatprep.subr.bf16.mxu0 %v12198_v0  ;;  %8451 = vmatpush3.bf16.msra.mxu1 %v9918_v5  ;;  %v12280_v28 = vand.u32 4294901760, %v9685_v47  ;;  %v931_v47 = vld [vmem:[#allocation2 + $0xe0] sm:$0xff]  ;;  %v1034_v36 = vand.u32 4294901760, %v9920_v18 }
  0x91   :  { %8452 = vmatprep.subr.bf16.mxu1 %v12198_v0 }
  0x92   :  { %v1035_v30 = vsub.f32 %v9920_v18, %v1034_v36 }
  0x93   :  { %8346 = vmatpush3.bf16.msra.mxu0 %v9829_v3  ;;  %v923_v3 = vld [vmem:[#allocation2 + $0xa0] sm:$0xff] }
  0x94   :  { %8347 = vmatprep.subr.bf16.mxu0 %v12198_v0  ;;  %v953_v43 = vand.u32 4294901760, %v923_v3 }
  0x96   :  { %v9930_v10 = vsub.f32 %v923_v3, %v953_v43  ;;  %v12277_v3 = vand.u32 4294901760, %v9670_v39 }
  0x97   :  { %8349 = vmatpush3.bf16.msra.mxu0 %v9851_v63  ;;  %v924_v63 = vld [vmem:[#allocation2 + $0xa8] sm:$0xff] }
  0x98   :  { %8350 = vmatprep.subr.bf16.mxu0 %v12198_v0  ;;  %v956_v16 = vand.u32 4294901760, %v924_v63 }
  0x9a   :  { %v9936_v48 = vsub.f32 %v924_v63, %v956_v16  ;;  %v9952_v32 = vpack.c.bf16 %v956_v16, %v953_v43 }
  0x9b   :  { %8352 = vmatpush3.bf16.msra.mxu0 %v9855_v40  ;;  %v950_v40 = vand.u32 4294901760, %v922_v13 }
  0x9c   :  { %8353 = vmatprep.subr.bf16.mxu0 %v12198_v0 }
  0x9d   :  { %v9926_v6 = vpack.c.bf16 %v950_v40, %v947_v33  ;;  %v9928_v31 = vsub.f32 %v922_v13, %v950_v40  ;;  %v12272_v13 = vpack.c.bf16 %v9701_v58, %v9694_v54  ;;  %v8417_v40 = vpack.c.bf16 %v12280_v28, %v12279_v26 }
  0x9e   :  { %6693 = vmatmul.mubr.f32.vlgmr.msra.gmra.mrb[0].mxu0 %v9878_v22  ;;  %v12160_v26 = vand.u32 4294901760, %v9940_v23  ;;  %v12159_v28 = vand.u32 4294901760, %v9942_v11 }
  0x9f   :  { %8355 = vmatpush3.bf16.msra.mxu0 %v8354_v51  ;;  %6727 = vmatprep.mubr.msk.f32.mxu0 %vm9602_vm0, %v12265_v4  ;;  %v9924_v51 = vsub.f32 %v921_v41, %v947_v33  ;;  %v9968_v41 = vpack.c.bf16 %v968_v29, %v965_v1  ;;  %v8408_v33 = vpack.c.bf16 %v12274_v53, %v12273_v49  ;;  %v1036_v29 = vand.u32 4294901760, %v1035_v30 }
  0xa0   :  { %8356 = vmatprep.subr.bf16.mxu0 %v12198_v0  ;;  %8454 = vmatpush3.bf16.msra.mxu1 %v9926_v6  ;;  %v1042_v1 = vsub.f32 %v9922_v19, %v1041_v21 }
  0xa1   :  { %8455 = vmatprep.subr.bf16.mxu1 %v12198_v0 }
  0xa3   :  { %8358 = vmatpush3.bf16.msra.mxu0 %v12266_v9 }
  0xa4   :  { %8359 = vmatprep.subr.bf16.mxu0 %v12198_v0  ;;  %8457 = vmatpush3.bf16.msra.mxu1 %v9952_v32 }
  0xa5   :  { %8458 = vmatprep.subr.bf16.mxu1 %v12198_v0 }
  0xa7   :  { %8361 = vmatpush3.bf16.msra.mxu0 %v12267_v25  ;;  %v12164_v25 = vand.u32 4294901760, %v9924_v51 }
  0xa8   :  { %8362 = vmatprep.subr.bf16.mxu0 %v12198_v0  ;;  %8460 = vmatpush3.bf16.msra.mxu1 %v9960_v8 }
  0xa9   :  { %8461 = vmatprep.subr.bf16.mxu1 %v12198_v0 }
  0xab   :  { %8364 = vmatpush3.bf16.msra.mxu0 %v12268_v55  ;;  %v12163_v55 = vand.u32 4294901760, %v9928_v31 }
  0xac   :  { %8365 = vmatprep.subr.bf16.mxu0 %v12198_v0  ;;  %8463 = vmatpush3.bf16.msra.mxu1 %v9968_v41 }
  0xad   :  { %8464 = vmatprep.subr.bf16.mxu1 %v12198_v0 }
  0xaf   :  { %8367 = vmatpush3.bf16.msra.mxu0 %v12269_v34  ;;  %v1043_v34 = vand.u32 4294901760, %v1042_v1 }
  0xb0   :  { %8368 = vmatprep.subr.bf16.mxu0 %v12198_v0 }
  0xb3   :  { %8370 = vmatpush3.bf16.msra.mxu0 %v12270_v50  ;;  %v1049_v50 = vsub.f32 %v9924_v51, %v12164_v25 }
  0xb4   :  { %8371 = vmatprep.subr.bf16.mxu0 %v12198_v0 }
  0xb5   :  { %v1050_v49 = vand.u32 4294901760, %v1049_v50 }
  0xb7   :  { %8373 = vmatpush3.bf16.msra.mxu0 %v12271_v14  ;;  %v1056_v14 = vsub.f32 %v9928_v31, %v12163_v55 }
  0xb8   :  { %8374 = vmatprep.subr.bf16.mxu0 %v12198_v0 }
  0xb9   :  { %v1057_v53 = vand.u32 4294901760, %v1056_v14 }
  0xbb   :  { %8376 = vmatpush3.bf16.msra.mxu0 %v12272_v13  ;;  %v10102_v13 = vpack.c.bf16 %v1043_v34, %v1036_v29 }
  0xbc   :  { %8377 = vmatprep.subr.bf16.mxu0 %v12198_v0 }
  0xbe   :  { %6728 = vmatmul.mubr.f32.vlgmr.msra.gmra.mrb[0].mxu0 %v9887_v52  ;;  %v12275_v52 = vand.u32 4294901760, %v9666_v37  ;;  %v12281_v37 = vand.u32 4294901760, %v9694_v54  ;;  %v932_v54 = vld [vmem:[#allocation2 + $0xe8] sm:$0xff] }
  0xbf   :  { %8379 = vmatpush3.bf16.msra.mxu0 %v9648_v17  ;;  %6762 = vmatprep.mubr.msk.f32.mxu0 %vm9602_vm0, %v12265_v4 }
  0xc0   :  { %8380 = vmatprep.subr.bf16.mxu0 %v12198_v0 }
  0xc3   :  { %8382 = vmatpush3.bf16.msra.mxu0 %v9656_v24 }
  0xc4   :  { %8383 = vmatprep.subr.bf16.mxu0 %v12198_v0 }
  0xc7   :  { %8385 = vmatpush3.bf16.msra.mxu0 %v9678_v44 }
  0xc8   :  { %8386 = vmatprep.subr.bf16.mxu0 %v12198_v0 }
  0xcb   :  { %8388 = vmatpush3.bf16.msra.mxu0 %v9697_v56 }
  0xcc   :  { %8389 = vmatprep.subr.bf16.mxu0 %v12198_v0 }
  0xcf   :  { %8391 = vmatpush3.bf16.msra.mxu0 %v9699_v57 }
  0xd0   :  { %8392 = vmatprep.subr.bf16.mxu0 %v12198_v0 }
  0xd3   :  { %8394 = vmatpush3.bf16.msra.mxu0 %v9705_v60 }
  0xd4   :  { %8395 = vmatprep.subr.bf16.mxu0 %v12198_v0 }
  0xd7   :  { %8397 = vmatpush3.bf16.msra.mxu0 %v9707_v61 }
  0xd8   :  { %8398 = vmatprep.subr.bf16.mxu0 %v12198_v0 }
  0xdb   :  { %8400 = vmatpush3.bf16.msra.mxu0 %v9714_v2 }
  0xdc   :  { %8401 = vmatprep.subr.bf16.mxu0 %v12198_v0 }
  0xde   :  { %6763 = vmatmul.mubr.f32.vlgmr.msra.gmra.mrb[0].mxu0 %v359_v62  ;;  %v12276_v62 = vand.u32 4294901760, %v9668_v38  ;;  %v12282_v38 = vand.u32 4294901760, %v9701_v58 }
  0xdf   :  { %8403 = vmatpush3.bf16.msra.mxu0 %v9865_v7  ;;  %6797 = vmatprep.mubr.msk.f32.mxu0 %vm9602_vm0, %v12265_v4 }
  0xe0   :  { %8404 = vmatprep.subr.bf16.mxu0 %v12198_v0  ;;  %v8411_v7 = vpack.c.bf16 %v12276_v62, %v12275_v52  ;;  %v8423_v39 = vpack.c.bf16 %v12282_v38, %v12281_v37  ;;  %v12161_v52 = vand.u32 4294901760, %v9936_v48  ;;  %v8477_v62 = vpack.c.bf16 %v1057_v53, %v1050_v49 }
  0xe1   :  { %v1077_v37 = vsub.f32 %v9940_v23, %v12160_v26  ;;  %v1084_v38 = vsub.f32 %v9942_v11, %v12159_v28 }
  0xe3   :  { %8406 = vmatpush3.bf16.msra.mxu0 %v9872_v59  ;;  %v12278_v59 = vand.u32 4294901760, %v9680_v45 }
  0xe4   :  { %8407 = vmatprep.subr.bf16.mxu0 %v12198_v0 }
  0xe5   :  { %v8414_v63 = vpack.c.bf16 %v12278_v59, %v12277_v3  ;;  %v1070_v3 = vsub.f32 %v9936_v48, %v12161_v52 }
  0xe7   :  { %8409 = vmatpush3.bf16.msra.mxu0 %v8408_v33  ;;  %v12162_v33 = vand.u32 4294901760, %v9930_v10 }
  0xe8   :  { %8410 = vmatprep.subr.bf16.mxu0 %v12198_v0 }
  0xeb   :  { %8412 = vmatpush3.bf16.msra.mxu0 %v8411_v7  ;;  %v1063_v7 = vsub.f32 %v9930_v10, %v12162_v33 }
  0xec   :  { %8413 = vmatprep.subr.bf16.mxu0 %v12198_v0 }
  0xed   :  { %v1064_v59 = vand.u32 4294901760, %v1063_v7 }
  0xef   :  { %8415 = vmatpush3.bf16.msra.mxu0 %v8414_v63  ;;  %v1071_v63 = vand.u32 4294901760, %v1070_v3 }
  0xf0   :  { %8416 = vmatprep.subr.bf16.mxu0 %v12198_v0 }
  0xf3   :  { %8418 = vmatpush3.bf16.msra.mxu0 %v8417_v40  ;;  %v8480_v40 = vpack.c.bf16 %v1071_v63, %v1064_v59 }
  0xf4   :  { %8419 = vmatprep.subr.bf16.mxu0 %v12198_v0 }
  0xf7   :  { %8421 = vmatpush3.bf16.msra.mxu0 %v9884_v35 }
  0xf8   :  { %8422 = vmatprep.subr.bf16.mxu0 %v12198_v0 }
  0xfb   :  { %8424 = vmatpush3.bf16.msra.mxu0 %v8423_v39  ;;  %v1078_v39 = vand.u32 4294901760, %v1077_v37 }
  0xfc   :  { %8425 = vmatprep.subr.bf16.mxu0 %v12198_v0 }
  0xfe   :  { %6798 = vmatmul.mubr.f32.vlgmr.msra.gmra.mrb[0].mxu0 %v9878_v22 }
  0xff   :  { %8427 = vmatpush3.bf16.msra.mxu0 %v9648_v17  ;;  %6832 = vmatprep.mubr.msk.f32.mxu0 %vm9602_vm0, %v12265_v4  ;;  %v929_v17 = vld [vmem:[#allocation2 + $0xd0] sm:$0xff] }
 0x100   :  { %8428 = vmatprep.subr.bf16.mxu0 %v12198_v0 }
 0x103   :  { %8430 = vmatpush3.bf16.msra.mxu0 %v9656_v24  ;;  %v930_v24 = vld [vmem:[#allocation2 + $0xd8] sm:$0xff] }
 0x104   :  { %8431 = vmatprep.subr.bf16.mxu0 %v12198_v0  ;;  %v974_v45 = vand.u32 4294901760, %v930_v24 }
 0x107   :  { %8433 = vmatpush3.bf16.msra.mxu0 %v9678_v44  ;;  %v971_v44 = vand.u32 4294901760, %v929_v17 }
 0x108   :  { %8434 = vmatprep.subr.bf16.mxu0 %v12198_v0 }
 0x109   :  { %v10062_v46 = vpack.c.bf16 %v974_v45, %v971_v44 }
 0x10b   :  { %8436 = vmatpush3.bf16.msra.mxu0 %v9697_v56  ;;  %8466 = vmatpush3.bf16.msra.mxu1 %v10062_v46  ;;  %v977_v56 = vand.u32 4294901760, %v931_v47 }
 0x10c   :  { %8437 = vmatprep.subr.bf16.mxu0 %v12198_v0  ;;  %8467 = vmatprep.subr.bf16.mxu1 %v12198_v0 }
 0x10d   :  { %v10073_v35 = vsub.f32 %v931_v47, %v977_v56 }
 0x10f   :  { %8439 = vmatpush3.bf16.msra.mxu0 %v9699_v57  ;;  %v980_v57 = vand.u32 4294901760, %v932_v54  ;;  %v12154_v34 = vand.u32 4294901760, %v10073_v35 }
 0x110   :  { %8440 = vmatprep.subr.bf16.mxu0 %v12198_v0 }
 0x111   :  { %v10066_v58 = vpack.c.bf16 %v980_v57, %v977_v56  ;;  %v10075_v43 = vsub.f32 %v932_v54, %v980_v57  ;;  %v1119_v49 = vsub.f32 %v10073_v35, %v12154_v34 }
 0x113   :  { %8442 = vmatpush3.bf16.msra.mxu0 %v9705_v60  ;;  %v933_v60 = vld [vmem:[#allocation2 + $0xf0] sm:$0xff]  ;;  %8469 = vmatpush3.bf16.msra.mxu1 %v10066_v58  ;;  %v12153_v50 = vand.u32 4294901760, %v10075_v43  ;;  %v1120_v7 = vand.u32 4294901760, %v1119_v49  ;;  %v8516_v49 = vpack.c.bf16 %v10075_v43, %v10073_v35 }
 0x114   :  { %8443 = vmatprep.subr.bf16.mxu0 %v12198_v0  ;;  %8470 = vmatprep.subr.bf16.mxu1 %v12198_v0  ;;  %v983_v16 = vand.u32 4294901760, %v933_v60 }
 0x115   :  { %v1126_v53 = vsub.f32 %v10075_v43, %v12153_v50 }
 0x116   :  { %v10082_v9 = vsub.f32 %v933_v60, %v983_v16 }
 0x117   :  { %8445 = vmatpush3.bf16.msra.mxu0 %v9707_v61  ;;  %v934_v61 = vld [vmem:[#allocation2 + $0xf8] sm:$0xff]  ;;  %v1127_v3 = vand.u32 4294901760, %v1126_v53 }
 0x118   :  { %8446 = vmatprep.subr.bf16.mxu0 %v12198_v0  ;;  %v986_v42 = vand.u32 4294901760, %v934_v61  ;;  %v12152_v59 = vand.u32 4294901760, %v10082_v9 }
 0x119   :  { %v8492_v37 = vpack.c.bf16 %v1127_v3, %v1120_v7  ;;  %v5795_v7 = vld [vmem:[%s12125_s2] ss:$0 sm:$0xff] }
 0x11a   :  { %v10080_v15 = vpack.c.bf16 %v986_v42, %v983_v16  ;;  %v10084_v12 = vsub.f32 %v934_v61, %v986_v42 }
 0x11b   :  { %8448 = vmatpush3.bf16.msra.mxu0 %v9714_v2  ;;  %v10068_v2 = vsub.f32 %v929_v17, %v971_v44  ;;  %v1085_v17 = vand.u32 4294901760, %v1084_v38  ;;  %v12157_v44 = vand.u32 4294901760, %v9946_v20  ;;  %v1133_v38 = vsub.f32 %v10082_v9, %v12152_v59 }
 0x11c   :  { %8593 = vmatprep.subr.bf16.mxu0 %v12198_v0  ;;  %8472 = vmatpush3.bf16.msra.mxu1 %v10080_v15  ;;  %v12151_v63 = vand.u32 4294901760, %v10084_v12  ;;  %v8519_v53 = vpack.c.bf16 %v10084_v12, %v10082_v9 }
 0x11d   :  { %8473 = vmatprep.subr.bf16.mxu1 %v12198_v0  ;;  %v1098_v54 = vsub.f32 %v9946_v20, %v12157_v44  ;;  %v12156_v60 = vand.u32 4294901760, %v10068_v2 }
 0x11e   :  { %6833 = vmatmul.mubr.f32.vlgmr.msra.gmra.mrb[0].mxu0 %v9878_v22  ;;  %v10070_v22 = vsub.f32 %v930_v24, %v974_v45  ;;  %v12158_v24 = vand.u32 4294901760, %v9944_v27  ;;  %v8483_v45 = vpack.c.bf16 %v1085_v17, %v1078_v39  ;;  %v1140_v39 = vsub.f32 %v10084_v12, %v12151_v63 }
 0x11f   :  { %7077 = vmatprep.mubr.msk.f32.mxu0 %vm9602_vm0, %v12265_v4  ;;  %v1099_v57 = vand.u32 4294901760, %v1098_v54  ;;  %v1105_v42 = vsub.f32 %v10068_v2, %v12156_v60  ;;  %v1134_v17 = vand.u32 4294901760, %v1133_v38 }
 0x120   :  { %v1091_v47 = vsub.f32 %v9944_v27, %v12158_v24  ;;  %v12155_v61 = vand.u32 4294901760, %v10070_v22  ;;  %v1592_v24 = vld [vmem:[#allocation2 + $0x148] sm:$0xff] }
 0x121   :  { %v1106_v1 = vand.u32 4294901760, %v1105_v42  ;;  %v8504_v42 = vpack.c.bf16 %v9936_v48, %v9930_v10 }
 0x122   :  { %v1092_v56 = vand.u32 4294901760, %v1091_v47  ;;  %v1112_v30 = vsub.f32 %v10070_v22, %v12155_v61  ;;  %v1141_v47 = vand.u32 4294901760, %v1140_v39 }
 0x124   :  { %v8486_v16 = vpack.c.bf16 %v1099_v57, %v1092_v56  ;;  %v1113_v29 = vand.u32 4294901760, %v1112_v30  ;;  %v8495_v54 = vpack.c.bf16 %v1141_v47, %v1134_v17  ;;  %v8498_v56 = vpack.c.bf16 %v9922_v19, %v9920_v18 }
 0x125   :  { %v8501_v57 = vpack.c.bf16 %v9928_v31, %v9924_v51  ;;  %v8507_v30 = vpack.c.bf16 %v9942_v11, %v9940_v23  ;;  %v12285_v18 = vand.u32 4294901760, %v9930_v10  ;;  %v12286_v19 = vand.u32 4294901760, %v9936_v48 }
 0x126   :  { %v8489_v14 = vpack.c.bf16 %v1113_v29, %v1106_v1  ;;  %v8510_v1 = vpack.c.bf16 %v9946_v20, %v9944_v27  ;;  %v8513_v29 = vpack.c.bf16 %v10070_v22, %v10068_v2  ;;  %v12291_v10 = vand.u32 4294901760, %v10068_v2  ;;  %v1596_v2 = vld [vmem:[#allocation2 + $0x168] sm:$0xff] }
 0x127   :  { %v12292_v48 = vand.u32 4294901760, %v10070_v22  ;;  %v1644_v22 = vand.u32 4294901760, %v1596_v2 }
 0x1f1   :  { %v913_v3 = vpop.f32.mrb[0].mxu0 }
 0x1f2   :  { %v9457_v38 = vadd.f32 %v5795_v7, %v913_v3  ;;  %v6834_v39 = vpop.f32.mrb[1].mxu0 }
 0x1f3   :  { %v1590_v39 = vld [vmem:[#allocation2 + $0x138] sm:$0xff] }
 0x1f4   :  { %v917_v17 = vmax.f32 %v9457_v38, 0.0  ;;  %v1589_v38 = vld [vmem:[#allocation2 + $0x130] sm:$0xff]  ;;  %v1626_v25 = vand.u32 4294901760, %v1590_v39 }
 0x1f5   :  { %v1623_v55 = vand.u32 4294901760, %v1589_v38 }
 0x1f6   :  { %v10171_v47 = vand.u32 4294901760, %v917_v17 }
 0x1f8   :  { %v10174_v63 = vsub.f32 %v917_v17, %v10171_v47  ;;  %v1591_v17 = vld [vmem:[#allocation2 + $0x140] sm:$0xff] }
 0x1fa   :  { %v1023_v59 = vand.u32 4294901760, %v10174_v63 }
 0x1fc   :  { %v1024_v50 = vsub.f32 %v10174_v63, %v1023_v59 }
 0x1fe   :  { %v1025_v34 = vand.u32 4294901760, %v1024_v50 }
 0x200   :  { %6868 = vmatmul.mubr.f32.vlgmr.msra.gmra.mrb[0].mxu1 %v1025_v34  ;;  %v1586_v34 = vld [vmem:[#allocation2 + $0x118] sm:$0xff] }
 0x201   :  { %8475 = vmatpush3.bf16.msra.mxu1 %v10102_v13  ;;  %6902 = vmatprep.mubr.msk.f32.mxu1 %vm9602_vm0, %v12265_v4  ;;  %v1583_v13 = vld [vmem:[#allocation2 + $0x100] sm:$0xff] }
 0x202   :  { %8476 = vmatprep.subr.bf16.mxu1 %v12198_v0 }
 0x205   :  { %8478 = vmatpush3.bf16.msra.mxu1 %v8477_v62  ;;  %v1584_v62 = vld [vmem:[#allocation2 + $0x108] sm:$0xff] }
 0x206   :  { %8479 = vmatprep.subr.bf16.mxu1 %v12198_v0 }
 0x209   :  { %8481 = vmatpush3.bf16.msra.mxu1 %v8480_v40  ;;  %v1585_v40 = vld [vmem:[#allocation2 + $0x110] sm:$0xff] }
 0x20a   :  { %8482 = vmatprep.subr.bf16.mxu1 %v12198_v0  ;;  %v1611_v50 = vand.u32 4294901760, %v1585_v40 }
 0x20c   :  { %v10201_v44 = vsub.f32 %v1585_v40, %v1611_v50  ;;  %v10214_v40 = vsub.f32 %v1589_v38, %v1623_v55 }
 0x20d   :  { %8484 = vmatpush3.bf16.msra.mxu1 %v8483_v45  ;;  %v1605_v45 = vand.u32 4294901760, %v1583_v13 }
 0x20e   :  { %8485 = vmatprep.subr.bf16.mxu1 %v12198_v0 }
 0x211   :  { %8487 = vmatpush3.bf16.msra.mxu1 %v8486_v16  ;;  %v1608_v16 = vand.u32 4294901760, %v1584_v62 }
 0x212   :  { %8488 = vmatprep.subr.bf16.mxu1 %v12198_v0 }
 0x213   :  { %v10195_v61 = vpack.c.bf16 %v1608_v16, %v1605_v45  ;;  %v10199_v60 = vsub.f32 %v1584_v62, %v1608_v16  ;;  %v1632_v62 = vand.u32 4294901760, %v1592_v24 }
 0x215   :  { %8490 = vmatpush3.bf16.msra.mxu1 %v8489_v14  ;;  %v1587_v14 = vld [vmem:[#allocation2 + $0x120] sm:$0xff]  ;;  %8595 = vmatpush3.bf16.msra.mxu0 %v10195_v61 }
 0x216   :  { %8491 = vmatprep.subr.bf16.mxu1 %v12198_v0  ;;  %v1617_v7 = vand.u32 4294901760, %v1587_v14  ;;  %8596 = vmatprep.subr.bf16.mxu0 %v12198_v0 }
 0x218   :  { %v10207_v52 = vsub.f32 %v1587_v14, %v1617_v7  ;;  %v1705_v14 = vand.u32 4294901760, %v10199_v60 }
 0x219   :  { %8493 = vmatpush3.bf16.msra.mxu1 %v8492_v37  ;;  %v1588_v37 = vld [vmem:[#allocation2 + $0x128] sm:$0xff] }
 0x21a   :  { %8494 = vmatprep.subr.bf16.mxu1 %v12198_v0  ;;  %v1620_v3 = vand.u32 4294901760, %v1588_v37 }
 0x21c   :  { %v10210_v33 = vsub.f32 %v1588_v37, %v1620_v3 }
 0x21d   :  { %8496 = vmatpush3.bf16.msra.mxu1 %v8495_v54  ;;  %v1614_v54 = vand.u32 4294901760, %v1586_v34 }
 0x21e   :  { %8497 = vmatprep.subr.bf16.mxu1 %v12198_v0 }
 0x21f   :  { %v10203_v28 = vpack.c.bf16 %v1614_v54, %v1611_v50  ;;  %v10205_v26 = vsub.f32 %v1586_v34, %v1614_v54  ;;  %v10220_v34 = vsub.f32 %v1592_v24, %v1632_v62  ;;  %v10234_v24 = vpack.c.bf16 %v1626_v25, %v1623_v55 }
 0x220   :  { %6903 = vmatmul.mubr.f32.vlgmr.msra.gmra.mrb[0].mxu1 %v10171_v47  ;;  %v12283_v55 = vand.u32 4294901760, %v9924_v51  ;;  %v12288_v51 = vand.u32 4294901760, %v9942_v11  ;;  %v12294_v11 = vand.u32 4294901760, %v10075_v43  ;;  %v1597_v43 = vld [vmem:[#allocation2 + $0x170] sm:$0xff] }
 0x221   :  { %8499 = vmatpush3.bf16.msra.mxu1 %v8498_v56  ;;  %6937 = vmatprep.mubr.msk.f32.mxu1 %vm9602_vm0, %v12265_v4  ;;  %v10197_v56 = vsub.f32 %v1583_v13, %v1605_v45  ;;  %v1629_v13 = vand.u32 4294901760, %v1591_v17  ;;  %v10216_v45 = vsub.f32 %v1590_v39, %v1626_v25  ;;  %v8546_v25 = vpack.c.bf16 %v1041_v21, %v1034_v36 }
 0x222   :  { %8500 = vmatprep.subr.bf16.mxu1 %v12198_v0  ;;  %8598 = vmatpush3.bf16.msra.mxu0 %v10203_v28  ;;  %v8552_v36 = vpack.c.bf16 %v12286_v19, %v12285_v18  ;;  %v12287_v21 = vand.u32 4294901760, %v9940_v23  ;;  %v12293_v23 = vand.u32 4294901760, %v10073_v35 }
 0x223   :  { %v10218_v16 = vsub.f32 %v1591_v17, %v1629_v13  ;;  %8599 = vmatprep.subr.bf16.mxu0 %v12198_v0  ;;  %v10369_v17 = vsub.f32 %v1596_v2, %v1644_v22 }
 0x225   :  { %8502 = vmatpush3.bf16.msra.mxu1 %v8501_v57  ;;  %v10226_v57 = vpack.c.bf16 %v1620_v3, %v1617_v7  ;;  %v1706_v7 = vsub.f32 %v10199_v60, %v1705_v14 }
 0x226   :  { %8503 = vmatprep.subr.bf16.mxu1 %v12198_v0 }
 0x227   :  { %8601 = vmatpush3.bf16.msra.mxu0 %v10226_v57 }
 0x228   :  { %8602 = vmatprep.subr.bf16.mxu0 %v12198_v0 }
 0x229   :  { %8505 = vmatpush3.bf16.msra.mxu1 %v8504_v42  ;;  %v10242_v42 = vpack.c.bf16 %v1632_v62, %v1629_v13 }
 0x22a   :  { %8506 = vmatprep.subr.bf16.mxu1 %v12198_v0 }
 0x22b   :  { %8604 = vmatpush3.bf16.msra.mxu0 %v10234_v24 }
 0x22c   :  { %8605 = vmatprep.subr.bf16.mxu0 %v12198_v0 }
 0x22d   :  { %8508 = vmatpush3.bf16.msra.mxu1 %v8507_v30  ;;  %v12284_v30 = vand.u32 4294901760, %v9928_v31  ;;  %v8555_v31 = vpack.c.bf16 %v12288_v51, %v12287_v21  ;;  %v12176_v21 = vand.u32 4294901760, %v10207_v52  ;;  %v12175_v51 = vand.u32 4294901760, %v10210_v33 }
 0x22e   :  { %8509 = vmatprep.subr.bf16.mxu1 %v12198_v0 }
 0x22f   :  { %8607 = vmatpush3.bf16.msra.mxu0 %v10242_v42 }
 0x230   :  { %8608 = vmatprep.subr.bf16.mxu0 %v12198_v0 }
 0x231   :  { %8511 = vmatpush3.bf16.msra.mxu1 %v8510_v1  ;;  %v8549_v1 = vpack.c.bf16 %v12284_v30, %v12283_v55  ;;  %v1707_v55 = vand.u32 4294901760, %v1706_v7  ;;  %v12178_v30 = vand.u32 4294901760, %v10201_v44 }
 0x232   :  { %8512 = vmatprep.subr.bf16.mxu1 %v12198_v0 }
 0x233   :  { %v1713_v19 = vsub.f32 %v10201_v44, %v12178_v30 }
 0x235   :  { %8514 = vmatpush3.bf16.msra.mxu1 %v8513_v29 }
 0x236   :  { %8515 = vmatprep.subr.bf16.mxu1 %v12198_v0 }
 0x239   :  { %8517 = vmatpush3.bf16.msra.mxu1 %v8516_v49  ;;  %v8561_v49 = vpack.c.bf16 %v12292_v48, %v12291_v10 }
 0x23a   :  { %8518 = vmatprep.subr.bf16.mxu1 %v12198_v0 }
 0x23d   :  { %8520 = vmatpush3.bf16.msra.mxu1 %v8519_v53  ;;  %v8564_v53 = vpack.c.bf16 %v12294_v11, %v12293_v23  ;;  %v12174_v23 = vand.u32 4294901760, %v10214_v40  ;;  %v12173_v11 = vand.u32 4294901760, %v10216_v45 }
 0x23e   :  { %8521 = vmatprep.subr.bf16.mxu1 %v12198_v0 }
 0x240   :  { %6938 = vmatmul.mubr.f32.vlgmr.msra.gmra.mrb[0].mxu1 %v10174_v63  ;;  %v12290_v63 = vand.u32 4294901760, %v9946_v20  ;;  %v12296_v20 = vand.u32 4294901760, %v10084_v12 }
 0x241   :  { %8523 = vmatpush3.bf16.msra.mxu1 %v9918_v5  ;;  %6972 = vmatprep.mubr.msk.f32.mxu1 %vm9602_vm0, %v12265_v4 }
 0x242   :  { %8524 = vmatprep.subr.bf16.mxu1 %v12198_v0 }
 0x245   :  { %8526 = vmatpush3.bf16.msra.mxu1 %v9926_v6 }
 0x246   :  { %8527 = vmatprep.subr.bf16.mxu1 %v12198_v0 }
 0x249   :  { %8529 = vmatpush3.bf16.msra.mxu1 %v9952_v32 }
 0x24a   :  { %8530 = vmatprep.subr.bf16.mxu1 %v12198_v0 }
 0x24d   :  { %8532 = vmatpush3.bf16.msra.mxu1 %v9960_v8 }
 0x24e   :  { %8533 = vmatprep.subr.bf16.mxu1 %v12198_v0 }
 0x251   :  { %8535 = vmatpush3.bf16.msra.mxu1 %v9968_v41 }
 0x252   :  { %8536 = vmatprep.subr.bf16.mxu1 %v12198_v0 }
 0x255   :  { %8538 = vmatpush3.bf16.msra.mxu1 %v10062_v46 }
 0x256   :  { %8539 = vmatprep.subr.bf16.mxu1 %v12198_v0 }
 0x259   :  { %8541 = vmatpush3.bf16.msra.mxu1 %v10066_v58 }
 0x25a   :  { %8542 = vmatprep.subr.bf16.mxu1 %v12198_v0 }
 0x25d   :  { %8544 = vmatpush3.bf16.msra.mxu1 %v10080_v15 }
 0x25e   :  { %8545 = vmatprep.subr.bf16.mxu1 %v12198_v0 }
 0x260   :  { %6973 = vmatmul.mubr.f32.vlgmr.msra.gmra.mrb[0].mxu1 %v1023_v59  ;;  %v12289_v59 = vand.u32 4294901760, %v9944_v27  ;;  %v12295_v27 = vand.u32 4294901760, %v10082_v9  ;;  %v1647_v9 = vand.u32 4294901760, %v1597_v43 }
 0x261   :  { %8547 = vmatpush3.bf16.msra.mxu1 %v8546_v25  ;;  %7007 = vmatprep.mubr.msk.f32.mxu1 %vm9602_vm0, %v12265_v4 }
 0x262   :  { %8548 = vmatprep.subr.bf16.mxu1 %v12198_v0  ;;  %v8558_v29 = vpack.c.bf16 %v12290_v63, %v12289_v59  ;;  %v8567_v50 = vpack.c.bf16 %v12296_v20, %v12295_v27  ;;  %v10372_v13 = vsub.f32 %v1597_v43, %v1647_v9  ;;  %v1727_v63 = vsub.f32 %v10207_v52, %v12176_v21 }
 0x263   :  { %v1741_v27 = vsub.f32 %v10214_v40, %v12174_v23  ;;  %v1748_v20 = vsub.f32 %v10216_v45, %v12173_v11 }
 0x264   :  { %v1728_v48 = vand.u32 4294901760, %v1727_v63 }
 0x265   :  { %8550 = vmatpush3.bf16.msra.mxu1 %v8549_v1  ;;  %v12177_v1 = vand.u32 4294901760, %v10205_v26 }
 0x266   :  { %8551 = vmatprep.subr.bf16.mxu1 %v12198_v0 }
 0x269   :  { %8553 = vmatpush3.bf16.msra.mxu1 %v8552_v36  ;;  %v1720_v36 = vsub.f32 %v10205_v26, %v12177_v1 }
 0x26a   :  { %8554 = vmatprep.subr.bf16.mxu1 %v12198_v0 }
 0x26b   :  { %v1721_v59 = vand.u32 4294901760, %v1720_v36 }
 0x26d   :  { %8556 = vmatpush3.bf16.msra.mxu1 %v8555_v31  ;;  %v1714_v31 = vand.u32 4294901760, %v1713_v19  ;;  %v12167_v19 = vand.u32 4294901760, %v10369_v17 }
 0x26e   :  { %8557 = vmatprep.subr.bf16.mxu1 %v12198_v0 }
 0x26f   :  { %v8621_v10 = vpack.c.bf16 %v1721_v59, %v1714_v31  ;;  %v1790_v59 = vsub.f32 %v10369_v17, %v12167_v19 }
 0x271   :  { %8559 = vmatpush3.bf16.msra.mxu1 %v8558_v29  ;;  %v1734_v29 = vsub.f32 %v10210_v33, %v12175_v51 }
 0x272   :  { %8560 = vmatprep.subr.bf16.mxu1 %v12198_v0 }
 0x275   :  { %8562 = vmatpush3.bf16.msra.mxu1 %v8561_v49  ;;  %v1735_v49 = vand.u32 4294901760, %v1734_v29  ;;  %v1791_v29 = vand.u32 4294901760, %v1790_v59 }
 0x276   :  { %8563 = vmatprep.subr.bf16.mxu1 %v12198_v0 }
 0x279   :  { %8565 = vmatpush3.bf16.msra.mxu1 %v8564_v53  ;;  %v8624_v53 = vpack.c.bf16 %v1735_v49, %v1728_v48  ;;  %v12166_v48 = vand.u32 4294901760, %v10372_v13 }
 0x27a   :  { %8566 = vmatprep.subr.bf16.mxu1 %v12198_v0 }
 0x27d   :  { %8568 = vmatpush3.bf16.msra.mxu1 %v8567_v50  ;;  %v1742_v50 = vand.u32 4294901760, %v1741_v27 }
 0x27e   :  { %8569 = vmatprep.subr.bf16.mxu1 %v12198_v0 }
 0x280   :  { %7008 = vmatmul.mubr.f32.vlgmr.msra.gmra.mrb[0].mxu1 %v10171_v47 }
 0x281   :  { %8571 = vmatpush3.bf16.msra.mxu1 %v9918_v5  ;;  %7042 = vmatprep.mubr.msk.f32.mxu1 %vm9602_vm0, %v12265_v4  ;;  %v1593_v5 = vld [vmem:[#allocation2 + $0x150] sm:$0xff] }
 0x282   :  { %8572 = vmatprep.subr.bf16.mxu1 %v12198_v0 }
 0x285   :  { %8574 = vmatpush3.bf16.msra.mxu1 %v9926_v6  ;;  %v1594_v6 = vld [vmem:[#allocation2 + $0x158] sm:$0xff] }
 0x286   :  { %8575 = vmatprep.subr.bf16.mxu1 %v12198_v0 }
 0x289   :  { %8577 = vmatpush3.bf16.msra.mxu1 %v9952_v32  ;;  %v1635_v32 = vand.u32 4294901760, %v1593_v5 }
 0x28a   :  { %8578 = vmatprep.subr.bf16.mxu1 %v12198_v0 }
 0x28b   :  { %v10363_v3 = vsub.f32 %v1593_v5, %v1635_v32  ;;  %v1749_v5 = vand.u32 4294901760, %v1748_v20  ;;  %v1797_v20 = vsub.f32 %v10372_v13, %v12166_v48 }
 0x28d   :  { %8580 = vmatpush3.bf16.msra.mxu1 %v9960_v8  ;;  %v1638_v8 = vand.u32 4294901760, %v1594_v6  ;;  %v12170_v43 = vand.u32 4294901760, %v10363_v3 }
 0x28e   :  { %8581 = vmatprep.subr.bf16.mxu1 %v12198_v0 }
 0x28f   :  { %v10365_v38 = vsub.f32 %v1594_v6, %v1638_v8  ;;  %v12172_v6 = vand.u32 4294901760, %v10218_v16 }
 0x291   :  { %8583 = vmatpush3.bf16.msra.mxu1 %v9968_v41  ;;  %v10345_v41 = vpack.c.bf16 %v1638_v8, %v1635_v32  ;;  %v12171_v32 = vand.u32 4294901760, %v10220_v34  ;;  %v8627_v8 = vpack.c.bf16 %v1749_v5, %v1742_v50  ;;  %v1798_v5 = vand.u32 4294901760, %v1797_v20 }
 0x292   :  { %8584 = vmatprep.subr.bf16.mxu1 %v12198_v0 }
 0x293   :  { %8610 = vmatpush3.bf16.msra.mxu0 %v10345_v41  ;;  %v1762_v2 = vsub.f32 %v10220_v34, %v12171_v32 }
 0x294   :  { %8611 = vmatprep.subr.bf16.mxu0 %v12198_v0 }
 0x295   :  { %8586 = vmatpush3.bf16.msra.mxu1 %v10062_v46  ;;  %v1595_v46 = vld [vmem:[#allocation2 + $0x160] sm:$0xff] }
 0x296   :  { %8587 = vmatprep.subr.bf16.mxu1 %v12198_v0 }
 0x299   :  { %8589 = vmatpush3.bf16.msra.mxu1 %v10066_v58  ;;  %v1641_v58 = vand.u32 4294901760, %v1595_v46 }
 0x29a   :  { %8590 = vmatprep.subr.bf16.mxu1 %v12198_v0 }
 0x29b   :  { %v10349_v35 = vpack.c.bf16 %v1644_v22, %v1641_v58  ;;  %v10367_v39 = vsub.f32 %v1595_v46, %v1641_v58  ;;  %v1755_v46 = vsub.f32 %v10218_v16, %v12172_v6  ;;  %v1763_v22 = vand.u32 4294901760, %v1762_v2  ;;  %v2256_v6 = vld [vmem:[#allocation2 + $0x1c8] sm:$0xff] }
 0x29d   :  { %8592 = vmatpush3.bf16.msra.mxu1 %v10080_v15  ;;  %v1598_v15 = vld [vmem:[#allocation2 + $0x178] sm:$0xff]  ;;  %8613 = vmatpush3.bf16.msra.mxu0 %v10349_v35  ;;  %v1756_v58 = vand.u32 4294901760, %v1755_v46 }
 0x29e   :  { %8737 = vmatprep.subr.bf16.mxu1 %v12198_v0  ;;  %v1650_v12 = vand.u32 4294901760, %v1598_v15  ;;  %8614 = vmatprep.subr.bf16.mxu0 %v12198_v0 }
 0x2a0   :  { %7043 = vmatmul.mubr.f32.vlgmr.msra.gmra.mrb[0].mxu1 %v10171_v47  ;;  %v1698_v47 = vand.u32 4294901760, %v10197_v56  ;;  %v10355_v37 = vpack.c.bf16 %v1650_v12, %v1647_v9  ;;  %v10374_v62 = vsub.f32 %v1598_v15, %v1650_v12  ;;  %v12169_v15 = vand.u32 4294901760, %v10365_v38 }
 0x2a1   :  { %7287 = vmatprep.mubr.msk.f32.mxu1 %vm9602_vm0, %v12265_v4  ;;  %v8630_v9 = vpack.c.bf16 %v1763_v22, %v1756_v58  ;;  %v1769_v12 = vsub.f32 %v10363_v3, %v12170_v43  ;;  %v8642_v58 = vpack.c.bf16 %v10199_v60, %v10197_v56  ;;  %v8645_v22 = vpack.c.bf16 %v10205_v26, %v10201_v44 }
 0x2a2   :  { %v1699_v54 = vsub.f32 %v10197_v56, %v1698_v47  ;;  %8616 = vmatpush3.bf16.msra.mxu0 %v10355_v37  ;;  %v12165_v49 = vand.u32 4294901760, %v10374_v62  ;;  %v8663_v59 = vpack.c.bf16 %v10374_v62, %v10372_v13  ;;  %v12299_v60 = vand.u32 4294901760, %v10207_v52 }
 0x2a3   :  { %8617 = vmatprep.subr.bf16.mxu0 %v12198_v0  ;;  %v1770_v7 = vand.u32 4294901760, %v1769_v12  ;;  %v8648_v12 = vpack.c.bf16 %v10210_v33, %v10207_v52  ;;  %v12300_v56 = vand.u32 4294901760, %v10210_v33  ;;  %v12305_v33 = vand.u32 4294901760, %v10363_v3 }
 0x2a4   :  { %v1700_v25 = vand.u32 4294901760, %v1699_v54  ;;  %v1776_v54 = vsub.f32 %v10365_v38, %v12169_v15  ;;  %v1804_v50 = vsub.f32 %v10374_v62, %v12165_v49  ;;  %v12306_v52 = vand.u32 4294901760, %v10365_v38 }
 0x2a6   :  { %v10379_v18 = vpack.c.bf16 %v1707_v55, %v1700_v25  ;;  %v1777_v25 = vand.u32 4294901760, %v1776_v54  ;;  %v12168_v55 = vand.u32 4294901760, %v10367_v39  ;;  %v1805_v46 = vand.u32 4294901760, %v1804_v50 }
 0x2a7   :  { %v8651_v54 = vpack.c.bf16 %v10216_v45, %v10214_v40 }
 0x2a8   :  { %v8633_v36 = vpack.c.bf16 %v1777_v25, %v1770_v7  ;;  %v1783_v31 = vsub.f32 %v10367_v39, %v12168_v55  ;;  %v8639_v2 = vpack.c.bf16 %v1805_v46, %v1798_v5  ;;  %v8654_v7 = vpack.c.bf16 %v10220_v34, %v10218_v16 }
 0x2a9   :  { %v8657_v25 = vpack.c.bf16 %v10365_v38, %v10363_v3  ;;  %v2260_v3 = vld [vmem:[#allocation2 + $0x1e8] sm:$0xff] }
 0x2aa   :  { %v1784_v63 = vand.u32 4294901760, %v1783_v31  ;;  %v8660_v31 = vpack.c.bf16 %v10369_v17, %v10367_v39  ;;  %v2308_v38 = vand.u32 4294901760, %v2260_v3 }
 0x2ac   :  { %v8636_v27 = vpack.c.bf16 %v1791_v29, %v1784_v63  ;;  %v5796_v63 = vld [vmem:[%s12125_s2 + $0x1] ss:$0 sm:$0xff] }
 0x373   :  { %v1577_v29 = vpop.f32.mrb[0].mxu1 }
 0x374   :  { %v9458_v20 = vadd.f32 %v5796_v63, %v1577_v29  ;;  %v7044_v50 = vpop.f32.mrb[1].mxu1 }
 0x375   :  { %v2254_v50 = vld [vmem:[#allocation2 + $0x1b8] sm:$0xff] }
 0x376   :  { %v1581_v5 = vmax.f32 %v9458_v20, 0.0  ;;  %v2253_v20 = vld [vmem:[#allocation2 + $0x1b0] sm:$0xff]  ;;  %v2290_v30 = vand.u32 4294901760, %v2254_v50 }
 0x377   :  { %v2287_v1 = vand.u32 4294901760, %v2253_v20 }
 0x378   :  { %v10454_v46 = vand.u32 4294901760, %v1581_v5 }
 0x37a   :  { %v10457_v49 = vsub.f32 %v1581_v5, %v10454_v46  ;;  %v2255_v5 = vld [vmem:[#allocation2 + $0x1c0] sm:$0xff] }
 0x37c   :  { %v1687_v48 = vand.u32 4294901760, %v10457_v49 }
 0x37e   :  { %v1688_v19 = vsub.f32 %v10457_v49, %v1687_v48 }
 0x380   :  { %v1689_v55 = vand.u32 4294901760, %v1688_v19 }
 0x382   :  { %7078 = vmatmul.mubr.f32.vlgmr.msra.gmra.mrb[2].mxu0 %v1689_v55  ;;  %v2250_v55 = vld [vmem:[#allocation2 + $0x198] sm:$0xff] }
 0x383   :  { %8619 = vmatpush3.bf16.msra.mxu0 %v10379_v18  ;;  %7112 = vmatprep.mubr.msk.f32.mxu0 %vm9602_vm0, %v12265_v4  ;;  %v2247_v18 = vld [vmem:[#allocation2 + $0x180] sm:$0xff] }
 0x384   :  { %8620 = vmatprep.subr.bf16.mxu0 %v12198_v0 }
 0x387   :  { %8622 = vmatpush3.bf16.msra.mxu0 %v8621_v10  ;;  %v2248_v10 = vld [vmem:[#allocation2 + $0x188] sm:$0xff] }
 0x388   :  { %8623 = vmatprep.subr.bf16.mxu0 %v12198_v0 }
 0x38b   :  { %8625 = vmatpush3.bf16.msra.mxu0 %v8624_v53  ;;  %v2249_v53 = vld [vmem:[#allocation2 + $0x190] sm:$0xff] }
 0x38c   :  { %8626 = vmatprep.subr.bf16.mxu0 %v12198_v0  ;;  %v2275_v19 = vand.u32 4294901760, %v2249_v53 }
 0x38e   :  { %v10484_v32 = vsub.f32 %v2249_v53, %v2275_v19  ;;  %v10497_v53 = vsub.f32 %v2253_v20, %v2287_v1 }
 0x38f   :  { %8628 = vmatpush3.bf16.msra.mxu0 %v8627_v8  ;;  %v2269_v8 = vand.u32 4294901760, %v2247_v18 }
 0x390   :  { %8629 = vmatprep.subr.bf16.mxu0 %v12198_v0 }
 0x393   :  { %8631 = vmatpush3.bf16.msra.mxu0 %v8630_v9  ;;  %v2272_v9 = vand.u32 4294901760, %v2248_v10 }
 0x394   :  { %8632 = vmatprep.subr.bf16.mxu0 %v12198_v0 }
 0x395   :  { %v10478_v15 = vpack.c.bf16 %v2272_v9, %v2269_v8  ;;  %v10482_v43 = vsub.f32 %v2248_v10, %v2272_v9  ;;  %v2296_v10 = vand.u32 4294901760, %v2256_v6 }
 0x397   :  { %8634 = vmatpush3.bf16.msra.mxu0 %v8633_v36  ;;  %v2251_v36 = vld [vmem:[#allocation2 + $0x1a0] sm:$0xff]  ;;  %8739 = vmatpush3.bf16.msra.mxu1 %v10478_v15 }
 0x398   :  { %8635 = vmatprep.subr.bf16.mxu0 %v12198_v0  ;;  %v2281_v63 = vand.u32 4294901760, %v2251_v36  ;;  %8740 = vmatprep.subr.bf16.mxu1 %v12198_v0 }
 0x39a   :  { %v10490_v51 = vsub.f32 %v2251_v36, %v2281_v63  ;;  %v2369_v36 = vand.u32 4294901760, %v10482_v43 }
 0x39b   :  { %8637 = vmatpush3.bf16.msra.mxu0 %v8636_v27  ;;  %v2252_v27 = vld [vmem:[#allocation2 + $0x1a8] sm:$0xff] }
 0x39c   :  { %8638 = vmatprep.subr.bf16.mxu0 %v12198_v0  ;;  %v2284_v29 = vand.u32 4294901760, %v2252_v27 }
 0x39e   :  { %v10493_v21 = vsub.f32 %v2252_v27, %v2284_v29 }
 0x39f   :  { %8640 = vmatpush3.bf16.msra.mxu0 %v8639_v2  ;;  %v2278_v2 = vand.u32 4294901760, %v2250_v55 }
 0x3a0   :  { %8641 = vmatprep.subr.bf16.mxu0 %v12198_v0 }
 0x3a1   :  { %v10486_v11 = vpack.c.bf16 %v2278_v2, %v2275_v19  ;;  %v10488_v23 = vsub.f32 %v2250_v55, %v2278_v2  ;;  %v10503_v55 = vsub.f32 %v2256_v6, %v2296_v10  ;;  %v10517_v6 = vpack.c.bf16 %v2290_v30, %v2287_v1 }
 0x3a2   :  { %7113 = vmatmul.mubr.f32.vlgmr.msra.gmra.mrb[2].mxu0 %v10454_v46  ;;  %v12297_v1 = vand.u32 4294901760, %v10201_v44  ;;  %v12302_v44 = vand.u32 4294901760, %v10216_v45  ;;  %v12308_v45 = vand.u32 4294901760, %v10369_v17  ;;  %v2262_v17 = vld [vmem:[#allocation2 + $0x1f8] sm:$0xff] }
 0x3a3   :  { %8643 = vmatpush3.bf16.msra.mxu0 %v8642_v58  ;;  %7147 = vmatprep.mubr.msk.f32.mxu0 %vm9602_vm0, %v12265_v4  ;;  %v10480_v58 = vsub.f32 %v2247_v18, %v2269_v8  ;;  %v2293_v18 = vand.u32 4294901760, %v2255_v5  ;;  %v10499_v8 = vsub.f32 %v2254_v50, %v2290_v30  ;;  %v8690_v30 = vpack.c.bf16 %v1705_v14, %v1698_v47 }
 0x3a4   :  { %8644 = vmatprep.subr.bf16.mxu0 %v12198_v0  ;;  %8742 = vmatpush3.bf16.msra.mxu1 %v10486_v11  ;;  %v8696_v47 = vpack.c.bf16 %v12300_v56, %v12299_v60  ;;  %v12301_v14 = vand.u32 4294901760, %v10214_v40  ;;  %v12307_v40 = vand.u32 4294901760, %v10367_v39  ;;  %v2261_v39 = vld [vmem:[#allocation2 + $0x1f0] sm:$0xff] }
 0x3a5   :  { %v10501_v9 = vsub.f32 %v2255_v5, %v2293_v18  ;;  %8743 = vmatprep.subr.bf16.mxu1 %v12198_v0  ;;  %v10652_v5 = vsub.f32 %v2260_v3, %v2308_v38 }
 0x3a7   :  { %8646 = vmatpush3.bf16.msra.mxu0 %v8645_v22  ;;  %v10509_v22 = vpack.c.bf16 %v2284_v29, %v2281_v63  ;;  %v2370_v63 = vsub.f32 %v10482_v43, %v2369_v36 }
 0x3a8   :  { %8647 = vmatprep.subr.bf16.mxu0 %v12198_v0 }
 0x3a9   :  { %8745 = vmatpush3.bf16.msra.mxu1 %v10509_v22 }
 0x3aa   :  { %8746 = vmatprep.subr.bf16.mxu1 %v12198_v0 }
 0x3ab   :  { %8649 = vmatpush3.bf16.msra.mxu0 %v8648_v12  ;;  %v10525_v12 = vpack.c.bf16 %v2296_v10, %v2293_v18 }
 0x3ac   :  { %8650 = vmatprep.subr.bf16.mxu0 %v12198_v0 }
 0x3ad   :  { %8748 = vmatpush3.bf16.msra.mxu1 %v10517_v6 }
 0x3ae   :  { %8749 = vmatprep.subr.bf16.mxu1 %v12198_v0 }
 0x3af   :  { %8652 = vmatpush3.bf16.msra.mxu0 %v8651_v54  ;;  %v12298_v54 = vand.u32 4294901760, %v10205_v26  ;;  %v8699_v26 = vpack.c.bf16 %v12302_v44, %v12301_v14  ;;  %v12190_v14 = vand.u32 4294901760, %v10490_v51  ;;  %v12189_v44 = vand.u32 4294901760, %v10493_v21 }
 0x3b0   :  { %8653 = vmatprep.subr.bf16.mxu0 %v12198_v0 }
 0x3b1   :  { %8751 = vmatpush3.bf16.msra.mxu1 %v10525_v12 }
 0x3b2   :  { %8752 = vmatprep.subr.bf16.mxu1 %v12198_v0 }
 0x3b3   :  { %8655 = vmatpush3.bf16.msra.mxu0 %v8654_v7  ;;  %v8693_v7 = vpack.c.bf16 %v12298_v54, %v12297_v1  ;;  %v2371_v1 = vand.u32 4294901760, %v2370_v63  ;;  %v12192_v54 = vand.u32 4294901760, %v10484_v32 }
 0x3b4   :  { %8656 = vmatprep.subr.bf16.mxu0 %v12198_v0 }
 0x3b5   :  { %v2377_v56 = vsub.f32 %v10484_v32, %v12192_v54 }
 0x3b7   :  { %8658 = vmatpush3.bf16.msra.mxu0 %v8657_v25 }
 0x3b8   :  { %8659 = vmatprep.subr.bf16.mxu0 %v12198_v0 }
 0x3bb   :  { %8661 = vmatpush3.bf16.msra.mxu0 %v8660_v31  ;;  %v8705_v31 = vpack.c.bf16 %v12306_v52, %v12305_v33 }
 0x3bc   :  { %8662 = vmatprep.subr.bf16.mxu0 %v12198_v0 }
 0x3bf   :  { %8664 = vmatpush3.bf16.msra.mxu0 %v8663_v59  ;;  %v8708_v59 = vpack.c.bf16 %v12308_v45, %v12307_v40  ;;  %v12188_v40 = vand.u32 4294901760, %v10497_v53  ;;  %v12187_v45 = vand.u32 4294901760, %v10499_v8 }
 0x3c0   :  { %8665 = vmatprep.subr.bf16.mxu0 %v12198_v0 }
 0x3c2   :  { %7148 = vmatmul.mubr.f32.vlgmr.msra.gmra.mrb[2].mxu0 %v10457_v49  ;;  %v12304_v49 = vand.u32 4294901760, %v10220_v34  ;;  %v12310_v34 = vand.u32 4294901760, %v10374_v62  ;;  %v2314_v62 = vand.u32 4294901760, %v2262_v17 }
 0x3c3   :  { %8667 = vmatpush3.bf16.msra.mxu0 %v10195_v61  ;;  %7182 = vmatprep.mubr.msk.f32.mxu0 %vm9602_vm0, %v12265_v4 }
 0x3c4   :  { %8668 = vmatprep.subr.bf16.mxu0 %v12198_v0  ;;  %v10657_v10 = vsub.f32 %v2262_v17, %v2314_v62 }
 0x3c7   :  { %8670 = vmatpush3.bf16.msra.mxu0 %v10203_v28 }
 0x3c8   :  { %8671 = vmatprep.subr.bf16.mxu0 %v12198_v0 }
 0x3cb   :  { %8673 = vmatpush3.bf16.msra.mxu0 %v10226_v57 }
 0x3cc   :  { %8674 = vmatprep.subr.bf16.mxu0 %v12198_v0 }
 0x3cf   :  { %8676 = vmatpush3.bf16.msra.mxu0 %v10234_v24 }
 0x3d0   :  { %8677 = vmatprep.subr.bf16.mxu0 %v12198_v0 }
 0x3d3   :  { %8679 = vmatpush3.bf16.msra.mxu0 %v10242_v42 }
 0x3d4   :  { %8680 = vmatprep.subr.bf16.mxu0 %v12198_v0 }
 0x3d7   :  { %8682 = vmatpush3.bf16.msra.mxu0 %v10345_v41 }
 0x3d8   :  { %8683 = vmatprep.subr.bf16.mxu0 %v12198_v0 }
 0x3db   :  { %8685 = vmatpush3.bf16.msra.mxu0 %v10349_v35 }
 0x3dc   :  { %8686 = vmatprep.subr.bf16.mxu0 %v12198_v0 }
 0x3df   :  { %8688 = vmatpush3.bf16.msra.mxu0 %v10355_v37 }
 0x3e0   :  { %8689 = vmatprep.subr.bf16.mxu0 %v12198_v0 }
 0x3e2   :  { %7183 = vmatmul.mubr.f32.vlgmr.msra.gmra.mrb[2].mxu0 %v1687_v48  ;;  %v12303_v48 = vand.u32 4294901760, %v10218_v16  ;;  %v12309_v16 = vand.u32 4294901760, %v10372_v13  ;;  %v2311_v13 = vand.u32 4294901760, %v2261_v39 }
 0x3e3   :  { %8691 = vmatpush3.bf16.msra.mxu0 %v8690_v30  ;;  %7217 = vmatprep.mubr.msk.f32.mxu0 %vm9602_vm0, %v12265_v4 }
 0x3e4   :  { %8692 = vmatprep.subr.bf16.mxu0 %v12198_v0  ;;  %v8702_v25 = vpack.c.bf16 %v12304_v49, %v12303_v48  ;;  %v8711_v19 = vpack.c.bf16 %v12310_v34, %v12309_v16  ;;  %v10638_v27 = vpack.c.bf16 %v2314_v62, %v2311_v13  ;;  %v10655_v18 = vsub.f32 %v2261_v39, %v2311_v13 }
 0x3e5   :  { %v2391_v49 = vsub.f32 %v10490_v51, %v12190_v14  ;;  %v2405_v16 = vsub.f32 %v10497_v53, %v12188_v40  ;;  %v2412_v34 = vsub.f32 %v10499_v8, %v12187_v45 }
 0x3e7   :  { %8694 = vmatpush3.bf16.msra.mxu0 %v8693_v7  ;;  %v12191_v7 = vand.u32 4294901760, %v10488_v23  ;;  %v2392_v52 = vand.u32 4294901760, %v2391_v49 }
 0x3e8   :  { %8695 = vmatprep.subr.bf16.mxu0 %v12198_v0 }
 0x3eb   :  { %8697 = vmatpush3.bf16.msra.mxu0 %v8696_v47  ;;  %v2384_v47 = vsub.f32 %v10488_v23, %v12191_v7 }
 0x3ec   :  { %8698 = vmatprep.subr.bf16.mxu0 %v12198_v0 }
 0x3ed   :  { %v2385_v48 = vand.u32 4294901760, %v2384_v47 }
 0x3ef   :  { %8700 = vmatpush3.bf16.msra.mxu0 %v8699_v26  ;;  %v2378_v26 = vand.u32 4294901760, %v2377_v56  ;;  %v12181_v56 = vand.u32 4294901760, %v10652_v5 }
 0x3f0   :  { %8701 = vmatprep.subr.bf16.mxu0 %v12198_v0 }
 0x3f1   :  { %v8765_v33 = vpack.c.bf16 %v2385_v48, %v2378_v26  ;;  %v2454_v48 = vsub.f32 %v10652_v5, %v12181_v56 }
 0x3f3   :  { %8703 = vmatpush3.bf16.msra.mxu0 %v8702_v25  ;;  %v2398_v25 = vsub.f32 %v10493_v21, %v12189_v44 }
 0x3f4   :  { %8704 = vmatprep.subr.bf16.mxu0 %v12198_v0 }
 0x3f7   :  { %8706 = vmatpush3.bf16.msra.mxu0 %v8705_v31  ;;  %v2399_v31 = vand.u32 4294901760, %v2398_v25  ;;  %v2455_v25 = vand.u32 4294901760, %v2454_v48  ;;  %v8807_v48 = vpack.c.bf16 %v10657_v10, %v10655_v18 }
 0x3f8   :  { %8707 = vmatprep.subr.bf16.mxu0 %v12198_v0 }
 0x3fb   :  { %8709 = vmatpush3.bf16.msra.mxu0 %v8708_v59  ;;  %v8768_v59 = vpack.c.bf16 %v2399_v31, %v2392_v52  ;;  %v12180_v52 = vand.u32 4294901760, %v10655_v18  ;;  %v12179_v31 = vand.u32 4294901760, %v10657_v10 }
 0x3fc   :  { %8710 = vmatprep.subr.bf16.mxu0 %v12198_v0 }
 0x3ff   :  { %8712 = vmatpush3.bf16.msra.mxu0 %v8711_v19  ;;  %v2406_v19 = vand.u32 4294901760, %v2405_v16 }
 0x400   :  { %8713 = vmatprep.subr.bf16.mxu0 %v12198_v0 }
 0x402   :  { %7218 = vmatmul.mubr.f32.vlgmr.msra.gmra.mrb[2].mxu0 %v10454_v46 }
 0x403   :  { %8715 = vmatpush3.bf16.msra.mxu0 %v10195_v61  ;;  %7252 = vmatprep.mubr.msk.f32.mxu0 %vm9602_vm0, %v12265_v4  ;;  %v2258_v61 = vld [vmem:[#allocation2 + $0x1d8] sm:$0xff] }
 0x404   :  { %8716 = vmatprep.subr.bf16.mxu0 %v12198_v0 }
 0x407   :  { %8718 = vmatpush3.bf16.msra.mxu0 %v10203_v28  ;;  %v2257_v28 = vld [vmem:[#allocation2 + $0x1d0] sm:$0xff] }
 0x408   :  { %8719 = vmatprep.subr.bf16.mxu0 %v12198_v0 }
 0x40b   :  { %8721 = vmatpush3.bf16.msra.mxu0 %v10226_v57  ;;  %v2299_v57 = vand.u32 4294901760, %v2257_v28 }
 0x40c   :  { %8722 = vmatprep.subr.bf16.mxu0 %v12198_v0 }
 0x40d   :  { %v10646_v29 = vsub.f32 %v2257_v28, %v2299_v57  ;;  %v2413_v28 = vand.u32 4294901760, %v2412_v34  ;;  %v2461_v34 = vsub.f32 %v10655_v18, %v12180_v52 }
 0x40f   :  { %8724 = vmatpush3.bf16.msra.mxu0 %v10234_v24  ;;  %v2302_v24 = vand.u32 4294901760, %v2258_v61  ;;  %v12184_v39 = vand.u32 4294901760, %v10646_v29 }
 0x410   :  { %8725 = vmatprep.subr.bf16.mxu0 %v12198_v0 }
 0x411   :  { %v10648_v20 = vsub.f32 %v2258_v61, %v2302_v24  ;;  %v12186_v61 = vand.u32 4294901760, %v10501_v9  ;;  %v2433_v62 = vsub.f32 %v10646_v29, %v12184_v39 }
 0x413   :  { %8727 = vmatpush3.bf16.msra.mxu0 %v10242_v42  ;;  %v10628_v42 = vpack.c.bf16 %v2302_v24, %v2299_v57  ;;  %v12185_v57 = vand.u32 4294901760, %v10503_v55  ;;  %v8771_v24 = vpack.c.bf16 %v2413_v28, %v2406_v19  ;;  %v12183_v17 = vand.u32 4294901760, %v10648_v20 }
 0x414   :  { %8728 = vmatprep.subr.bf16.mxu0 %v12198_v0  ;;  %v2434_v63 = vand.u32 4294901760, %v2433_v62  ;;  %v2468_v19 = vsub.f32 %v10657_v10, %v12179_v31  ;;  %v2462_v28 = vand.u32 4294901760, %v2461_v34  ;;  %v8792_v62 = vpack.c.bf16 %v10493_v21, %v10490_v51 }
 0x415   :  { %8754 = vmatpush3.bf16.msra.mxu1 %v10628_v42  ;;  %v2426_v3 = vsub.f32 %v10503_v55, %v12185_v57 }
 0x416   :  { %8755 = vmatprep.subr.bf16.mxu1 %v12198_v0 }
 0x417   :  { %8730 = vmatpush3.bf16.msra.mxu0 %v10345_v41  ;;  %v2259_v41 = vld [vmem:[#allocation2 + $0x1e0] sm:$0xff] }
 0x418   :  { %8731 = vmatprep.subr.bf16.mxu0 %v12198_v0 }
 0x41b   :  { %8733 = vmatpush3.bf16.msra.mxu0 %v10349_v35  ;;  %v2305_v35 = vand.u32 4294901760, %v2259_v41 }
 0x41c   :  { %8734 = vmatprep.subr.bf16.mxu0 %v12198_v0 }
 0x41d   :  { %v10650_v50 = vsub.f32 %v2259_v41, %v2305_v35  ;;  %v2419_v41 = vsub.f32 %v10501_v9, %v12186_v61  ;;  %v2920_v61 = vld [vmem:[#allocation2 + $0x248] sm:$0xff] }
 0x41f   :  { %8736 = vmatpush3.bf16.msra.mxu0 %v10355_v37  ;;  %v10632_v37 = vpack.c.bf16 %v2308_v38, %v2305_v35  ;;  %v2420_v35 = vand.u32 4294901760, %v2419_v41  ;;  %v2427_v38 = vand.u32 4294901760, %v2426_v3  ;;  %v2469_v41 = vand.u32 4294901760, %v2468_v19 }
 0x420   :  { %8881 = vmatprep.subr.bf16.mxu0 %v12198_v0 }
 0x421   :  { %8757 = vmatpush3.bf16.msra.mxu1 %v10632_v37  ;;  %v8774_v13 = vpack.c.bf16 %v2427_v38, %v2420_v35  ;;  %v8783_v3 = vpack.c.bf16 %v2469_v41, %v2462_v28  ;;  %v8786_v35 = vpack.c.bf16 %v10482_v43, %v10480_v58  ;;  %v8789_v38 = vpack.c.bf16 %v10488_v23, %v10484_v32 }
 0x422   :  { %7253 = vmatmul.mubr.f32.vlgmr.msra.gmra.mrb[2].mxu0 %v10454_v46  ;;  %v2362_v46 = vand.u32 4294901760, %v10480_v58  ;;  %8758 = vmatprep.subr.bf16.mxu1 %v12198_v0  ;;  %v12313_v43 = vand.u32 4294901760, %v10490_v51  ;;  %v12320_v51 = vand.u32 4294901760, %v10648_v20 }
 0x423   :  { %7497 = vmatprep.mubr.msk.f32.mxu0 %vm9602_vm0, %v12265_v4 }
 0x424   :  { %v2363_v2 = vsub.f32 %v10480_v58, %v2362_v46  ;;  %v12314_v58 = vand.u32 4294901760, %v10493_v21  ;;  %v12319_v21 = vand.u32 4294901760, %v10646_v29 }
 0x425   :  { %8760 = vmatpush3.bf16.msra.mxu1 %v10638_v27 }
 0x426   :  { %8761 = vmatprep.subr.bf16.mxu1 %v12198_v0  ;;  %v2364_v30 = vand.u32 4294901760, %v2363_v2  ;;  %v2440_v2 = vsub.f32 %v10648_v20, %v12183_v17 }
 0x428   :  { %v10662_v60 = vpack.c.bf16 %v2371_v1, %v2364_v30  ;;  %v2441_v30 = vand.u32 4294901760, %v2440_v2  ;;  %v12182_v1 = vand.u32 4294901760, %v10650_v50  ;;  %v8795_v2 = vpack.c.bf16 %v10499_v8, %v10497_v53 }
 0x42a   :  { %v8777_v47 = vpack.c.bf16 %v2441_v30, %v2434_v63  ;;  %v2447_v26 = vsub.f32 %v10650_v50, %v12182_v1  ;;  %v8798_v63 = vpack.c.bf16 %v10503_v55, %v10501_v9  ;;  %v8801_v30 = vpack.c.bf16 %v10648_v20, %v10646_v29  ;;  %v2924_v29 = vld [vmem:[#allocation2 + $0x268] sm:$0xff] }
 0x42b   :  { %v2972_v20 = vand.u32 4294901760, %v2924_v29 }
 0x42c   :  { %v2448_v49 = vand.u32 4294901760, %v2447_v26  ;;  %v8804_v26 = vpack.c.bf16 %v10652_v5, %v10650_v50 }
 0x42e   :  { %v8780_v16 = vpack.c.bf16 %v2455_v25, %v2448_v49  ;;  %v5797_v49 = vld [vmem:[%s12125_s2 + $0x2] ss:$0 sm:$0xff] }
 0x4f5   :  { %v2241_v25 = vpop.f32.mrb[2].mxu0 }
 0x4f6   :  { %v9459_v34 = vadd.f32 %v5797_v49, %v2241_v25  ;;  %v7254_v19 = vpop.f32.mrb[3].mxu0 }
 0x4f7   :  { %v2918_v19 = vld [vmem:[#allocation2 + $0x238] sm:$0xff] }
 0x4f8   :  { %v2245_v28 = vmax.f32 %v9459_v34, 0.0  ;;  %v2917_v34 = vld [vmem:[#allocation2 + $0x230] sm:$0xff]  ;;  %v2954_v54 = vand.u32 4294901760, %v2918_v19 }
 0x4f9   :  { %v2951_v7 = vand.u32 4294901760, %v2917_v34 }
 0x4fa   :  { %v10737_v41 = vand.u32 4294901760, %v2245_v28 }
 0x4fc   :  { %v10740_v31 = vsub.f32 %v2245_v28, %v10737_v41  ;;  %v2919_v28 = vld [vmem:[#allocation2 + $0x240] sm:$0xff] }
 0x4fe   :  { %v2351_v52 = vand.u32 4294901760, %v10740_v31 }
 0x500   :  { %v2352_v56 = vsub.f32 %v10740_v31, %v2351_v52 }
 0x502   :  { %v2353_v1 = vand.u32 4294901760, %v2352_v56 }
 0x504   :  { %7288 = vmatmul.mubr.f32.vlgmr.msra.gmra.mrb[2].mxu1 %v2353_v1  ;;  %v2914_v1 = vld [vmem:[#allocation2 + $0x218] sm:$0xff] }
 0x505   :  { %8763 = vmatpush3.bf16.msra.mxu1 %v10662_v60  ;;  %7322 = vmatprep.mubr.msk.f32.mxu1 %vm9602_vm0, %v12265_v4  ;;  %v2911_v60 = vld [vmem:[#allocation2 + $0x200] sm:$0xff] }
 0x506   :  { %8764 = vmatprep.subr.bf16.mxu1 %v12198_v0 }
 0x509   :  { %8766 = vmatpush3.bf16.msra.mxu1 %v8765_v33  ;;  %v2912_v33 = vld [vmem:[#allocation2 + $0x208] sm:$0xff] }
 0x50a   :  { %8767 = vmatprep.subr.bf16.mxu1 %v12198_v0 }
 0x50d   :  { %8769 = vmatpush3.bf16.msra.mxu1 %v8768_v59  ;;  %v2913_v59 = vld [vmem:[#allocation2 + $0x210] sm:$0xff] }
 0x50e   :  { %8770 = vmatprep.subr.bf16.mxu1 %v12198_v0  ;;  %v2939_v56 = vand.u32 4294901760, %v2913_v59 }
 0x510   :  { %v10767_v57 = vsub.f32 %v2913_v59, %v2939_v56  ;;  %v10780_v59 = vsub.f32 %v2917_v34, %v2951_v7 }
 0x511   :  { %8772 = vmatpush3.bf16.msra.mxu1 %v8771_v24  ;;  %v2933_v24 = vand.u32 4294901760, %v2911_v60 }
 0x512   :  { %8773 = vmatprep.subr.bf16.mxu1 %v12198_v0 }
 0x515   :  { %8775 = vmatpush3.bf16.msra.mxu1 %v8774_v13  ;;  %v2936_v13 = vand.u32 4294901760, %v2912_v33 }
 0x516   :  { %8776 = vmatprep.subr.bf16.mxu1 %v12198_v0 }
 0x517   :  { %v10761_v17 = vpack.c.bf16 %v2936_v13, %v2933_v24  ;;  %v10765_v39 = vsub.f32 %v2912_v33, %v2936_v13  ;;  %v2960_v33 = vand.u32 4294901760, %v2920_v61 }
 0x519   :  { %8778 = vmatpush3.bf16.msra.mxu1 %v8777_v47  ;;  %v2915_v47 = vld [vmem:[#allocation2 + $0x220] sm:$0xff]  ;;  %8883 = vmatpush3.bf16.msra.mxu0 %v10761_v17 }
 0x51a   :  { %8779 = vmatprep.subr.bf16.mxu1 %v12198_v0  ;;  %v2945_v49 = vand.u32 4294901760, %v2915_v47  ;;  %8884 = vmatprep.subr.bf16.mxu0 %v12198_v0 }
 0x51c   :  { %v10773_v44 = vsub.f32 %v2915_v47, %v2945_v49  ;;  %v3033_v47 = vand.u32 4294901760, %v10765_v39 }
 0x51d   :  { %8781 = vmatpush3.bf16.msra.mxu1 %v8780_v16  ;;  %v2916_v16 = vld [vmem:[#allocation2 + $0x228] sm:$0xff] }
 0x51e   :  { %8782 = vmatprep.subr.bf16.mxu1 %v12198_v0  ;;  %v2948_v25 = vand.u32 4294901760, %v2916_v16 }
 0x520   :  { %v10776_v14 = vsub.f32 %v2916_v16, %v2948_v25 }
 0x521   :  { %8784 = vmatpush3.bf16.msra.mxu1 %v8783_v3  ;;  %v2942_v3 = vand.u32 4294901760, %v2914_v1 }
 0x522   :  { %8785 = vmatprep.subr.bf16.mxu1 %v12198_v0 }
 0x523   :  { %v10769_v45 = vpack.c.bf16 %v2942_v3, %v2939_v56  ;;  %v10771_v40 = vsub.f32 %v2914_v1, %v2942_v3  ;;  %v10786_v1 = vsub.f32 %v2920_v61, %v2960_v33  ;;  %v10800_v61 = vpack.c.bf16 %v2954_v54, %v2951_v7 }
 0x524   :  { %7323 = vmatmul.mubr.f32.vlgmr.msra.gmra.mrb[2].mxu1 %v10737_v41  ;;  %v12311_v7 = vand.u32 4294901760, %v10484_v32  ;;  %v12316_v32 = vand.u32 4294901760, %v10499_v8  ;;  %v12322_v8 = vand.u32 4294901760, %v10652_v5  ;;  %v2926_v5 = vld [vmem:[#allocation2 + $0x278] sm:$0xff] }
 0x525   :  { %8787 = vmatpush3.bf16.msra.mxu1 %v8786_v35  ;;  %7357 = vmatprep.mubr.msk.f32.mxu1 %vm9602_vm0, %v12265_v4  ;;  %v10763_v35 = vsub.f32 %v2911_v60, %v2933_v24  ;;  %v2957_v60 = vand.u32 4294901760, %v2919_v28  ;;  %v10782_v24 = vsub.f32 %v2918_v19, %v2954_v54  ;;  %v8834_v54 = vpack.c.bf16 %v2369_v36, %v2362_v46 }
 0x526   :  { %8788 = vmatprep.subr.bf16.mxu1 %v12198_v0  ;;  %8886 = vmatpush3.bf16.msra.mxu0 %v10769_v45  ;;  %v8840_v46 = vpack.c.bf16 %v12314_v58, %v12313_v43  ;;  %v12315_v36 = vand.u32 4294901760, %v10497_v53  ;;  %v12321_v53 = vand.u32 4294901760, %v10650_v50  ;;  %v2925_v50 = vld [vmem:[#allocation2 + $0x270] sm:$0xff] }
 0x527   :  { %v10784_v13 = vsub.f32 %v2919_v28, %v2957_v60  ;;  %8887 = vmatprep.subr.bf16.mxu0 %v12198_v0  ;;  %v10935_v28 = vsub.f32 %v2924_v29, %v2972_v20 }
 0x529   :  { %8790 = vmatpush3.bf16.msra.mxu1 %v8789_v38  ;;  %v10792_v38 = vpack.c.bf16 %v2948_v25, %v2945_v49  ;;  %v3034_v49 = vsub.f32 %v10765_v39, %v3033_v47 }
 0x52a   :  { %8791 = vmatprep.subr.bf16.mxu1 %v12198_v0 }
 0x52b   :  { %8889 = vmatpush3.bf16.msra.mxu0 %v10792_v38 }
 0x52c   :  { %8890 = vmatprep.subr.bf16.mxu0 %v12198_v0 }
 0x52d   :  { %8793 = vmatpush3.bf16.msra.mxu1 %v8792_v62  ;;  %v10808_v62 = vpack.c.bf16 %v2960_v33, %v2957_v60 }
 0x52e   :  { %8794 = vmatprep.subr.bf16.mxu1 %v12198_v0 }
 0x52f   :  { %8892 = vmatpush3.bf16.msra.mxu0 %v10800_v61 }
 0x530   :  { %8893 = vmatprep.subr.bf16.mxu0 %v12198_v0 }
 0x531   :  { %8796 = vmatpush3.bf16.msra.mxu1 %v8795_v2  ;;  %v12312_v2 = vand.u32 4294901760, %v10488_v23  ;;  %v8843_v23 = vpack.c.bf16 %v12316_v32, %v12315_v36  ;;  %v3054_v36 = vand.u32 4294901760, %v10773_v44  ;;  %v3061_v32 = vand.u32 4294901760, %v10776_v14 }
 0x532   :  { %8797 = vmatprep.subr.bf16.mxu1 %v12198_v0 }
 0x533   :  { %8895 = vmatpush3.bf16.msra.mxu0 %v10808_v62 }
 0x534   :  { %8896 = vmatprep.subr.bf16.mxu0 %v12198_v0 }
 0x535   :  { %8799 = vmatpush3.bf16.msra.mxu1 %v8798_v63  ;;  %v8837_v63 = vpack.c.bf16 %v12312_v2, %v12311_v7  ;;  %v3035_v7 = vand.u32 4294901760, %v3034_v49  ;;  %v3040_v2 = vand.u32 4294901760, %v10767_v57 }
 0x536   :  { %8800 = vmatprep.subr.bf16.mxu1 %v12198_v0 }
 0x537   :  { %v3041_v58 = vsub.f32 %v10767_v57, %v3040_v2 }
 0x539   :  { %8802 = vmatpush3.bf16.msra.mxu1 %v8801_v30 }
 0x53a   :  { %8803 = vmatprep.subr.bf16.mxu1 %v12198_v0 }
 0x53d   :  { %8805 = vmatpush3.bf16.msra.mxu1 %v8804_v26  ;;  %v8849_v26 = vpack.c.bf16 %v12320_v51, %v12319_v21 }
 0x53e   :  { %8806 = vmatprep.subr.bf16.mxu1 %v12198_v0 }
 0x541   :  { %8808 = vmatpush3.bf16.msra.mxu1 %v8807_v48  ;;  %v8852_v48 = vpack.c.bf16 %v12322_v8, %v12321_v53  ;;  %v3068_v53 = vand.u32 4294901760, %v10780_v59  ;;  %v3075_v8 = vand.u32 4294901760, %v10782_v24 }
 0x542   :  { %8809 = vmatprep.subr.bf16.mxu1 %v12198_v0 }
 0x544   :  { %7358 = vmatmul.mubr.f32.vlgmr.msra.gmra.mrb[2].mxu1 %v10740_v31  ;;  %v12318_v31 = vand.u32 4294901760, %v10503_v55  ;;  %v12324_v55 = vand.u32 4294901760, %v10657_v10  ;;  %v2978_v10 = vand.u32 4294901760, %v2926_v5 }
 0x545   :  { %8811 = vmatpush3.bf16.msra.mxu1 %v10478_v15  ;;  %7392 = vmatprep.mubr.msk.f32.mxu1 %vm9602_vm0, %v12265_v4 }
 0x546   :  { %8812 = vmatprep.subr.bf16.mxu1 %v12198_v0  ;;  %v10940_v33 = vsub.f32 %v2926_v5, %v2978_v10 }
 0x549   :  { %8814 = vmatpush3.bf16.msra.mxu1 %v10486_v11 }
 0x54a   :  { %8815 = vmatprep.subr.bf16.mxu1 %v12198_v0 }
 0x54d   :  { %8817 = vmatpush3.bf16.msra.mxu1 %v10509_v22 }
 0x54e   :  { %8818 = vmatprep.subr.bf16.mxu1 %v12198_v0 }
 0x551   :  { %8820 = vmatpush3.bf16.msra.mxu1 %v10517_v6 }
 0x552   :  { %8821 = vmatprep.subr.bf16.mxu1 %v12198_v0 }
 0x555   :  { %8823 = vmatpush3.bf16.msra.mxu1 %v10525_v12 }
 0x556   :  { %8824 = vmatprep.subr.bf16.mxu1 %v12198_v0 }
 0x559   :  { %8826 = vmatpush3.bf16.msra.mxu1 %v10628_v42 }
 0x55a   :  { %8827 = vmatprep.subr.bf16.mxu1 %v12198_v0 }
 0x55d   :  { %8829 = vmatpush3.bf16.msra.mxu1 %v10632_v37 }
 0x55e   :  { %8830 = vmatprep.subr.bf16.mxu1 %v12198_v0 }
 0x561   :  { %8832 = vmatpush3.bf16.msra.mxu1 %v10638_v27 }
 0x562   :  { %8833 = vmatprep.subr.bf16.mxu1 %v12198_v0 }
 0x564   :  { %7393 = vmatmul.mubr.f32.vlgmr.msra.gmra.mrb[2].mxu1 %v2351_v52  ;;  %v12317_v52 = vand.u32 4294901760, %v10501_v9  ;;  %v12323_v9 = vand.u32 4294901760, %v10655_v18  ;;  %v2975_v18 = vand.u32 4294901760, %v2925_v50 }
 0x565   :  { %8835 = vmatpush3.bf16.msra.mxu1 %v8834_v54  ;;  %7427 = vmatprep.mubr.msk.f32.mxu1 %vm9602_vm0, %v12265_v4 }
 0x566   :  { %8836 = vmatprep.subr.bf16.mxu1 %v12198_v0  ;;  %v8846_v30 = vpack.c.bf16 %v12318_v31, %v12317_v52  ;;  %v8855_v56 = vpack.c.bf16 %v12324_v55, %v12323_v9  ;;  %v10921_v16 = vpack.c.bf16 %v2978_v10, %v2975_v18  ;;  %v10938_v60 = vsub.f32 %v2925_v50, %v2975_v18 }
 0x567   :  { %v3055_v31 = vsub.f32 %v10773_v44, %v3054_v36  ;;  %v3069_v9 = vsub.f32 %v10780_v59, %v3068_v53  ;;  %v3076_v55 = vsub.f32 %v10782_v24, %v3075_v8 }
 0x569   :  { %8838 = vmatpush3.bf16.msra.mxu1 %v8837_v63  ;;  %v3047_v63 = vand.u32 4294901760, %v10771_v40  ;;  %v3056_v51 = vand.u32 4294901760, %v3055_v31 }
 0x56a   :  { %8839 = vmatprep.subr.bf16.mxu1 %v12198_v0 }
 0x56d   :  { %8841 = vmatpush3.bf16.msra.mxu1 %v8840_v46  ;;  %v3048_v46 = vsub.f32 %v10771_v40, %v3047_v63 }
 0x56e   :  { %8842 = vmatprep.subr.bf16.mxu1 %v12198_v0 }
 0x56f   :  { %v3049_v52 = vand.u32 4294901760, %v3048_v46 }
 0x571   :  { %8844 = vmatpush3.bf16.msra.mxu1 %v8843_v23  ;;  %v3042_v23 = vand.u32 4294901760, %v3041_v58  ;;  %v12195_v58 = vand.u32 4294901760, %v10935_v28 }
 0x572   :  { %8845 = vmatprep.subr.bf16.mxu1 %v12198_v0 }
 0x573   :  { %v8909_v21 = vpack.c.bf16 %v3049_v52, %v3042_v23  ;;  %v3118_v52 = vsub.f32 %v10935_v28, %v12195_v58 }
 0x575   :  { %8847 = vmatpush3.bf16.msra.mxu1 %v8846_v30  ;;  %v3062_v30 = vsub.f32 %v10776_v14, %v3061_v32 }
 0x576   :  { %8848 = vmatprep.subr.bf16.mxu1 %v12198_v0 }
 0x579   :  { %8850 = vmatpush3.bf16.msra.mxu1 %v8849_v26  ;;  %v3063_v26 = vand.u32 4294901760, %v3062_v30  ;;  %v3119_v30 = vand.u32 4294901760, %v3118_v52  ;;  %v8951_v52 = vpack.c.bf16 %v10940_v33, %v10938_v60 }
 0x57a   :  { %8851 = vmatprep.subr.bf16.mxu1 %v12198_v0 }
 0x57d   :  { %8853 = vmatpush3.bf16.msra.mxu1 %v8852_v48  ;;  %v8912_v48 = vpack.c.bf16 %v3063_v26, %v3056_v51  ;;  %v12194_v51 = vand.u32 4294901760, %v10938_v60  ;;  %v12193_v26 = vand.u32 4294901760, %v10940_v33 }
 0x57e   :  { %8854 = vmatprep.subr.bf16.mxu1 %v12198_v0 }
 0x581   :  { %8856 = vmatpush3.bf16.msra.mxu1 %v8855_v56  ;;  %v3070_v56 = vand.u32 4294901760, %v3069_v9 }
 0x582   :  { %8857 = vmatprep.subr.bf16.mxu1 %v12198_v0 }
 0x584   :  { %7428 = vmatmul.mubr.f32.vlgmr.msra.gmra.mrb[2].mxu1 %v10737_v41 }
 0x585   :  { %8859 = vmatpush3.bf16.msra.mxu1 %v10478_v15  ;;  %7462 = vmatprep.mubr.msk.f32.mxu1 %vm9602_vm0, %v12265_v4  ;;  %v2922_v15 = vld [vmem:[#allocation2 + $0x258] sm:$0xff] }
 0x586   :  { %8860 = vmatprep.subr.bf16.mxu1 %v12198_v0 }
 0x589   :  { %8862 = vmatpush3.bf16.msra.mxu1 %v10486_v11  ;;  %v2921_v11 = vld [vmem:[#allocation2 + $0x250] sm:$0xff] }
 0x58a   :  { %8863 = vmatprep.subr.bf16.mxu1 %v12198_v0 }
 0x58d   :  { %8865 = vmatpush3.bf16.msra.mxu1 %v10509_v22  ;;  %v2963_v22 = vand.u32 4294901760, %v2921_v11 }
 0x58e   :  { %8866 = vmatprep.subr.bf16.mxu1 %v12198_v0 }
 0x58f   :  { %v10929_v25 = vsub.f32 %v2921_v11, %v2963_v22  ;;  %v3077_v11 = vand.u32 4294901760, %v3076_v55  ;;  %v3125_v55 = vsub.f32 %v10938_v60, %v12194_v51 }
 0x591   :  { %8868 = vmatpush3.bf16.msra.mxu1 %v10517_v6  ;;  %v2966_v6 = vand.u32 4294901760, %v2922_v15  ;;  %v3096_v50 = vand.u32 4294901760, %v10929_v25 }
 0x592   :  { %8869 = vmatprep.subr.bf16.mxu1 %v12198_v0 }
 0x593   :  { %v10931_v34 = vsub.f32 %v2922_v15, %v2966_v6  ;;  %v3082_v15 = vand.u32 4294901760, %v10784_v13  ;;  %v3097_v10 = vsub.f32 %v10929_v25, %v3096_v50 }
 0x595   :  { %8871 = vmatpush3.bf16.msra.mxu1 %v10525_v12  ;;  %v10911_v12 = vpack.c.bf16 %v2966_v6, %v2963_v22  ;;  %v3089_v22 = vand.u32 4294901760, %v10786_v1  ;;  %v8915_v6 = vpack.c.bf16 %v3077_v11, %v3070_v56  ;;  %v3103_v5 = vand.u32 4294901760, %v10931_v34 }
 0x596   :  { %8872 = vmatprep.subr.bf16.mxu1 %v12198_v0  ;;  %v3098_v49 = vand.u32 4294901760, %v3097_v10  ;;  %v3132_v56 = vsub.f32 %v10940_v33, %v12193_v26  ;;  %v3126_v11 = vand.u32 4294901760, %v3125_v55  ;;  %v8936_v10 = vpack.c.bf16 %v10776_v14, %v10773_v44 }
 0x597   :  { %8898 = vmatpush3.bf16.msra.mxu0 %v10911_v12  ;;  %v3090_v29 = vsub.f32 %v10786_v1, %v3089_v22  ;;  %v8993_v14 = vpack.c.bf16 %v3103_v5, %v3096_v50  ;;  %v11188_v50 = vld [vmem:[#allocation2 + $0x2a8] sm:$0xff] }
 0x598   :  { %8899 = vmatprep.subr.bf16.mxu0 %v12198_v0 }
 0x599   :  { %8874 = vmatpush3.bf16.msra.mxu1 %v10628_v42  ;;  %v2923_v42 = vld [vmem:[#allocation2 + $0x260] sm:$0xff] }
 0x59a   :  { %8875 = vmatprep.subr.bf16.mxu1 %v12198_v0 }
 0x59d   :  { %8877 = vmatpush3.bf16.msra.mxu1 %v10632_v37  ;;  %v2969_v37 = vand.u32 4294901760, %v2923_v42 }
 0x59e   :  { %8878 = vmatprep.subr.bf16.mxu1 %v12198_v0 }
 0x59f   :  { %v10933_v19 = vsub.f32 %v2923_v42, %v2969_v37  ;;  %v3083_v42 = vsub.f32 %v10784_v13, %v3082_v15 }
 0x5a1   :  { %8880 = vmatpush3.bf16.msra.mxu1 %v10638_v27  ;;  %v10915_v27 = vpack.c.bf16 %v2972_v20, %v2969_v37  ;;  %v3084_v37 = vand.u32 4294901760, %v3083_v42  ;;  %v3091_v20 = vand.u32 4294901760, %v3090_v29  ;;  %v3133_v42 = vand.u32 4294901760, %v3132_v56 }
 0x5a2   :  { %9025 = vmatprep.subr.bf16.mxu1 %v12198_v0  ;;  %v12325_v44 = vand.u32 4294901760, %v10933_v19 }
 0x5a3   :  { %8901 = vmatpush3.bf16.msra.mxu0 %v10915_v27  ;;  %v8918_v18 = vpack.c.bf16 %v3091_v20, %v3084_v37  ;;  %v8927_v29 = vpack.c.bf16 %v3133_v42, %v3126_v11  ;;  %v8930_v37 = vpack.c.bf16 %v10765_v39, %v10763_v35  ;;  %v8933_v20 = vpack.c.bf16 %v10771_v40, %v10767_v57 }
 0x5a4   :  { %7463 = vmatmul.mubr.f32.vlgmr.msra.gmra.mrb[2].mxu1 %v10737_v41  ;;  %v3026_v41 = vand.u32 4294901760, %v10763_v35  ;;  %8902 = vmatprep.subr.bf16.mxu0 %v12198_v0  ;;  %v8984_v39 = vpack.c.bf16 %v3061_v32, %v3054_v36  ;;  %v8987_v40 = vpack.c.bf16 %v3075_v8, %v3068_v53  ;;  %v8990_v57 = vpack.c.bf16 %v3089_v22, %v3082_v15  ;;  %v11167_v53 = vld [vmem:[#allocation2 + $0x318] sm:$0xff] }
 0x5a5   :  { %7707 = vmatprep.mubr.msk.f32.mxu1 %vm9602_vm0, %v12265_v4 }
 0x5a6   :  { %v3027_v3 = vsub.f32 %v10763_v35, %v3026_v41  ;;  %v12326_v35 = vand.u32 4294901760, %v10935_v28 }
 0x5a7   :  { %8904 = vmatpush3.bf16.msra.mxu0 %v10921_v16 }
 0x5a8   :  { %8905 = vmatprep.subr.bf16.mxu0 %v12198_v0  ;;  %v3028_v54 = vand.u32 4294901760, %v3027_v3  ;;  %v3104_v3 = vsub.f32 %v10931_v34, %v3103_v5  ;;  %v11190_v5 = vld [vmem:[#allocation2 + $0x320] sm:$0xff] }
 0x5aa   :  { %v10945_v43 = vpack.c.bf16 %v3035_v7, %v3028_v54  ;;  %v3105_v54 = vand.u32 4294901760, %v3104_v3  ;;  %v12196_v7 = vand.u32 4294901760, %v10933_v19  ;;  %v8939_v3 = vpack.c.bf16 %v10782_v24, %v10780_v59 }
 0x5ab   :  { %v8996_v59 = vpack.c.bf16 %v12326_v35, %v12325_v44  ;;  %v12327_v24 = vand.u32 4294901760, %v10938_v60  ;;  %v3805_v44 = vld [vmem:[#allocation2 + $0x2d8] sm:$0xff]  ;;  %v4462_v35 = vld [vmem:[#allocation2 + $0x350] sm:$0xff] }
 0x5ac   :  { %v8921_v46 = vpack.c.bf16 %v3105_v54, %v3098_v49  ;;  %v3111_v23 = vsub.f32 %v10933_v19, %v12196_v7  ;;  %v8942_v49 = vpack.c.bf16 %v10786_v1, %v10784_v13  ;;  %v8945_v54 = vpack.c.bf16 %v10931_v34, %v10929_v25  ;;  %v11142_v25 = vld [vmem:[#allocation2 + $0x308] sm:$0xff] }
 0x5ad   :  { %v12328_v13 = vand.u32 4294901760, %v10940_v33  ;;  %v11158_v33 = vld [vmem:[#allocation2 + $0x290] sm:$0xff] }
 0x5ae   :  { %v3112_v31 = vand.u32 4294901760, %v3111_v23  ;;  %v8948_v23 = vpack.c.bf16 %v10935_v28, %v10933_v19  ;;  %v4472_v19 = vand.u32 4294901760, %v11142_v25  ;;  %v3817_v36 = vand.u32 4294901760, %v11158_v33 }
 0x5af   :  { %v8999_v1 = vpack.c.bf16 %v12328_v13, %v12327_v24  ;;  %v3844_v24 = vand.u32 4294901760, %v3805_v44  ;;  %v4463_v13 = vld [vmem:[#allocation2 + $0x358] sm:$0xff] }
 0x5b0   :  { %v8924_v9 = vpack.c.bf16 %v3119_v30, %v3112_v31  ;;  %v5798_v31 = vld [vmem:[%s12125_s2 + $0x3] ss:$0 sm:$0xff] }
 0x677   :  { %v2905_v30 = vpop.f32.mrb[2].mxu1 }
 0x678   :  { %v9460_v55 = vadd.f32 %v5798_v31, %v2905_v30  ;;  %v7464_v56 = vpop.f32.mrb[3].mxu1  ;;  %v3802_v30 = vld [vmem:[#allocation2 + $0x2c0] sm:$0xff] }
 0x679   :  { %v4460_v56 = vld [vmem:[#allocation2 + $0x340] sm:$0xff] }
 0x67a   :  { %v2909_v11 = vmax.f32 %v9460_v55, 0.0  ;;  %v3803_v55 = vld [vmem:[#allocation2 + $0x2c8] sm:$0xff] }
 0x67c   :  { %v11020_v42 = vand.u32 4294901760, %v2909_v11 }
 0x67e   :  { %v3014_v26 = vsub.f32 %v2909_v11, %v11020_v42  ;;  %v3835_v11 = vand.u32 4294901760, %v3802_v30 }
 0x680   :  { %v3015_v51 = vand.u32 4294901760, %v3014_v26 }
 0x682   :  { %v3016_v58 = vsub.f32 %v3014_v26, %v3015_v51 }
 0x684   :  { %v3017_v7 = vand.u32 4294901760, %v3016_v58  ;;  %v4457_v58 = vld [vmem:[#allocation2 + $0x328] sm:$0xff] }
 0x686   :  { %7498 = vmatmul.mubr.f32.vlgmr.msra.gmra.mrb[4].mxu0 %v3017_v7  ;;  %v3826_v7 = vand.u32 4294901760, %v11188_v50 }
 0x687   :  { %8907 = vmatpush3.bf16.msra.mxu0 %v10945_v43  ;;  %7532 = vmatprep.mubr.msk.f32.mxu0 %vm9602_vm0, %v12265_v4  ;;  %v8978_v43 = vpack.c.bf16 %v3033_v47, %v3026_v41  ;;  %v11138_v41 = vld [vmem:[#allocation2 + $0x300] sm:$0xff] }
 0x688   :  { %8908 = vmatprep.subr.bf16.mxu0 %v12198_v0  ;;  %v4469_v34 = vand.u32 4294901760, %v11138_v41 }
 0x68a   :  { %v11156_v60 = vpack.c.bf16 %v4472_v19, %v4469_v34 }
 0x68b   :  { %8910 = vmatpush3.bf16.msra.mxu0 %v8909_v21  ;;  %v8981_v21 = vpack.c.bf16 %v3047_v63, %v3040_v2  ;;  %v11160_v2 = vld [vmem:[#allocation2 + $0x298] sm:$0xff]  ;;  %v11162_v63 = vld [vmem:[#allocation2 + $0x310] sm:$0xff] }
 0x68c   :  { %8911 = vmatprep.subr.bf16.mxu0 %v12198_v0  ;;  %12330 = vst [vmem:[#allocation6_spill] sm:$0xff] %v11156_v60  ;;  %v3820_v32 = vand.u32 4294901760, %v11160_v2  ;;  %v4475_v8 = vand.u32 4294901760, %v11162_v63 }
 0x68e   :  { %v11178_v15 = vpack.c.bf16 %v3820_v32, %v3817_v36 }
 0x68f   :  { %8913 = vmatpush3.bf16.msra.mxu0 %v8912_v48  ;;  %v12197_v48 = vand.u32 4294901760, %v11167_v53 }
 0x690   :  { %8914 = vmatprep.subr.bf16.mxu0 %v12198_v0  ;;  %12331 = vst [vmem:[#allocation7_spill] sm:$0xff] %v11178_v15 }
 0x691   :  { %v11184_v22 = vpack.c.bf16 %v12197_v48, %v4475_v8  ;;  %v11238_v48 = vsub.f32 %v11138_v41, %v4469_v34  ;;  %v11258_v41 = vsub.f32 %v11162_v63, %v4475_v8  ;;  %v11270_v34 = vsub.f32 %v11188_v50, %v3826_v7  ;;  %v3806_v63 = vld [vmem:[#allocation2 + $0x2e0] sm:$0xff]  ;;  %v4465_v50 = vld [vmem:[#allocation2 + $0x368] sm:$0xff] }
 0x693   :  { %8916 = vmatpush3.bf16.msra.mxu0 %v8915_v6  ;;  %12332 = vst [vmem:[#allocation8_spill] sm:$0xff] %v11184_v22  ;;  %v11186_v6 = vld [vmem:[#allocation2 + $0x2a0] sm:$0xff] }
 0x694   :  { %8917 = vmatprep.subr.bf16.mxu0 %v12198_v0 }
 0x697   :  { %8919 = vmatpush3.bf16.msra.mxu0 %v8918_v18  ;;  %v3823_v18 = vand.u32 4294901760, %v11186_v6 }
 0x698   :  { %8920 = vmatprep.subr.bf16.mxu0 %v12198_v0 }
 0x69b   :  { %8922 = vmatpush3.bf16.msra.mxu0 %v8921_v46  ;;  %v4481_v46 = vand.u32 4294901760, %v11190_v5 }
 0x69c   :  { %8923 = vmatprep.subr.bf16.mxu0 %v12198_v0 }
 0x69f   :  { %8925 = vmatpush3.bf16.msra.mxu0 %v8924_v9 }
 0x6a0   :  { %8926 = vmatprep.subr.bf16.mxu0 %v12198_v0 }
 0x6a3   :  { %8928 = vmatpush3.bf16.msra.mxu0 %v8927_v29  ;;  %v3800_v29 = vld [vmem:[#allocation2 + $0x2b0] sm:$0xff] }
 0x6a4   :  { %8929 = vmatprep.subr.bf16.mxu0 %v12198_v0 }
 0x6a6   :  { %7533 = vmatmul.mubr.f32.vlgmr.msra.gmra.mrb[4].mxu0 %v11020_v42 }
 0x6a7   :  { %8931 = vmatpush3.bf16.msra.mxu0 %v8930_v37  ;;  %7567 = vmatprep.mubr.msk.f32.mxu0 %vm9602_vm0, %v12265_v4  ;;  %v3801_v37 = vld [vmem:[#allocation2 + $0x2b8] sm:$0xff] }
 0x6a8   :  { %8932 = vmatprep.subr.bf16.mxu0 %v12198_v0 }
 0x6ab   :  { %8934 = vmatpush3.bf16.msra.mxu0 %v8933_v20  ;;  %v4458_v20 = vld [vmem:[#allocation2 + $0x330] sm:$0xff] }
 0x6ac   :  { %8935 = vmatprep.subr.bf16.mxu0 %v12198_v0 }
 0x6af   :  { %8937 = vmatpush3.bf16.msra.mxu0 %v8936_v10  ;;  %v3829_v10 = vand.u32 4294901760, %v3800_v29 }
 0x6b0   :  { %8938 = vmatprep.subr.bf16.mxu0 %v12198_v0 }
 0x6b3   :  { %8940 = vmatpush3.bf16.msra.mxu0 %v8939_v3  ;;  %v3832_v3 = vand.u32 4294901760, %v3801_v37 }
 0x6b4   :  { %8941 = vmatprep.subr.bf16.mxu0 %v12198_v0 }
 0x6b7   :  { %8943 = vmatpush3.bf16.msra.mxu0 %v8942_v49  ;;  %v4459_v49 = vld [vmem:[#allocation2 + $0x338] sm:$0xff] }
 0x6b8   :  { %8944 = vmatprep.subr.bf16.mxu0 %v12198_v0 }
 0x6bb   :  { %8946 = vmatpush3.bf16.msra.mxu0 %v8945_v54  ;;  %v4487_v54 = vand.u32 4294901760, %v4458_v20 }
 0x6bc   :  { %8947 = vmatprep.subr.bf16.mxu0 %v12198_v0 }
 0x6bf   :  { %8949 = vmatpush3.bf16.msra.mxu0 %v8948_v23  ;;  %v4490_v23 = vand.u32 4294901760, %v4459_v49 }
 0x6c0   :  { %8950 = vmatprep.subr.bf16.mxu0 %v12198_v0 }
 0x6c1   :  { %v11209_v31 = vpack.c.bf16 %v4490_v23, %v4487_v54  ;;  %v11284_v8 = vsub.f32 %v4459_v49, %v4490_v23  ;;  %v3847_v23 = vand.u32 4294901760, %v3806_v63 }
 0x6c3   :  { %8952 = vmatpush3.bf16.msra.mxu0 %v8951_v52  ;;  %v11207_v52 = vpack.c.bf16 %v3832_v3, %v3829_v10  ;;  %12336 = vst [vmem:[#allocation12_spill] sm:$0xff] %v11209_v31 }
 0x6c4   :  { %8953 = vmatprep.subr.bf16.mxu0 %v12198_v0 }
 0x6c5   :  { %12335 = vst [vmem:[#allocation11_spill] sm:$0xff] %v11207_v52 }
 0x6c6   :  { %7568 = vmatmul.mubr.f32.vlgmr.msra.gmra.mrb[4].mxu0 %v3014_v26  ;;  %v11199_v26 = vpack.c.bf16 %v3826_v7, %v3823_v18  ;;  %v11286_v7 = vsub.f32 %v3802_v30, %v3835_v11 }
 0x6c7   :  { %8955 = vmatpush3.bf16.msra.mxu0 %v10761_v17  ;;  %7602 = vmatprep.mubr.msk.f32.mxu0 %vm9602_vm0, %v12265_v4 }
 0x6c8   :  { %8956 = vmatprep.subr.bf16.mxu0 %v12198_v0  ;;  %12333 = vst [vmem:[#allocation9_spill] sm:$0xff] %v11199_v26 }
 0x6cb   :  { %8958 = vmatpush3.bf16.msra.mxu0 %v10769_v45 }
 0x6cc   :  { %8959 = vmatprep.subr.bf16.mxu0 %v12198_v0 }
 0x6cf   :  { %8961 = vmatpush3.bf16.msra.mxu0 %v10792_v38 }
 0x6d0   :  { %8962 = vmatprep.subr.bf16.mxu0 %v12198_v0 }
 0x6d3   :  { %8964 = vmatpush3.bf16.msra.mxu0 %v10800_v61 }
 0x6d4   :  { %8965 = vmatprep.subr.bf16.mxu0 %v12198_v0 }
 0x6d7   :  { %8967 = vmatpush3.bf16.msra.mxu0 %v10808_v62 }
 0x6d8   :  { %8968 = vmatprep.subr.bf16.mxu0 %v12198_v0 }
 0x6db   :  { %8970 = vmatpush3.bf16.msra.mxu0 %v10911_v12 }
 0x6dc   :  { %8971 = vmatprep.subr.bf16.mxu0 %v12198_v0 }
 0x6df   :  { %8973 = vmatpush3.bf16.msra.mxu0 %v10915_v27 }
 0x6e0   :  { %8974 = vmatprep.subr.bf16.mxu0 %v12198_v0 }
 0x6e3   :  { %8976 = vmatpush3.bf16.msra.mxu0 %v10921_v16 }
 0x6e4   :  { %8977 = vmatprep.subr.bf16.mxu0 %v12198_v0 }
 0x6e6   :  { %7603 = vmatmul.mubr.f32.vlgmr.msra.gmra.mrb[4].mxu0 %v3015_v51  ;;  %v4484_v51 = vand.u32 4294901760, %v4457_v58 }
 0x6e7   :  { %8979 = vmatpush3.bf16.msra.mxu0 %v8978_v43  ;;  %7637 = vmatprep.mubr.msk.f32.mxu0 %vm9602_vm0, %v12265_v4  ;;  %v4461_v43 = vld [vmem:[#allocation2 + $0x348] sm:$0xff] }
 0x6e8   :  { %8980 = vmatprep.subr.bf16.mxu0 %v12198_v0  ;;  %v11201_v9 = vpack.c.bf16 %v4484_v51, %v4481_v46 }
 0x6ea   :  { %12334 = vst [vmem:[#allocation10_spill] sm:$0xff] %v11201_v9 }
 0x6eb   :  { %8982 = vmatpush3.bf16.msra.mxu0 %v8981_v21  ;;  %v4493_v21 = vand.u32 4294901760, %v4460_v56 }
 0x6ec   :  { %8983 = vmatprep.subr.bf16.mxu0 %v12198_v0 }
 0x6ef   :  { %8985 = vmatpush3.bf16.msra.mxu0 %v8984_v39  ;;  %v4496_v39 = vand.u32 4294901760, %v4461_v43 }
 0x6f0   :  { %8986 = vmatprep.subr.bf16.mxu0 %v12198_v0 }
 0x6f3   :  { %8988 = vmatpush3.bf16.msra.mxu0 %v8987_v40 }
 0x6f4   :  { %8989 = vmatprep.subr.bf16.mxu0 %v12198_v0 }
 0x6f7   :  { %8991 = vmatpush3.bf16.msra.mxu0 %v8990_v57  ;;  %v11217_v57 = vpack.c.bf16 %v4496_v39, %v4493_v21 }
 0x6f8   :  { %8992 = vmatprep.subr.bf16.mxu0 %v12198_v0 }
 0x6f9   :  { %12338 = vst [vmem:[#allocation14_spill] sm:$0xff] %v11217_v57 }
 0x6fb   :  { %8994 = vmatpush3.bf16.msra.mxu0 %v8993_v14  ;;  %v3804_v14 = vld [vmem:[#allocation2 + $0x2d0] sm:$0xff] }
 0x6fc   :  { %8995 = vmatprep.subr.bf16.mxu0 %v12198_v0 }
 0x6ff   :  { %8997 = vmatpush3.bf16.msra.mxu0 %v8996_v59  ;;  %v3841_v59 = vand.u32 4294901760, %v3804_v14 }
 0x700   :  { %8998 = vmatprep.subr.bf16.mxu0 %v12198_v0 }
 0x703   :  { %9000 = vmatpush3.bf16.msra.mxu0 %v8999_v1  ;;  %v11223_v1 = vpack.c.bf16 %v3844_v24, %v3841_v59 }
 0x704   :  { %9001 = vmatprep.subr.bf16.mxu0 %v12198_v0 }
 0x705   :  { %12339 = vst [vmem:[#allocation15_spill] sm:$0xff] %v11223_v1 }
 0x706   :  { %7638 = vmatmul.mubr.f32.vlgmr.msra.gmra.mrb[4].mxu0 %v11020_v42 }
 0x707   :  { %9003 = vmatpush3.bf16.msra.mxu0 %v10761_v17  ;;  %7672 = vmatprep.mubr.msk.f32.mxu0 %vm9602_vm0, %v12265_v4 }
 0x708   :  { %9004 = vmatprep.subr.bf16.mxu0 %v12198_v0 }
 0x70b   :  { %9006 = vmatpush3.bf16.msra.mxu0 %v10769_v45  ;;  %v5799_v45 = vld [vmem:[%s12125_s2 + $0x4] ss:$0 sm:$0xff] }
 0x70c   :  { %9007 = vmatprep.subr.bf16.mxu0 %v12198_v0 }
 0x70f   :  { %9009 = vmatpush3.bf16.msra.mxu0 %v10792_v38 }
 0x710   :  { %9010 = vmatprep.subr.bf16.mxu0 %v12198_v0 }
 0x713   :  { %9012 = vmatpush3.bf16.msra.mxu0 %v10800_v61 }
 0x714   :  { %9013 = vmatprep.subr.bf16.mxu0 %v12198_v0 }
 0x717   :  { %9015 = vmatpush3.bf16.msra.mxu0 %v10808_v62 }
 0x718   :  { %9016 = vmatprep.subr.bf16.mxu0 %v12198_v0 }
 0x71b   :  { %9018 = vmatpush3.bf16.msra.mxu0 %v10911_v12  ;;  %v11134_v12 = vld [vmem:[#allocation2 + $0x280] sm:$0xff] }
 0x71c   :  { %9019 = vmatprep.subr.bf16.mxu0 %v12198_v0  ;;  %v3811_v47 = vand.u32 4294901760, %v11134_v12 }
 0x71f   :  { %9021 = vmatpush3.bf16.msra.mxu0 %v10915_v27  ;;  %v11136_v27 = vld [vmem:[#allocation2 + $0x288] sm:$0xff] }
 0x720   :  { %9022 = vmatprep.subr.bf16.mxu0 %v12198_v0 }
 0x723   :  { %9024 = vmatpush3.bf16.msra.mxu0 %v10921_v16  ;;  %v3814_v16 = vand.u32 4294901760, %v11136_v27 }
 0x724   :  { %9169 = vmatprep.subr.bf16.mxu0 %v12198_v0 }
 0x725   :  { %v11150_v28 = vpack.c.bf16 %v3814_v16, %v3811_v47 }
 0x726   :  { %7673 = vmatmul.mubr.f32.vlgmr.msra.gmra.mrb[4].mxu0 %v11020_v42  ;;  %v3838_v42 = vand.u32 4294901760, %v3803_v55 }
 0x727   :  { %7917 = vmatprep.mubr.msk.f32.mxu0 %vm9602_vm0, %v12265_v4  ;;  %12329 = vst [vmem:[#allocation5_spill] sm:$0xff] %v11150_v28  ;;  %9027 = vmatpush3.bf16.msra.mxu1 %v11150_v28 }
 0x728   :  { %9171 = vmatpush3.bf16.msra.mxu0 %v11156_v60  ;;  %9028 = vmatprep.subr.bf16.mxu1 %v12198_v0  ;;  %v11215_v40 = vpack.c.bf16 %v3838_v42, %v3835_v11 }
 0x729   :  { %9172 = vmatprep.subr.bf16.mxu0 %v12198_v0 }
 0x72a   :  { %12337 = vst [vmem:[#allocation13_spill] sm:$0xff] %v11215_v40 }
 0x72b   :  { %9030 = vmatpush3.bf16.msra.mxu1 %v11178_v15 }
 0x72c   :  { %9174 = vmatpush3.bf16.msra.mxu0 %v11184_v22  ;;  %9031 = vmatprep.subr.bf16.mxu1 %v12198_v0 }
 0x72d   :  { %9175 = vmatprep.subr.bf16.mxu0 %v12198_v0 }
 0x72f   :  { %9033 = vmatpush3.bf16.msra.mxu1 %v11199_v26 }
 0x730   :  { %9177 = vmatpush3.bf16.msra.mxu0 %v11201_v9  ;;  %9034 = vmatprep.subr.bf16.mxu1 %v12198_v0 }
 0x731   :  { %9178 = vmatprep.subr.bf16.mxu0 %v12198_v0 }
 0x733   :  { %9036 = vmatpush3.bf16.msra.mxu1 %v11207_v52 }
 0x734   :  { %9180 = vmatpush3.bf16.msra.mxu0 %v11209_v31  ;;  %9037 = vmatprep.subr.bf16.mxu1 %v12198_v0 }
 0x735   :  { %9181 = vmatprep.subr.bf16.mxu0 %v12198_v0 }
 0x737   :  { %9039 = vmatpush3.bf16.msra.mxu1 %v11215_v40 }
 0x738   :  { %9183 = vmatpush3.bf16.msra.mxu0 %v11217_v57  ;;  %9040 = vmatprep.subr.bf16.mxu1 %v12198_v0 }
 0x739   :  { %9184 = vmatprep.subr.bf16.mxu0 %v12198_v0  ;;  %v11243_v0 = vsub.f32 %v11142_v25, %v4472_v19  ;;  %v11267_v25 = vsub.f32 %v11186_v6, %v3823_v18  ;;  %v11273_v19 = vsub.f32 %v11190_v5, %v4481_v46  ;;  %v3807_v6 = vld [vmem:[#allocation2 + $0x2e8] sm:$0xff]  ;;  %v4464_v18 = vld [vmem:[#allocation2 + $0x360] sm:$0xff]  ;;  %v11288_v5 = vsub.f32 %v3803_v55, %v3838_v42 }
 0x73a   :  { %v11292_v46 = vsub.f32 %v4461_v43, %v4496_v39  ;;  %v3850_v30 = vand.u32 4294901760, %v3807_v6  ;;  %v4505_v55 = vand.u32 4294901760, %v4464_v18  ;;  %v4467_v43 = vld [vmem:[#allocation2 + $0x378] sm:$0xff] }
 0x73b   :  { %9042 = vmatpush3.bf16.msra.mxu1 %v11223_v1  ;;  %v12236_v57 = vand.u32 4294901760, %v11288_v5 }
 0x73c   :  { %v11306_v39 = vpack.c.bf16 %v3850_v30, %v3847_v23 }
 0x73e   :  { %12343 = vst [vmem:[#allocation17_spill] sm:$0xff] %v11306_v39 }
 0x7f9   :  { %v3569_v17 = vpop.f32.mrb[4].mxu0 }
 0x7fa   :  { %v11130_v38 = vadd.f32 %v5799_v45, %v3569_v17  ;;  %v7674_v61 = vpop.f32.mrb[5].mxu0  ;;  %v4499_v45 = vand.u32 4294901760, %v4462_v35  ;;  %v4502_v17 = vand.u32 4294901760, %v4463_v13 }
 0x7fb   :  { %v11228_v61 = vsub.f32 %v11134_v12, %v3811_v47  ;;  %v11248_v12 = vsub.f32 %v11158_v33, %v3817_v36  ;;  %v12340_v47 = vand.u32 4294901760, %v11167_v53  ;;  %v11275_v33 = vsub.f32 %v4457_v58, %v4484_v51  ;;  %v3808_v51 = vld [vmem:[#allocation2 + $0x2f0] sm:$0xff] }
 0x7fc   :  { %v3573_v62 = vmul.f32 %v11130_v38, %v11130_v38  ;;  %v11278_v36 = vsub.f32 %v3800_v29, %v3829_v10  ;;  %v11290_v58 = vsub.f32 %v4460_v56, %v4493_v21  ;;  %v3809_v29 = vld [vmem:[#allocation2 + $0x2f8] sm:$0xff]  ;;  %v4466_v10 = vld [vmem:[#allocation2 + $0x370] sm:$0xff]  ;;  %v11300_v49 = vsub.f32 %v4462_v35, %v4499_v45 }
 0x7fd   :  { %v4508_v56 = vand.u32 4294901760, %v4465_v50  ;;  %v3853_v11 = vand.u32 4294901760, %v3808_v51  ;;  %v3856_v42 = vand.u32 4294901760, %v3809_v29  ;;  %v4511_v21 = vand.u32 4294901760, %v4466_v10 }
 0x7fe   :  { %3574 = vadd.xlane.f32.xlu0 %v3573_v62  ;;  %v11233_v62 = vsub.f32 %v11136_v27, %v3814_v16  ;;  %v11253_v27 = vsub.f32 %v11160_v2, %v3820_v32  ;;  %v11263_v16 = vsub.f32 %v11167_v53, %v12340_v47  ;;  %v12341_v2 = vmov 0.0|0.0  }
 0x7ff   :  { %9043 = vmatprep.subr.bf16.mxu1 %v12341_v2  ;;  %v11280_v32 = vsub.f32 %v3801_v37, %v3832_v3  ;;  %v11282_v53 = vsub.f32 %v4458_v20, %v4487_v54  ;;  %v11294_v37 = vsub.f32 %v3804_v14, %v3841_v59  ;;  %v11296_v20 = vsub.f32 %v3805_v44, %v3844_v24 }
 0x800   :  { %v11298_v3 = vpack.c.bf16 %v4502_v17, %v4499_v45  ;;  %v11302_v54 = vsub.f32 %v4463_v13, %v4502_v17  ;;  %v11308_v14 = vsub.f32 %v3806_v63, %v3847_v23  ;;  %v11310_v44 = vsub.f32 %v3807_v6, %v3850_v30  ;;  %9045 = vmatpush3.bf16.msra.mxu1 %v11306_v39 }
 0x801   :  { %v11312_v35 = vsub.f32 %v4464_v18, %v4505_v55  ;;  %v11314_v59 = vpack.c.bf16 %v4508_v56, %v4505_v55  ;;  %v11316_v24 = vsub.f32 %v4465_v50, %v4508_v56  ;;  %v11318_v13 = vpack.c.bf16 %v3856_v42, %v3853_v11  ;;  %9046 = vmatprep.subr.bf16.mxu1 %v12341_v2 }
 0x802   :  { %12342 = vst [vmem:[#allocation16_spill] sm:$0xff] %v11298_v3  ;;  %9186 = vmatpush3.bf16.msra.mxu0 %v11298_v3  ;;  %v11320_v45 = vsub.f32 %v3808_v51, %v3853_v11  ;;  %v11323_v17 = vsub.f32 %v3809_v29, %v3856_v42  ;;  %v4514_v47 = vand.u32 4294901760, %v4467_v43  ;;  %v11325_v3 = vsub.f32 %v4466_v10, %v4511_v21 }
 0x803   :  { %9187 = vmatprep.subr.bf16.mxu0 %v12341_v2  ;;  %12344 = vst [vmem:[#allocation18_spill] sm:$0xff] %v11314_v59  ;;  %12345 = vst [vmem:[#allocation19_spill] sm:$0xff] %v11318_v13  ;;  %v12205_v63 = vand.u32 4294901760, %v11228_v61  ;;  %v12202_v6 = vand.u32 4294901760, %v11233_v62  ;;  %v12204_v18 = vand.u32 4294901760, %v11238_v48  ;;  %v12203_v50 = vand.u32 4294901760, %v11243_v0 }
 0x804   :  { %v12208_v51 = vand.u32 4294901760, %v11248_v12  ;;  %v11335_v29 = vpack.c.bf16 %v4514_v47, %v4511_v21  ;;  %v11337_v10 = vsub.f32 %v4467_v43, %v4514_v47  ;;  %v12209_v30 = vand.u32 4294901760, %v11253_v27  ;;  %9048 = vmatpush3.bf16.msra.mxu1 %v11318_v13 }
 0x805   :  { %v3905_v23 = vsub.f32 %v11228_v61, %v12205_v63  ;;  %v3912_v55 = vsub.f32 %v11233_v62, %v12202_v6  ;;  %v4563_v56 = vsub.f32 %v11238_v48, %v12204_v18  ;;  %v4570_v11 = vsub.f32 %v11243_v0, %v12203_v50  ;;  %9049 = vmatprep.subr.bf16.mxu1 %v12341_v2 }
 0x806   :  { %9189 = vmatpush3.bf16.msra.mxu0 %v11314_v59  ;;  %12346 = vst [vmem:[#allocation20_spill] sm:$0xff] %v11335_v29  ;;  %v3919_v42 = vsub.f32 %v11248_v12, %v12208_v51  ;;  %v3926_v21 = vsub.f32 %v11253_v27, %v12209_v30  ;;  %v12216_v47 = vand.u32 4294901760, %v11258_v41  ;;  %v12217_v6 = vand.u32 4294901760, %v11263_v16 }
 0x807   :  { %9190 = vmatprep.subr.bf16.mxu0 %v12341_v2  ;;  %v3906_v43 = vand.u32 4294901760, %v3905_v23  ;;  %v3913_v50 = vand.u32 4294901760, %v3912_v55  ;;  %v4564_v18 = vand.u32 4294901760, %v4563_v56  ;;  %v4571_v63 = vand.u32 4294901760, %v4570_v11 }
 0x808   :  { %v3920_v59 = vand.u32 4294901760, %v3919_v42  ;;  %v3927_v51 = vand.u32 4294901760, %v3926_v21  ;;  %v4577_v23 = vsub.f32 %v11258_v41, %v12216_v47  ;;  %v4584_v30 = vsub.f32 %v11263_v16, %v12217_v6 }
 0x809   :  { %v12218_v13 = vand.u32 4294901760, %v11267_v25  ;;  %v11373_v39 = vpack.c.bf16 %v4571_v63, %v4564_v18  ;;  %v12219_v55 = vand.u32 4294901760, %v11270_v34  ;;  %v12220_v56 = vand.u32 4294901760, %v11273_v19 }
 0x80a   :  { %9192 = vmatpush3.bf16.msra.mxu0 %v11335_v29  ;;  %v11371_v29 = vpack.c.bf16 %v3913_v50, %v3906_v43  ;;  %v11377_v11 = vpack.c.bf16 %v3927_v51, %v3920_v59  ;;  %v4578_v42 = vand.u32 4294901760, %v4577_v23  ;;  %v4585_v21 = vand.u32 4294901760, %v4584_v30 }
 0x80b   :  { %9193 = vmatprep.subr.bf16.mxu0 %v12341_v2  ;;  %v3933_v47 = vsub.f32 %v11267_v25, %v12218_v13  ;;  %v3940_v6 = vsub.f32 %v11270_v34, %v12219_v55  ;;  %v4591_v63 = vsub.f32 %v11273_v19, %v12220_v56  ;;  %v12223_v18 = vand.u32 4294901760, %v11275_v33 }
 0x80c   :  { %v12228_v50 = vand.u32 4294901760, %v11278_v36  ;;  %v11390_v59 = vpack.c.bf16 %v4585_v21, %v4578_v42  ;;  %v12229_v30 = vand.u32 4294901760, %v11280_v32  ;;  %v12230_v43 = vand.u32 4294901760, %v11282_v53 }
 0x80d   :  { %v3934_v51 = vand.u32 4294901760, %v3933_v47  ;;  %v3941_v23 = vand.u32 4294901760, %v3940_v6  ;;  %v4592_v13 = vand.u32 4294901760, %v4591_v63  ;;  %v4598_v55 = vsub.f32 %v11275_v33, %v12223_v18 }
 0x80e   :  { %v3947_v56 = vsub.f32 %v11278_v36, %v12228_v50  ;;  %v3954_v42 = vsub.f32 %v11280_v32, %v12229_v30  ;;  %v4605_v47 = vsub.f32 %v11282_v53, %v12230_v43  ;;  %v12233_v21 = vand.u32 4294901760, %v11284_v8 }
 0x80f   :  { %v12237_v6 = vand.u32 4294901760, %v11286_v7  ;;  %v11408_v63 = vpack.c.bf16 %v3941_v23, %v3934_v51  ;;  %v4599_v1 = vand.u32 4294901760, %v4598_v55  ;;  %v3968_v51 = vsub.f32 %v11288_v5, %v12236_v57 }
 0x810   :  { %v3948_v18 = vand.u32 4294901760, %v3947_v56  ;;  %v3955_v40 = vand.u32 4294901760, %v3954_v42  ;;  %v4606_v50 = vand.u32 4294901760, %v4605_v47  ;;  %v4612_v30 = vsub.f32 %v11284_v8, %v12233_v21 }
 0x811   :  { %v3961_v43 = vsub.f32 %v11286_v7, %v12237_v6  ;;  %v11417_v31 = vpack.c.bf16 %v4599_v1, %v4592_v13  ;;  %v12238_v55 = vand.u32 4294901760, %v11290_v58  ;;  %v12239_v56 = vand.u32 4294901760, %v11292_v46 }
 0x812   :  { %v11424_v23 = vpack.c.bf16 %v3955_v40, %v3948_v18  ;;  %v4613_v42 = vand.u32 4294901760, %v4612_v30  ;;  %v12242_v21 = vand.u32 4294901760, %v11294_v37  ;;  %v3969_v52 = vand.u32 4294901760, %v3968_v51 }
 0x813   :  { %v3962_v47 = vand.u32 4294901760, %v3961_v43  ;;  %v4619_v1 = vsub.f32 %v11290_v58, %v12238_v55  ;;  %v4626_v13 = vsub.f32 %v11292_v46, %v12239_v56  ;;  %v12245_v57 = vand.u32 4294901760, %v11296_v20 }
 0x814   :  { %v11434_v6 = vpack.c.bf16 %v4613_v42, %v4606_v50  ;;  %v3975_v40 = vsub.f32 %v11294_v37, %v12242_v21  ;;  %v12246_v18 = vand.u32 4294901760, %v11300_v49  ;;  %v12250_v30 = vand.u32 4294901760, %v11302_v54 }
 0x815   :  { %v11441_v43 = vpack.c.bf16 %v3969_v52, %v3962_v47  ;;  %v4620_v51 = vand.u32 4294901760, %v4619_v1  ;;  %v4627_v55 = vand.u32 4294901760, %v4626_v13  ;;  %v3982_v56 = vsub.f32 %v11296_v20, %v12245_v57 }
 0x816   :  { %v3976_v9 = vand.u32 4294901760, %v3975_v40  ;;  %v4633_v50 = vsub.f32 %v11300_v49, %v12246_v18  ;;  %v4640_v42 = vsub.f32 %v11302_v54, %v12250_v30  ;;  %v12249_v21 = vand.u32 4294901760, %v11308_v14 }
 0x817   :  { %v11453_v26 = vpack.c.bf16 %v4627_v55, %v4620_v51  ;;  %v3983_v52 = vand.u32 4294901760, %v3982_v56  ;;  %v12253_v47 = vand.u32 4294901760, %v11310_v44  ;;  %v12254_v1 = vand.u32 4294901760, %v11312_v35 }
 0x818   :  { %v4634_v13 = vand.u32 4294901760, %v4633_v50  ;;  %v4641_v57 = vand.u32 4294901760, %v4640_v42  ;;  %v3989_v40 = vsub.f32 %v11308_v14, %v12249_v21  ;;  %v12255_v18 = vand.u32 4294901760, %v11316_v24 }
 0x819   :  { %v11461_v22 = vpack.c.bf16 %v3983_v52, %v3976_v9  ;;  %v3996_v55 = vsub.f32 %v11310_v44, %v12253_v47  ;;  %v4647_v56 = vsub.f32 %v11312_v35, %v12254_v1  ;;  %v12256_v21 = vand.u32 4294901760, %v11320_v45 }
 0x81a   :  { %v11469_v51 = vpack.c.bf16 %v4641_v57, %v4634_v13  ;;  %v3990_v50 = vand.u32 4294901760, %v3989_v40  ;;  %v4654_v42 = vsub.f32 %v11316_v24, %v12255_v18  ;;  %v12261_v52 = vand.u32 4294901760, %v11323_v17 }
 0x81b   :  { %v3997_v30 = vand.u32 4294901760, %v3996_v55  ;;  %v4648_v9 = vand.u32 4294901760, %v4647_v56  ;;  %v12262_v15 = vand.u32 4294901760, %v11325_v3  ;;  %v4003_v1 = vsub.f32 %v11320_v45, %v12256_v21 }
 0x81c   :  { %v4655_v47 = vand.u32 4294901760, %v4654_v42  ;;  %v12263_v57 = vand.u32 4294901760, %v11337_v10  ;;  %v4010_v40 = vsub.f32 %v11323_v17, %v12261_v52  ;;  %v9074_v52 = vpack.c.bf16 %v11233_v62, %v11228_v61 }
 0x81d   :  { %v11481_v13 = vpack.c.bf16 %v3997_v30, %v3990_v50  ;;  %v4661_v55 = vsub.f32 %v11325_v3, %v12262_v15  ;;  %v4004_v18 = vand.u32 4294901760, %v4003_v1  ;;  %v9218_v15 = vpack.c.bf16 %v11243_v0, %v11238_v48 }
 0x81e   :  { %v11489_v56 = vpack.c.bf16 %v4655_v47, %v4648_v9  ;;  %v4668_v42 = vsub.f32 %v11337_v10, %v12263_v57  ;;  %v4011_v21 = vand.u32 4294901760, %v4010_v40 }
 0x81f   :  { %v4662_v60 = vand.u32 4294901760, %v4661_v55 }
 0x820   :  { %v4669_v28 = vand.u32 4294901760, %v4668_v42  ;;  %v11494_v30 = vpack.c.bf16 %v4011_v21, %v4004_v18 }
 0x822   :  { %v11496_v50 = vpack.c.bf16 %v4669_v28, %v4662_v60 }
 0x88b   :  { %v3575_v21 = vpop.xlane.xlu0 %3574 }
 0x88c   :  { %v3576_v40 = vadd.f32 1e-05, %v3575_v21 }
 0x88e   :  { %9566 = vrsqrt.f32 %v3576_v40  ;;  %vm3579_vm2 = vcmp.eq.f32.partialorder %v3576_v40, inf  ;;  %v3582_v1 = vand.u32 2147483648, %v3576_v40  ;;  %vm3581_vm3 = vcmp.eq.f32.partialorder %v3576_v40, 0.0 }
 0x898   :  { %v9567_v9 = vpop.eup %9566 }
 0x899   :  { %v3578_v55 = vmul.f32 %v9567_v9, %v3576_v40 }
 0x89b   :  { %v3580_v42 = vsel %vm3579_vm2, %v3576_v40, %v3578_v55  ;;  %v12368_v40 = vld [vmem:[#allocation12_spill] sm:$0xff] }
 0x89c   :  { %v11530_v47 = vsel %vm3581_vm3, %v3582_v1, %v3580_v42  ;;  %v12366_v1 = vld [vmem:[#allocation10_spill] sm:$0xff]  ;;  %v12369_v42 = vld [vmem:[#allocation13_spill] sm:$0xff] }
 0x89d   :  { %9568 = vrcp.f32 %v11530_v47  ;;  %vm3588_vm10 = vcmp.lt.s32.totalorder %v11530_v47, 0  ;;  %vm3678_vm15 = vweird.f32 %v11530_v47 }
 0x8a7   :  { %v9569_v28 = vpop.eup %9568 }
 0x8a8   :  { %v3585_v57 = vmul.f32 %v9569_v28, %v11130_v38  ;;  %v12367_v28 = vld [vmem:[#allocation11_spill] sm:$0xff] }
 0x8aa   :  { %v11534_v60 = vand.u32 4294901760, %v3585_v57 }
 0x8ac   :  { %v11537_v18 = vsub.f32 %v3585_v57, %v11534_v60  ;;  %v12361_v57 = vld [vmem:[#allocation5_spill] sm:$0xff] }
 0x8ae   :  { %v11540_v21 = vand.u32 4294901760, %v11537_v18 }
 0x8b0   :  { %v3894_v9 = vsub.f32 %v11537_v18, %v11540_v21 }
 0x8b2   :  { %v11544_v55 = vand.u32 4294901760, %v3894_v9  ;;  %v12370_v9 = vld [vmem:[#allocation14_spill] sm:$0xff] }
 0x8b4   :  { %7708 = vmatmul.mubr.f32.vlgmr.msra.gmra.mrb[4].mxu1 %v11544_v55  ;;  %7918 = vmatmul.mubr.f32.vlgmr.msra.gmra.mrb[6].mxu0 %v11544_v55 }
 0x8b5   :  { %9051 = vmatpush3.bf16.msra.mxu1 %v11371_v29  ;;  %9195 = vmatpush3.bf16.msra.mxu0 %v11373_v39  ;;  %v12351_v39 = vpack.c.bf16 %v11280_v32, %v11278_v36  ;;  %v12352_v29 = vpack.c.bf16 %v11284_v8, %v11282_v53 }
 0x8b6   :  { %9052 = vmatprep.subr.bf16.mxu1 %v12341_v2  ;;  %9196 = vmatprep.subr.bf16.mxu0 %v12341_v2 }
 0x8b7   :  { %7742 = vmatprep.mubr.msk.f32.mxu1 %vm9602_vm0, %v12265_v4  ;;  %7952 = vmatprep.mubr.msk.f32.mxu0 %vm9602_vm0, %v12265_v4 }
 0x8b9   :  { %9054 = vmatpush3.bf16.msra.mxu1 %v11377_v11  ;;  %9198 = vmatpush3.bf16.msra.mxu0 %v11390_v59  ;;  %v12353_v11 = vpack.c.bf16 %v11288_v5, %v11286_v7  ;;  %v12354_v59 = vpack.c.bf16 %v11292_v46, %v11290_v58 }
 0x8ba   :  { %9055 = vmatprep.subr.bf16.mxu1 %v12341_v2  ;;  %9199 = vmatprep.subr.bf16.mxu0 %v12341_v2 }
 0x8bd   :  { %9057 = vmatpush3.bf16.msra.mxu1 %v11408_v63  ;;  %9201 = vmatpush3.bf16.msra.mxu0 %v11417_v31  ;;  %v12350_v31 = vpack.c.bf16 %v11275_v33, %v11273_v19  ;;  %v12356_v63 = vpack.c.bf16 %v11302_v54, %v11300_v49 }
 0x8be   :  { %9058 = vmatprep.subr.bf16.mxu1 %v12341_v2  ;;  %9202 = vmatprep.subr.bf16.mxu0 %v12341_v2 }
 0x8c1   :  { %9060 = vmatpush3.bf16.msra.mxu1 %v11424_v23  ;;  %9204 = vmatpush3.bf16.msra.mxu0 %v11434_v6  ;;  %v12355_v6 = vpack.c.bf16 %v11296_v20, %v11294_v37  ;;  %v12357_v23 = vpack.c.bf16 %v11310_v44, %v11308_v14 }
 0x8c2   :  { %9061 = vmatprep.subr.bf16.mxu1 %v12341_v2  ;;  %9205 = vmatprep.subr.bf16.mxu0 %v12341_v2 }
 0x8c5   :  { %9063 = vmatpush3.bf16.msra.mxu1 %v11441_v43  ;;  %9207 = vmatpush3.bf16.msra.mxu0 %v11453_v26  ;;  %v12348_v26 = vpack.c.bf16 %v11263_v16, %v11258_v41  ;;  %v12358_v43 = vpack.c.bf16 %v11316_v24, %v11312_v35 }
 0x8c6   :  { %9064 = vmatprep.subr.bf16.mxu1 %v12341_v2  ;;  %9208 = vmatprep.subr.bf16.mxu0 %v12341_v2 }
 0x8c9   :  { %9066 = vmatpush3.bf16.msra.mxu1 %v11461_v22  ;;  %9210 = vmatpush3.bf16.msra.mxu0 %v11469_v51  ;;  %v12347_v22 = vpack.c.bf16 %v11253_v27, %v11248_v12  ;;  %v12359_v51 = vpack.c.bf16 %v11323_v17, %v11320_v45 }
 0x8ca   :  { %9067 = vmatprep.subr.bf16.mxu1 %v12341_v2  ;;  %9211 = vmatprep.subr.bf16.mxu0 %v12341_v2 }
 0x8cd   :  { %9069 = vmatpush3.bf16.msra.mxu1 %v11481_v13  ;;  %9213 = vmatpush3.bf16.msra.mxu0 %v11489_v56  ;;  %v12362_v13 = vld [vmem:[#allocation6_spill] sm:$0xff]  ;;  %v12363_v56 = vld [vmem:[#allocation7_spill] sm:$0xff] }
 0x8ce   :  { %9070 = vmatprep.subr.bf16.mxu1 %v12341_v2  ;;  %9214 = vmatprep.subr.bf16.mxu0 %v12341_v2 }
 0x8d1   :  { %9072 = vmatpush3.bf16.msra.mxu1 %v11494_v30  ;;  %9216 = vmatpush3.bf16.msra.mxu0 %v11496_v50  ;;  %v12364_v30 = vld [vmem:[#allocation8_spill] sm:$0xff]  ;;  %v12365_v50 = vld [vmem:[#allocation9_spill] sm:$0xff] }
 0x8d2   :  { %9073 = vmatprep.subr.bf16.mxu1 %v12341_v2  ;;  %9217 = vmatprep.subr.bf16.mxu0 %v12341_v2 }
 0x8d4   :  { %7743 = vmatmul.mubr.f32.vlgmr.msra.gmra.mrb[4].mxu1 %v11534_v60  ;;  %7953 = vmatmul.mubr.f32.vlgmr.msra.gmra.mrb[6].mxu0 %v11534_v60 }
 0x8d5   :  { %9075 = vmatpush3.bf16.msra.mxu1 %v9074_v52  ;;  %9219 = vmatpush3.bf16.msra.mxu0 %v9218_v15  ;;  %v12349_v15 = vpack.c.bf16 %v11270_v34, %v11267_v25  ;;  %v12360_v52 = vpack.c.bf16 %v11337_v10, %v11325_v3 }
 0x8d6   :  { %9076 = vmatprep.subr.bf16.mxu1 %v12341_v2  ;;  %9220 = vmatprep.subr.bf16.mxu0 %v12341_v2 }
 0x8d7   :  { %7777 = vmatprep.mubr.msk.f32.mxu1 %vm9602_vm0, %v12265_v4  ;;  %7987 = vmatprep.mubr.msk.f32.mxu0 %vm9602_vm0, %v12265_v4 }
 0x8d9   :  { %9078 = vmatpush3.bf16.msra.mxu1 %v12347_v22  ;;  %9222 = vmatpush3.bf16.msra.mxu0 %v12348_v26  ;;  %v12371_v22 = vld [vmem:[#allocation15_spill] sm:$0xff]  ;;  %v12372_v26 = vld [vmem:[#allocation16_spill] sm:$0xff] }
 0x8da   :  { %9079 = vmatprep.subr.bf16.mxu1 %v12341_v2  ;;  %9223 = vmatprep.subr.bf16.mxu0 %v12341_v2 }
 0x8dd   :  { %9081 = vmatpush3.bf16.msra.mxu1 %v12349_v15  ;;  %9225 = vmatpush3.bf16.msra.mxu0 %v12350_v31  ;;  %v12373_v15 = vld [vmem:[#allocation17_spill] sm:$0xff]  ;;  %v12374_v31 = vld [vmem:[#allocation18_spill] sm:$0xff] }
 0x8de   :  { %9082 = vmatprep.subr.bf16.mxu1 %v12341_v2  ;;  %9226 = vmatprep.subr.bf16.mxu0 %v12341_v2 }
 0x8e1   :  { %9084 = vmatpush3.bf16.msra.mxu1 %v12351_v39  ;;  %9228 = vmatpush3.bf16.msra.mxu0 %v12352_v29  ;;  %v12375_v39 = vld [vmem:[#allocation19_spill] sm:$0xff]  ;;  %v12376_v29 = vld [vmem:[#allocation20_spill] sm:$0xff] }
 0x8e2   :  { %9085 = vmatprep.subr.bf16.mxu1 %v12341_v2  ;;  %9229 = vmatprep.subr.bf16.mxu0 %v12341_v2 }
 0x8e5   :  { %9087 = vmatpush3.bf16.msra.mxu1 %v12353_v11  ;;  %9231 = vmatpush3.bf16.msra.mxu0 %v12354_v59  ;;  %v12377_v11 = vand.u32 4294901760, %v11228_v61  ;;  %v12378_v59 = vand.u32 4294901760, %v11233_v62  ;;  %v12381_v61 = vand.u32 4294901760, %v11248_v12  ;;  %v12382_v62 = vand.u32 4294901760, %v11253_v27 }
 0x8e6   :  { %9088 = vmatprep.subr.bf16.mxu1 %v12341_v2  ;;  %9232 = vmatprep.subr.bf16.mxu0 %v12341_v2  ;;  %v12385_v12 = vand.u32 4294901760, %v11267_v25  ;;  %v12386_v27 = vand.u32 4294901760, %v11270_v34  ;;  %v12391_v25 = vand.u32 4294901760, %v11282_v53  ;;  %v12392_v34 = vand.u32 4294901760, %v11284_v8 }
 0x8e7   :  { %v12397_v53 = vand.u32 4294901760, %v11294_v37  ;;  %v12398_v8 = vand.u32 4294901760, %v11296_v20  ;;  %v12403_v37 = vand.u32 4294901760, %v11312_v35  ;;  %v12404_v20 = vand.u32 4294901760, %v11316_v24  ;;  %v5111_v35 = vld [vmem:[#allocation2 + $0x388] sm:$0xff] }
 0x8e9   :  { %9090 = vmatpush3.bf16.msra.mxu1 %v12355_v6  ;;  %9234 = vmatpush3.bf16.msra.mxu0 %v12356_v63  ;;  %v9122_v6 = vpack.c.bf16 %v12378_v59, %v12377_v11  ;;  %v12379_v63 = vand.u32 4294901760, %v11238_v48  ;;  %v12383_v48 = vand.u32 4294901760, %v11258_v41  ;;  %v9128_v41 = vpack.c.bf16 %v12386_v27, %v12385_v12 }
 0x8ea   :  { %9091 = vmatprep.subr.bf16.mxu1 %v12341_v2  ;;  %9235 = vmatprep.subr.bf16.mxu0 %v12341_v2  ;;  %v12388_v11 = vand.u32 4294901760, %v11275_v33  ;;  %v12394_v33 = vand.u32 4294901760, %v11288_v5  ;;  %v12400_v5 = vand.u32 4294901760, %v11302_v54  ;;  %v12406_v54 = vand.u32 4294901760, %v11323_v17  ;;  %v5112_v17 = vld [vmem:[#allocation2 + $0x390] sm:$0xff] }
 0x8ed   :  { %9093 = vmatpush3.bf16.msra.mxu1 %v12357_v23  ;;  %9237 = vmatpush3.bf16.msra.mxu0 %v12358_v43  ;;  %v12380_v23 = vand.u32 4294901760, %v11243_v0  ;;  %v12384_v0 = vand.u32 4294901760, %v11263_v16  ;;  %v12387_v16 = vand.u32 4294901760, %v11273_v19  ;;  %v12393_v19 = vand.u32 4294901760, %v11286_v7 }
 0x8ee   :  { %9094 = vmatprep.subr.bf16.mxu1 %v12341_v2  ;;  %9238 = vmatprep.subr.bf16.mxu0 %v12341_v2  ;;  %v12399_v7 = vand.u32 4294901760, %v11300_v49  ;;  %v12405_v49 = vand.u32 4294901760, %v11320_v45  ;;  %v5130_v45 = vand.u32 4294901760, %v5111_v35 }
 0x8ef   :  { %v9266_v43 = vpack.c.bf16 %v12380_v23, %v12379_v63  ;;  %v9272_v59 = vpack.c.bf16 %v12388_v11, %v12387_v16  ;;  %v12390_v63 = vand.u32 4294901760, %v11280_v32  ;;  %v12396_v32 = vand.u32 4294901760, %v11292_v46  ;;  %v5120_v11 = vld [vmem:[#allocation2 + $0x3d0] sm:$0xff] }
 0x8f0   :  { %v12402_v46 = vand.u32 4294901760, %v11310_v44  ;;  %v9143_v12 = vpack.c.bf16 %v12406_v54, %v12405_v49  ;;  %v12408_v44 = vand.u32 4294901760, %v11337_v10  ;;  %v5113_v10 = vld [vmem:[#allocation2 + $0x398] sm:$0xff] }
 0x8f1   :  { %9096 = vmatpush3.bf16.msra.mxu1 %v12359_v51  ;;  %9240 = vmatpush3.bf16.msra.mxu0 %v12360_v52  ;;  %v9125_v51 = vpack.c.bf16 %v12382_v62, %v12381_v61  ;;  %v9269_v52 = vpack.c.bf16 %v12384_v0, %v12383_v48  ;;  %v9134_v61 = vpack.c.bf16 %v12394_v33, %v12393_v19  ;;  %v11841_v19 = vld [vmem:[#allocation2 + $0x3e8] sm:$0xff] }
 0x8f2   :  { %9097 = vmatprep.subr.bf16.mxu1 %v12341_v2  ;;  %9241 = vmatprep.subr.bf16.mxu0 %v12341_v2  ;;  %v9281_v48 = vpack.c.bf16 %v12400_v5, %v12399_v7  ;;  %v11854_v7 = vld [vmem:[#allocation2 + $0x3f8] sm:$0xff] }
 0x8f3   :  { %v5172_v49 = vand.u32 4294901760, %v11854_v7 }
 0x8f4   :  { %7778 = vmatmul.mubr.f32.vlgmr.msra.gmra.mrb[4].mxu1 %v11537_v18  ;;  %7988 = vmatmul.mubr.f32.vlgmr.msra.gmra.mrb[6].mxu0 %v11537_v18 }
 0x8f5   :  { %9099 = vmatpush3.bf16.msra.mxu1 %v12361_v57  ;;  %9243 = vmatpush3.bf16.msra.mxu0 %v12362_v13 }
 0x8f6   :  { %9100 = vmatprep.subr.bf16.mxu1 %v12341_v2  ;;  %9244 = vmatprep.subr.bf16.mxu0 %v12341_v2 }
 0x8f7   :  { %7812 = vmatprep.mubr.msk.f32.mxu1 %vm9602_vm0, %v12265_v4  ;;  %8022 = vmatprep.mubr.msk.f32.mxu0 %vm9602_vm0, %v12265_v4 }
 0x8f9   :  { %9102 = vmatpush3.bf16.msra.mxu1 %v12363_v56  ;;  %9246 = vmatpush3.bf16.msra.mxu0 %v12364_v30 }
 0x8fa   :  { %9103 = vmatprep.subr.bf16.mxu1 %v12341_v2  ;;  %9247 = vmatprep.subr.bf16.mxu0 %v12341_v2 }
 0x8fd   :  { %9105 = vmatpush3.bf16.msra.mxu1 %v12365_v50  ;;  %9249 = vmatpush3.bf16.msra.mxu0 %v12366_v1 }
 0x8fe   :  { %9106 = vmatprep.subr.bf16.mxu1 %v12341_v2  ;;  %9250 = vmatprep.subr.bf16.mxu0 %v12341_v2 }
 0x901   :  { %9108 = vmatpush3.bf16.msra.mxu1 %v12367_v28  ;;  %9252 = vmatpush3.bf16.msra.mxu0 %v12368_v40 }
 0x902   :  { %9109 = vmatprep.subr.bf16.mxu1 %v12341_v2  ;;  %9253 = vmatprep.subr.bf16.mxu0 %v12341_v2 }
 0x905   :  { %9111 = vmatpush3.bf16.msra.mxu1 %v12369_v42  ;;  %9255 = vmatpush3.bf16.msra.mxu0 %v12370_v9 }
 0x906   :  { %9112 = vmatprep.subr.bf16.mxu1 %v12341_v2  ;;  %9256 = vmatprep.subr.bf16.mxu0 %v12341_v2 }
 0x909   :  { %9114 = vmatpush3.bf16.msra.mxu1 %v12371_v22  ;;  %9258 = vmatpush3.bf16.msra.mxu0 %v12372_v26 }
 0x90a   :  { %9115 = vmatprep.subr.bf16.mxu1 %v12341_v2  ;;  %9259 = vmatprep.subr.bf16.mxu0 %v12341_v2 }
 0x90d   :  { %9117 = vmatpush3.bf16.msra.mxu1 %v12373_v15  ;;  %9261 = vmatpush3.bf16.msra.mxu0 %v12374_v31 }
 0x90e   :  { %9118 = vmatprep.subr.bf16.mxu1 %v12341_v2  ;;  %9262 = vmatprep.subr.bf16.mxu0 %v12341_v2 }
 0x911   :  { %9120 = vmatpush3.bf16.msra.mxu1 %v12375_v39  ;;  %9264 = vmatpush3.bf16.msra.mxu0 %v12376_v29 }
 0x912   :  { %9121 = vmatprep.subr.bf16.mxu1 %v12341_v2  ;;  %9265 = vmatprep.subr.bf16.mxu0 %v12341_v2 }
 0x914   :  { %7813 = vmatmul.mubr.f32.vlgmr.msra.gmra.mrb[4].mxu1 %v11540_v21  ;;  %8023 = vmatmul.mubr.f32.vlgmr.msra.gmra.mrb[6].mxu0 %v11540_v21 }
 0x915   :  { %9123 = vmatpush3.bf16.msra.mxu1 %v9122_v6  ;;  %9267 = vmatpush3.bf16.msra.mxu0 %v9266_v43  ;;  %v12389_v6 = vand.u32 4294901760, %v11278_v36  ;;  %v9275_v43 = vpack.c.bf16 %v12392_v34, %v12391_v25  ;;  %v12395_v36 = vand.u32 4294901760, %v11290_v58  ;;  %v12401_v58 = vand.u32 4294901760, %v11308_v14 }
 0x916   :  { %9124 = vmatprep.subr.bf16.mxu1 %v12341_v2  ;;  %9268 = vmatprep.subr.bf16.mxu0 %v12341_v2  ;;  %v12407_v14 = vand.u32 4294901760, %v11325_v3  ;;  %v5110_v3 = vld [vmem:[#allocation2 + $0x380] sm:$0xff]  ;;  %v5157_v25 = vand.u32 4294901760, %v5120_v11 }
 0x917   :  { %7847 = vmatprep.mubr.msk.f32.mxu1 %vm9602_vm0, %v12265_v4  ;;  %8057 = vmatprep.mubr.msk.f32.mxu0 %vm9602_vm0, %v12265_v4  ;;  %v9131_v23 = vpack.c.bf16 %v12390_v63, %v12389_v6  ;;  %v9278_v62 = vpack.c.bf16 %v12396_v32, %v12395_v36  ;;  %v9140_v0 = vpack.c.bf16 %v12402_v46, %v12401_v58  ;;  %v5127_v24 = vand.u32 4294901760, %v5110_v3 }
 0x918   :  { %v9287_v27 = vpack.c.bf16 %v12408_v44, %v12407_v14  ;;  %v11835_v63 = vsub.f32 %v5111_v35, %v5130_v45 }
 0x919   :  { %9126 = vmatpush3.bf16.msra.mxu1 %v9125_v51  ;;  %9270 = vmatpush3.bf16.msra.mxu0 %v9269_v52  ;;  %v9137_v51 = vpack.c.bf16 %v12398_v8, %v12397_v53  ;;  %v9284_v52 = vpack.c.bf16 %v12404_v20, %v12403_v37  ;;  %v11833_v6 = vsub.f32 %v5110_v3, %v5127_v24  ;;  %v5166_v8 = vand.u32 4294901760, %v11841_v19 }
 0x91a   :  { %9127 = vmatprep.subr.bf16.mxu1 %v12341_v2  ;;  %9271 = vmatprep.subr.bf16.mxu0 %v12341_v2  ;;  %v5227_v32 = vand.u32 4294901760, %v11835_v63 }
 0x91b   :  { %v5220_v36 = vand.u32 4294901760, %v11833_v6 }
 0x91c   :  { %v5228_v58 = vsub.f32 %v11835_v63, %v5227_v32 }
 0x91d   :  { %9129 = vmatpush3.bf16.msra.mxu1 %v9128_v41  ;;  %9273 = vmatpush3.bf16.msra.mxu0 %v9272_v59  ;;  %v5121_v59 = vld [vmem:[#allocation2 + $0x3d8] sm:$0xff] }
 0x91e   :  { %9130 = vmatprep.subr.bf16.mxu1 %v12341_v2  ;;  %9274 = vmatprep.subr.bf16.mxu0 %v12341_v2  ;;  %v5160_v34 = vand.u32 4294901760, %v5121_v59  ;;  %v5229_v14 = vand.u32 4294901760, %v5228_v58 }
 0x921   :  { %9132 = vmatpush3.bf16.msra.mxu1 %v9131_v23  ;;  %9276 = vmatpush3.bf16.msra.mxu0 %v9275_v43  ;;  %v5122_v43 = vld [vmem:[#allocation2 + $0x3e0] sm:$0xff] }
 0x922   :  { %9133 = vmatprep.subr.bf16.mxu1 %v12341_v2  ;;  %9277 = vmatprep.subr.bf16.mxu0 %v12341_v2  ;;  %v5163_v53 = vand.u32 4294901760, %v5122_v43 }
 0x924   :  { %v11869_v20 = vpack.c.bf16 %v5166_v8, %v5163_v53 }
 0x925   :  { %9135 = vmatpush3.bf16.msra.mxu1 %v9134_v61  ;;  %9279 = vmatpush3.bf16.msra.mxu0 %v9278_v62  ;;  %v11850_v62 = vpack.c.bf16 %v5160_v34, %v5157_v25 }
 0x926   :  { %9136 = vmatprep.subr.bf16.mxu1 %v12341_v2  ;;  %9280 = vmatprep.subr.bf16.mxu0 %v12341_v2 }
 0x929   :  { %9138 = vmatpush3.bf16.msra.mxu1 %v9137_v51  ;;  %9282 = vmatpush3.bf16.msra.mxu0 %v9281_v48  ;;  %v5124_v51 = vld [vmem:[#allocation2 + $0x3f0] sm:$0xff]  ;;  %v5221_v48 = vsub.f32 %v11833_v6, %v5220_v36 }
 0x92a   :  { %9139 = vmatprep.subr.bf16.mxu1 %v12341_v2  ;;  %9283 = vmatprep.subr.bf16.mxu0 %v12341_v2 }
 0x92d   :  { %9141 = vmatpush3.bf16.msra.mxu1 %v9140_v0  ;;  %9285 = vmatpush3.bf16.msra.mxu0 %v9284_v52  ;;  %v5169_v52 = vand.u32 4294901760, %v5124_v51 }
 0x92e   :  { %9142 = vmatprep.subr.bf16.mxu1 %v12341_v2  ;;  %9286 = vmatprep.subr.bf16.mxu0 %v12341_v2 }
 0x92f   :  { %v11884_v35 = vpack.c.bf16 %v5172_v49, %v5169_v52 }
 0x931   :  { %9144 = vmatpush3.bf16.msra.mxu1 %v9143_v12  ;;  %9288 = vmatpush3.bf16.msra.mxu0 %v9287_v27  ;;  %v5222_v12 = vand.u32 4294901760, %v5221_v48 }
 0x932   :  { %9145 = vmatprep.subr.bf16.mxu1 %v12341_v2  ;;  %9289 = vmatprep.subr.bf16.mxu0 %v12341_v2 }
 0x934   :  { %7848 = vmatmul.mubr.f32.vlgmr.msra.gmra.mrb[4].mxu1 %v11534_v60  ;;  %8058 = vmatmul.mubr.f32.vlgmr.msra.gmra.mrb[6].mxu0 %v11534_v60 }
 0x935   :  { %9147 = vmatpush3.bf16.msra.mxu1 %v12361_v57  ;;  %9291 = vmatpush3.bf16.msra.mxu0 %v12362_v13  ;;  %v11814_v57 = vpack.c.bf16 %v5130_v45, %v5127_v24  ;;  %v5133_v13 = vand.u32 4294901760, %v5112_v17 }
 0x936   :  { %9148 = vmatprep.subr.bf16.mxu1 %v12341_v2  ;;  %9292 = vmatprep.subr.bf16.mxu0 %v12341_v2 }
 0x937   :  { %7882 = vmatprep.mubr.msk.f32.mxu1 %vm9602_vm0, %v12265_v4  ;;  %8092 = vmatprep.mubr.msk.f32.mxu0 %vm9602_vm0, %v12265_v4  ;;  %v11843_v33 = vsub.f32 %v5112_v17, %v5133_v13 }
 0x939   :  { %9150 = vmatpush3.bf16.msra.mxu1 %v12363_v56  ;;  %9294 = vmatpush3.bf16.msra.mxu0 %v12364_v30  ;;  %v5136_v56 = vand.u32 4294901760, %v5113_v10  ;;  %v5114_v30 = vld [vmem:[#allocation2 + $0x3a0] sm:$0xff]  ;;  %v5234_v46 = vand.u32 4294901760, %v11843_v33 }
 0x93a   :  { %9151 = vmatprep.subr.bf16.mxu1 %v12341_v2  ;;  %9295 = vmatprep.subr.bf16.mxu0 %v12341_v2 }
 0x93b   :  { %v11845_v61 = vsub.f32 %v5113_v10, %v5136_v56  ;;  %v5235_v44 = vsub.f32 %v11843_v33, %v5234_v46 }
 0x93d   :  { %9153 = vmatpush3.bf16.msra.mxu1 %v12365_v50  ;;  %9297 = vmatpush3.bf16.msra.mxu0 %v12366_v1  ;;  %v5115_v50 = vld [vmem:[#allocation2 + $0x3a8] sm:$0xff]  ;;  %v11820_v1 = vpack.c.bf16 %v5136_v56, %v5133_v13  ;;  %v5241_v0 = vand.u32 4294901760, %v11845_v61  ;;  %v9338_v13 = vpack.c.bf16 %v5229_v14, %v5222_v12  ;;  %v5236_v56 = vand.u32 4294901760, %v5235_v44 }
 0x93e   :  { %9154 = vmatprep.subr.bf16.mxu1 %v12341_v2  ;;  %9298 = vmatprep.subr.bf16.mxu0 %v12341_v2  ;;  %v11930_v12 = vsub.f32 %v11841_v19, %v5166_v8  ;;  %v11942_v19 = vsub.f32 %v11854_v7, %v5172_v49 }
 0x93f   :  { %v5242_v27 = vsub.f32 %v11845_v61, %v5241_v0 }
 0x941   :  { %9156 = vmatpush3.bf16.msra.mxu1 %v12367_v28  ;;  %9300 = vmatpush3.bf16.msra.mxu0 %v12368_v40  ;;  %v5139_v28 = vand.u32 4294901760, %v5114_v30  ;;  %v5142_v40 = vand.u32 4294901760, %v5115_v50 }
 0x942   :  { %9157 = vmatprep.subr.bf16.mxu1 %v12341_v2  ;;  %9301 = vmatprep.subr.bf16.mxu0 %v12341_v2 }
 0x943   :  { %v11856_v5 = vsub.f32 %v5114_v30, %v5139_v28  ;;  %v11866_v37 = vsub.f32 %v5115_v50, %v5142_v40  ;;  %v5243_v30 = vand.u32 4294901760, %v5242_v27 }
 0x945   :  { %9159 = vmatpush3.bf16.msra.mxu1 %v12369_v42  ;;  %9303 = vmatpush3.bf16.msra.mxu0 %v12370_v9  ;;  %v5116_v42 = vld [vmem:[#allocation2 + $0x3b0] sm:$0xff]  ;;  %v5117_v9 = vld [vmem:[#allocation2 + $0x3b8] sm:$0xff]  ;;  %v5248_v24 = vand.u32 4294901760, %v11856_v5  ;;  %v5255_v45 = vand.u32 4294901760, %v11866_v37 }
 0x946   :  { %9160 = vmatprep.subr.bf16.mxu1 %v12341_v2  ;;  %9304 = vmatprep.subr.bf16.mxu0 %v12341_v2 }
 0x947   :  { %v5249_v50 = vsub.f32 %v11856_v5, %v5248_v24 }
 0x949   :  { %9162 = vmatpush3.bf16.msra.mxu1 %v12371_v22  ;;  %9306 = vmatpush3.bf16.msra.mxu0 %v12372_v26  ;;  %v11826_v22 = vpack.c.bf16 %v5142_v40, %v5139_v28  ;;  %v5145_v26 = vand.u32 4294901760, %v5116_v42  ;;  %v5256_v28 = vsub.f32 %v11866_v37, %v5255_v45 }
 0x94a   :  { %9163 = vmatprep.subr.bf16.mxu1 %v12341_v2  ;;  %9307 = vmatprep.subr.bf16.mxu0 %v12341_v2 }
 0x94b   :  { %v11873_v54 = vsub.f32 %v5116_v42, %v5145_v26 }
 0x94d   :  { %9165 = vmatpush3.bf16.msra.mxu1 %v12373_v15  ;;  %9309 = vmatpush3.bf16.msra.mxu0 %v12374_v31  ;;  %v5148_v15 = vand.u32 4294901760, %v5117_v9  ;;  %v5118_v31 = vld [vmem:[#allocation2 + $0x3c0] sm:$0xff]  ;;  %v5262_v40 = vand.u32 4294901760, %v11873_v54 }
 0x94e   :  { %9166 = vmatprep.subr.bf16.mxu1 %v12341_v2  ;;  %9310 = vmatprep.subr.bf16.mxu0 %v12341_v2  ;;  %v5151_v41 = vand.u32 4294901760, %v5118_v31 }
 0x94f   :  { %v11881_v3 = vsub.f32 %v5117_v9, %v5148_v15  ;;  %v11903_v9 = vsub.f32 %v5120_v11, %v5157_v25  ;;  %v5263_v48 = vsub.f32 %v11873_v54, %v5262_v40 }
 0x950   :  { %v11889_v17 = vsub.f32 %v5118_v31, %v5151_v41 }
 0x951   :  { %9168 = vmatpush3.bf16.msra.mxu1 %v12375_v39  ;;  %9312 = vmatpush3.bf16.msra.mxu0 %v12376_v29  ;;  %v5119_v39 = vld [vmem:[#allocation2 + $0x3c8] sm:$0xff]  ;;  %v11830_v29 = vpack.c.bf16 %v5148_v15, %v5145_v26  ;;  %v5269_v42 = vand.u32 4294901760, %v11881_v3  ;;  %v11905_v26 = vsub.f32 %v5121_v59, %v5160_v34  ;;  %v9341_v15 = vpack.c.bf16 %v5243_v30, %v5236_v56 }
 0x952   :  { %9313 = vmatprep.subr.bf16.mxu1 %v12341_v2  ;;  %v5154_v16 = vand.u32 4294901760, %v5119_v39  ;;  %v5276_v31 = vand.u32 4294901760, %v11889_v17  ;;  %v5290_v34 = vand.u32 4294901760, %v11903_v9  ;;  %v5264_v44 = vand.u32 4294901760, %v5263_v48 }
 0x953   :  { %v5270_v11 = vsub.f32 %v11881_v3, %v5269_v42  ;;  %v5297_v58 = vand.u32 4294901760, %v11905_v26 }
 0x954   :  { %7883 = vmatmul.mubr.f32.vlgmr.msra.gmra.mrb[4].mxu1 %v11534_v60  ;;  %8093 = vmatmul.mubr.f32.vlgmr.msra.gmra.mrb[6].mxu0 %v11534_v60  ;;  %v11838_v23 = vpack.c.bf16 %v5154_v16, %v5151_v41  ;;  %v11891_v10 = vsub.f32 %v5119_v39, %v5154_v16  ;;  %v5250_v41 = vand.u32 4294901760, %v5249_v50  ;;  %v5257_v16 = vand.u32 4294901760, %v5256_v28 }
 0x955   :  { %9315 = vmatpush3.bf16.msra.mxu1 %v11814_v57  ;;  %8127 = vmatprep.mubr.msk.f32.mxu1 %vm9602_vm0, %v12265_v4  ;;  %v5277_v59 = vsub.f32 %v11889_v17, %v5276_v31  ;;  %v5291_v56 = vsub.f32 %v11903_v9, %v5290_v34  ;;  %v5298_v30 = vsub.f32 %v11905_v26, %v5297_v58 }
 0x956   :  { %9316 = vmatprep.subr.bf16.mxu1 %v12341_v2  ;;  %v5283_v39 = vand.u32 4294901760, %v11891_v10  ;;  %v9344_v14 = vpack.c.bf16 %v5257_v16, %v5250_v41  ;;  %v5325_v16 = vand.u32 4294901760, %v11942_v19 }
 0x957   :  { %v5278_v27 = vand.u32 4294901760, %v5277_v59  ;;  %v5292_v28 = vand.u32 4294901760, %v5291_v56  ;;  %v9362_v56 = vpack.c.bf16 %v11835_v63, %v11833_v6  ;;  %v9416_v6 = vpack.c.bf16 %v5255_v45, %v5248_v24 }
 0x958   :  { %v5284_v25 = vsub.f32 %v11891_v10, %v5283_v39  ;;  %v9422_v63 = vpack.c.bf16 %v5283_v39, %v5276_v31  ;;  %v12411_v24 = vmov 2102212464   ;;  %v12414_v39 = vmov 683565275  }
 0x959   :  { %9318 = vmatpush3.bf16.msra.mxu1 %v11820_v1 }
 0x95a   :  { %9319 = vmatprep.subr.bf16.mxu1 %v12341_v2 }
 0x95d   :  { %9321 = vmatpush3.bf16.msra.mxu1 %v11826_v22 }
 0x95e   :  { %9322 = vmatprep.subr.bf16.mxu1 %v12341_v2 }
 0x961   :  { %9324 = vmatpush3.bf16.msra.mxu1 %v11830_v29 }
 0x962   :  { %9325 = vmatprep.subr.bf16.mxu1 %v12341_v2 }
 0x965   :  { %9327 = vmatpush3.bf16.msra.mxu1 %v11838_v23 }
 0x966   :  { %9328 = vmatprep.subr.bf16.mxu1 %v12341_v2 }
 0x969   :  { %9330 = vmatpush3.bf16.msra.mxu1 %v11850_v62 }
 0x96a   :  { %9331 = vmatprep.subr.bf16.mxu1 %v12341_v2 }
 0x96d   :  { %9333 = vmatpush3.bf16.msra.mxu1 %v11869_v20 }
 0x96e   :  { %9334 = vmatprep.subr.bf16.mxu1 %v12341_v2 }
 0x971   :  { %9336 = vmatpush3.bf16.msra.mxu1 %v11884_v35 }
 0x972   :  { %9337 = vmatprep.subr.bf16.mxu1 %v12341_v2 }
 0x974   :  { %8128 = vmatmul.mubr.f32.vlgmr.msra.gmra.mrb[6].mxu1 %v11544_v55  ;;  %v11919_v55 = vsub.f32 %v5122_v43, %v5163_v53  ;;  %v5271_v43 = vand.u32 4294901760, %v5270_v11  ;;  %v11933_v53 = vsub.f32 %v5124_v51, %v5169_v52  ;;  %v5311_v51 = vand.u32 4294901760, %v11930_v12 }
 0x975   :  { %9339 = vmatpush3.bf16.msra.mxu1 %v9338_v13  ;;  %8162 = vmatprep.mubr.msk.f32.mxu1 %vm9602_vm0, %v12265_v4  ;;  %v5285_v13 = vand.u32 4294901760, %v5284_v25 }
 0x976   :  { %9340 = vmatprep.subr.bf16.mxu1 %v12341_v2  ;;  %v9347_v8 = vpack.c.bf16 %v5271_v43, %v5264_v44  ;;  %v5304_v50 = vand.u32 4294901760, %v11919_v55  ;;  %v5312_v7 = vsub.f32 %v11930_v12, %v5311_v51  ;;  %v5318_v49 = vand.u32 4294901760, %v11933_v53 }
 0x977   :  { %v9350_v52 = vpack.c.bf16 %v5285_v13, %v5278_v27 }
 0x978   :  { %v5305_v41 = vsub.f32 %v11919_v55, %v5304_v50  ;;  %v5313_v59 = vand.u32 4294901760, %v5312_v7  ;;  %v5319_v25 = vsub.f32 %v11933_v53, %v5318_v49  ;;  %v9383_v7 = vpack.c.bf16 %v11942_v19, %v11933_v53 }
 0x979   :  { %9342 = vmatpush3.bf16.msra.mxu1 %v9341_v15  ;;  %v5299_v15 = vand.u32 4294901760, %v5298_v30  ;;  %v9365_v30 = vpack.c.bf16 %v11845_v61, %v11843_v33  ;;  %v9425_v33 = vpack.c.bf16 %v5297_v58, %v5290_v34  ;;  %v9428_v61 = vpack.c.bf16 %v5311_v51, %v5304_v50 }
 0x97a   :  { %9343 = vmatprep.subr.bf16.mxu1 %v12341_v2  ;;  %v5306_v11 = vand.u32 4294901760, %v5305_v41  ;;  %v5320_v43 = vand.u32 4294901760, %v5319_v25  ;;  %v9380_v41 = vpack.c.bf16 %v11930_v12, %v11919_v55 }
 0x97b   :  { %v9353_v48 = vpack.c.bf16 %v5299_v15, %v5292_v28  ;;  %v9374_v28 = vpack.c.bf16 %v11891_v10, %v11889_v17  ;;  %v9377_v15 = vpack.c.bf16 %v11905_v26, %v11903_v9  ;;  %v12412_v17 = vmov 2475754826  }
 0x97c   :  { %v9356_v44 = vpack.c.bf16 %v5313_v59, %v5306_v11 }
 0x97d   :  { %9345 = vmatpush3.bf16.msra.mxu1 %v9344_v14  ;;  %v5326_v14 = vsub.f32 %v11942_v19, %v5325_v16 }
 0x97e   :  { %9346 = vmatprep.subr.bf16.mxu1 %v12341_v2 }
 0x97f   :  { %v5327_v27 = vand.u32 4294901760, %v5326_v14 }
 0x981   :  { %9348 = vmatpush3.bf16.msra.mxu1 %v9347_v8  ;;  %v9359_v13 = vpack.c.bf16 %v5327_v27, %v5320_v43  ;;  %v9368_v8 = vpack.c.bf16 %v11866_v37, %v11856_v5 }
 0x982   :  { %9349 = vmatprep.subr.bf16.mxu1 %v12341_v2 }
 0x985   :  { %9351 = vmatpush3.bf16.msra.mxu1 %v9350_v52  ;;  %v9371_v52 = vpack.c.bf16 %v11881_v3, %v11873_v54  ;;  %v12410_v54 = vmov 1326507024  }
 0x986   :  { %9352 = vmatprep.subr.bf16.mxu1 %v12341_v2 }
 0x989   :  { %9354 = vmatpush3.bf16.msra.mxu1 %v9353_v48  ;;  %v9413_v48 = vpack.c.bf16 %v5241_v0, %v5234_v46 }
 0x98a   :  { %9355 = vmatprep.subr.bf16.mxu1 %v12341_v2 }
 0x98d   :  { %9357 = vmatpush3.bf16.msra.mxu1 %v9356_v44 }
 0x98e   :  { %9358 = vmatprep.subr.bf16.mxu1 %v12341_v2 }
 0x991   :  { %9360 = vmatpush3.bf16.msra.mxu1 %v9359_v13 }
 0x992   :  { %9361 = vmatprep.subr.bf16.mxu1 %v12341_v2 }
 0x994   :  { %8163 = vmatmul.mubr.f32.vlgmr.msra.gmra.mrb[6].mxu1 %v11534_v60 }
 0x995   :  { %9363 = vmatpush3.bf16.msra.mxu1 %v9362_v56  ;;  %8197 = vmatprep.mubr.msk.f32.mxu1 %vm9602_vm0, %v12265_v4 }
 0x996   :  { %9364 = vmatprep.subr.bf16.mxu1 %v12341_v2 }
 0x999   :  { %9366 = vmatpush3.bf16.msra.mxu1 %v9365_v30 }
 0x99a   :  { %9367 = vmatprep.subr.bf16.mxu1 %v12341_v2 }
 0x99d   :  { %9369 = vmatpush3.bf16.msra.mxu1 %v9368_v8 }
 0x99e   :  { %9370 = vmatprep.subr.bf16.mxu1 %v12341_v2 }
 0x9a1   :  { %9372 = vmatpush3.bf16.msra.mxu1 %v9371_v52 }
 0x9a2   :  { %9373 = vmatprep.subr.bf16.mxu1 %v12341_v2 }
 0x9a5   :  { %9375 = vmatpush3.bf16.msra.mxu1 %v9374_v28 }
 0x9a6   :  { %9376 = vmatprep.subr.bf16.mxu1 %v12341_v2 }
 0x9a9   :  { %9378 = vmatpush3.bf16.msra.mxu1 %v9377_v15 }
 0x9aa   :  { %9379 = vmatprep.subr.bf16.mxu1 %v12341_v2 }
 0x9ad   :  { %9381 = vmatpush3.bf16.msra.mxu1 %v9380_v41 }
 0x9ae   :  { %9382 = vmatprep.subr.bf16.mxu1 %v12341_v2 }
 0x9b1   :  { %9384 = vmatpush3.bf16.msra.mxu1 %v9383_v7 }
 0x9b2   :  { %9385 = vmatprep.subr.bf16.mxu1 %v12341_v2 }
 0x9b4   :  { %8198 = vmatmul.mubr.f32.vlgmr.msra.gmra.mrb[6].mxu1 %v11537_v18  ;;  %v9410_v18 = vpack.c.bf16 %v5227_v32, %v5220_v36  ;;  %v9431_v36 = vpack.c.bf16 %v5325_v16, %v5318_v49 }
 0x9b5   :  { %9387 = vmatpush3.bf16.msra.mxu1 %v11814_v57  ;;  %8232 = vmatprep.mubr.msk.f32.mxu1 %vm9602_vm0, %v12265_v4 }
 0x9b6   :  { %9388 = vmatprep.subr.bf16.mxu1 %v12341_v2 }
 0x9b9   :  { %9390 = vmatpush3.bf16.msra.mxu1 %v11820_v1 }
 0x9ba   :  { %9391 = vmatprep.subr.bf16.mxu1 %v12341_v2 }
 0x9bd   :  { %9393 = vmatpush3.bf16.msra.mxu1 %v11826_v22 }
 0x9be   :  { %9394 = vmatprep.subr.bf16.mxu1 %v12341_v2 }
 0x9c1   :  { %9396 = vmatpush3.bf16.msra.mxu1 %v11830_v29 }
 0x9c2   :  { %9397 = vmatprep.subr.bf16.mxu1 %v12341_v2 }
 0x9c5   :  { %9399 = vmatpush3.bf16.msra.mxu1 %v11838_v23 }
 0x9c6   :  { %9400 = vmatprep.subr.bf16.mxu1 %v12341_v2 }
 0x9c9   :  { %9402 = vmatpush3.bf16.msra.mxu1 %v11850_v62 }
 0x9ca   :  { %9403 = vmatprep.subr.bf16.mxu1 %v12341_v2 }
 0x9cd   :  { %9405 = vmatpush3.bf16.msra.mxu1 %v11869_v20 }
 0x9ce   :  { %9406 = vmatprep.subr.bf16.mxu1 %v12341_v2 }
 0x9d1   :  { %9408 = vmatpush3.bf16.msra.mxu1 %v11884_v35 }
 0x9d2   :  { %9409 = vmatprep.subr.bf16.mxu1 %v12341_v2 }
 0x9d4   :  { %8233 = vmatmul.mubr.f32.vlgmr.msra.gmra.mrb[6].mxu1 %v11540_v21  ;;  %v9419_v21 = vpack.c.bf16 %v5269_v42, %v5262_v40  ;;  %v12413_v40 = vmov 2131351028  }
 0x9d5   :  { %9411 = vmatpush3.bf16.msra.mxu1 %v9410_v18  ;;  %8267 = vmatprep.mubr.msk.f32.mxu1 %vm9602_vm0, %v12265_v4 }
 0x9d6   :  { %9412 = vmatprep.subr.bf16.mxu1 %v12341_v2 }
 0x9d9   :  { %9414 = vmatpush3.bf16.msra.mxu1 %v9413_v48 }
 0x9da   :  { %9415 = vmatprep.subr.bf16.mxu1 %v12341_v2 }
 0x9dd   :  { %9417 = vmatpush3.bf16.msra.mxu1 %v9416_v6 }
 0x9de   :  { %9418 = vmatprep.subr.bf16.mxu1 %v12341_v2 }
 0x9e1   :  { %9420 = vmatpush3.bf16.msra.mxu1 %v9419_v21 }
 0x9e2   :  { %9421 = vmatprep.subr.bf16.mxu1 %v12341_v2 }
 0x9e5   :  { %9423 = vmatpush3.bf16.msra.mxu1 %v9422_v63 }
 0x9e6   :  { %9424 = vmatprep.subr.bf16.mxu1 %v12341_v2 }
 0x9e9   :  { %9426 = vmatpush3.bf16.msra.mxu1 %v9425_v33 }
 0x9ea   :  { %9427 = vmatprep.subr.bf16.mxu1 %v12341_v2 }
 0x9ed   :  { %9429 = vmatpush3.bf16.msra.mxu1 %v9428_v61 }
 0x9ee   :  { %9430 = vmatprep.subr.bf16.mxu1 %v12341_v2 }
 0x9f1   :  { %9432 = vmatpush3.bf16.msra.mxu1 %v9431_v36 }
 0x9f2   :  { %9433 = vmatprep.subr.bf16.mxu1 %v12341_v2 }
 0x9f4   :  { %8268 = vmatmul.mubr.f32.vlgmr.msra.gmra.mrb[6].mxu1 %v11534_v60 }
 0x9f5   :  { %9435 = vmatpush3.bf16.msra.mxu1 %v11814_v57  ;;  %8302 = vmatprep.mubr.msk.f32.mxu1 %vm9602_vm0, %v12265_v4 }
 0x9f6   :  { %9436 = vmatprep.subr.bf16.mxu1 %v12341_v2 }
 0x9f9   :  { %9438 = vmatpush3.bf16.msra.mxu1 %v11820_v1 }
 0x9fa   :  { %9439 = vmatprep.subr.bf16.mxu1 %v12341_v2 }
 0x9fd   :  { %9441 = vmatpush3.bf16.msra.mxu1 %v11826_v22 }
 0x9fe   :  { %9442 = vmatprep.subr.bf16.mxu1 %v12341_v2 }
 0xa01   :  { %9444 = vmatpush3.bf16.msra.mxu1 %v11830_v29 }
 0xa02   :  { %9445 = vmatprep.subr.bf16.mxu1 %v12341_v2 }
 0xa05   :  { %9447 = vmatpush3.bf16.msra.mxu1 %v11838_v23  ;;  %v3589_v23 = vand.u32 2139095040, %v11530_v47 }
 0xa06   :  { %9448 = vmatprep.subr.bf16.mxu1 %v12341_v2 }
 0xa07   :  { %v3590_v32 = vshrl.u32 %v3589_v23, 23 }
 0xa09   :  { %9450 = vmatpush3.bf16.msra.mxu1 %v11850_v62  ;;  %v5800_v62 = vadd.s32 4294967169, %v3590_v32 }
 0xa0a   :  { %9451 = vmatprep.subr.bf16.mxu1 %v12341_v2 }
 0xa0b   :  { %v3596_v5 = vadd.s32 1, %v5800_v62 }
 0xa0d   :  { %9453 = vmatpush3.bf16.msra.mxu1 %v11869_v20  ;;  %vm3597_vm0 = vcmp.gt.s32.totalorder %v3596_v5, 0 }
 0xa0e   :  { %9454 = vmatprep.subr.bf16.mxu1 %v12341_v2  ;;  %v3598_v46 = vsel %vm3597_vm0, %v3596_v5, 0  ;;  %v12409_v2 = vmov 920167782  }
 0xa0f   :  { %v3600_v0 = vand.u32 31, %v3598_v46 }
 0xa11   :  { %9456 = vmatpush3.bf16.msra.mxu1 %v11884_v35  ;;  %v3601_v37 = vsub.s32 32, %v3600_v0  ;;  %v3586_v35 = vand.u32 2147483647, %v11530_v47  ;;  %v3612_v45 = vshll.u32 %v12411_v24, %v3600_v0  ;;  %v3615_v26 = vshll.u32 %v12409_v2, %v3600_v0 }
 0xa12   :  { %v3603_v55 = vshll.u32 %v12414_v39, %v3600_v0  ;;  %v3606_v34 = vshll.u32 %v12412_v17, %v3600_v0  ;;  %v3609_v58 = vshll.u32 %v12413_v40, %v3600_v0 }
 0xa13   :  { %v3613_v20 = vshrl.u32 %v12409_v2, %v3601_v37  ;;  %v3616_v3 = vshrl.u32 %v12410_v54, %v3601_v37  ;;  %v3604_v10 = vshrl.u32 %v12412_v17, %v3601_v37  ;;  %v3607_v42 = vshrl.u32 %v12413_v40, %v3601_v37 }
 0xa14   :  { %8303 = vmatmul.mubr.f32.vlgmr.msra.gmra.mrb[6].mxu1 %v11534_v60  ;;  %v3599_v60 = vshrl.u32 %v3598_v46, 5  ;;  %v3610_v9 = vshrl.u32 %v12411_v24, %v3601_v37  ;;  %v3593_v53 = vand.u32 8388607, %v3586_v35  ;;  %v3602_v15 = vshrl.u32 %v12414_v39, %v3601_v37 }
 0xa15   :  { %v3614_v31 = vor.u32 %v3613_v20, %v3612_v45  ;;  %v3617_v12 = vor.u32 %v3616_v3, %v3615_v26  ;;  %v3605_v19 = vor.u32 %v3604_v10, %v3603_v55  ;;  %v3608_v50 = vor.u32 %v3607_v42, %v3606_v34 }
 0xa16   :  { %v3611_v51 = vor.u32 %v3610_v9, %v3609_v58  ;;  %vm3621_vm4 = vcmp.lt.s32.totalorder %v3599_v60, 4  ;;  %vm3618_vm5 = vcmp.lt.s32.totalorder %v3599_v60, 1  ;;  %vm3620_vm6 = vcmp.lt.s32.totalorder %v3599_v60, 3 }
 0xa17   :  { %v3627_v49 = vsel %vm3621_vm4, %v3614_v31, 920167782  ;;  %v3631_v16 = vsel %vm3621_vm4, %v3617_v12, 1326507024  ;;  %v3594_v11 = vor.u32 8388608, %v3593_v53  ;;  %v3626_v59 = vsel %vm3618_vm5, %v3605_v19, %v3608_v50 }
 0xa18   :  { %v3628_v25 = vsel %vm3620_vm6, %v3611_v51, %v3627_v49  ;;  %v3630_v14 = vsel %vm3618_vm5, %v3608_v50, %v3611_v51  ;;  %v3632_v44 = vsel %vm3620_vm6, %v3614_v31, %v3631_v16  ;;  %vm3619_vm7 = vcmp.lt.s32.totalorder %v3599_v60, 2 }
 0xa19   :  { %v3629_v43 = vsel %vm3619_vm7, %v3626_v59, %v3628_v25  ;;  %v3633_v27 = vsel %vm3619_vm7, %v3630_v14, %v3632_v44  ;;  %v3634_v13 = vshll.u32 %v3594_v11, 8  ;;  %v3623_v28 = vsel %vm3621_vm4, %v3611_v51, 2102212464  ;;  %v5808_v25 = vld [vmem:[%s12125_s2 + $0x5] ss:$0 sm:$0xff] }
 0xa1a   :  { %v3622_v41 = vsel %vm3618_vm5, %v3602_v15, %v3605_v19  ;;  %v3624_v7 = vsel %vm3620_vm6, %v3608_v50, %v3623_v28  ;;  %vm3587_vm11 = vcmp.le.f32.partialorder %v3586_v35, 0.7853982 }
 0xa1b   :  { %v12096_v56 = vmul.u32.u64.low %v3634_v13, %v3629_v43  ;;  %v12097_v30 = vmul.u32.u64.high %v3634_v13, %v3629_v43, %v12096_v56  ;;  %v12099_v8 = vmul.u32.u64.low %v3634_v13, %v3633_v27  ;;  %v12100_v52 = vmul.u32.u64.high %v3634_v13, %v3633_v27, %v12099_v8 }
 0xa1c   :  { %v3625_v48 = vsel %vm3619_vm7, %v3622_v41, %v3624_v7 }
 0xa1d   :  { %v3644_v18 = vadd.s32 1, %v12097_v30  ;;  %vm3643_vm8 = vc.u32 %v12100_v52, %v12096_v56  ;;  %v3641_v21 = vmul.u32 %v3634_v13, %v3625_v48  ;;  %v3642_v0 = vadd.s32 %v12096_v56, %v12100_v52 }
 0xa1f   :  { %v3645_v6 = vsel %vm3643_vm8, %v3644_v18, %v12097_v30 }
 0xa20   :  { %v3646_v63 = vadd.s32 %v3645_v6, %v3641_v21 }
 0xa22   :  { %v3647_v33 = vadd.s32 536870912, %v3646_v63 }
 0xa24   :  { %v3648_v61 = vshrl.u32 %v3647_v33, 30 }
 0xa26   :  { %v3649_v36 = vshll.u32 %v3648_v61, 30  ;;  %v3672_v42 = vsub.s32 4, %v3648_v61 }
 0xa27   :  { %v4447_v4 = vpop.f32.mrb[4].mxu1  ;;  %v5105_v57 = vpop.f32.mrb[6].mxu0 }
 0xa28   :  { %v12074_v1 = vmul.f32 %v5105_v57, %v4447_v4  ;;  %v7884_v22 = vpop.f32.mrb[5].mxu1  ;;  %v8094_v29 = vpop.f32.mrb[7].mxu0  ;;  %v3650_v4 = vsub.s32 %v3646_v63, %v3649_v36  ;;  %v3673_v9 = vsel %vm3588_vm10, %v3672_v42, %v3648_v61 }
 0xa29   :  { %v3675_v31 = vsel %vm3587_vm11, 0, %v3673_v9 }
 0xa2a   :  { %v3652_v57 = vsub.s32 0, %v3650_v4  ;;  %v3679_v55 = vand.u32 3, %v3675_v31  ;;  %v3782_v50 = vadd.s32 3, %v3675_v31 }
 0xa2c   :  { %v5801_v22 = vmin.u32 %v3652_v57, %v3650_v4  ;;  %vm3681_vm12 = vcmp.eq.s32.totalorder %v3679_v55, 0  ;;  %vm3684_vm13 = vcmp.eq.s32.totalorder %v3679_v55, 2  ;;  %vm3680_vm14 = vcmp.lt.s32.totalorder %v3679_v55, 2 }
 0xa2d   :  { %v3783_v51 = vand.u32 3, %v3782_v50 }
 0xa2e   :  { %v3654_v29 = vclz %v5801_v22 }
 0xa2f   :  { %vm3785_vm1 = vcmp.eq.s32.totalorder %v3783_v51, 0  ;;  %vm3788_vm2 = vcmp.eq.s32.totalorder %v3783_v51, 2  ;;  %vm3784_vm3 = vcmp.lt.s32.totalorder %v3783_v51, 2 }
 0xa30   :  { %v5802_v23 = vadd.s32 4294967294, %v3654_v29 }
 0xa32   :  { %vm5803_vm9 = vcmp.lt.s32.totalorder %v5802_v23, 0 }
 0xa33   :  { %v3657_v32 = vsel %vm5803_vm9, 0, %v5802_v23 }
 0xa34   :  { %v3662_v62 = vsub.s32 4294967266, %v3657_v32  ;;  %v3658_v46 = vsub.s32 32, %v3657_v32  ;;  %v3659_v20 = vshll.u32 %v3650_v4, %v3657_v32 }
 0xa36   :  { %v3663_v5 = vadd.s32 127, %v3662_v62  ;;  %v3660_v2 = vshrl.u32 %v3642_v0, %v3658_v46 }
 0xa38   :  { %v3664_v37 = vshll.u32 %v3663_v5, 23  ;;  %v3661_v3 = vor.u32 %v3660_v2, %v3659_v20 }
 0xa3a   :  { %v3665_v54 = vor.u32 4788187, %v3664_v37  ;;  %v3668_v24 = vcvt.s32.f32 %v3661_v3 }
 0xa3c   :  { %v3666_v60 = vand.u32 2147483647, %v3665_v54 }
 0xa3e   :  { %v3669_v45 = vmul.f32 %v3668_v24, %v3666_v60 }
 0xa40   :  { %v3670_v17 = vxor.u32 2147483648, %v3669_v45 }
 0xa42   :  { %v3671_v10 = vsel %vm3588_vm10, %v3670_v17, %v3669_v45 }
 0xa43   :  { %v3674_v40 = vsel %vm3587_vm11, %v11530_v47, %v3671_v10 }
 0xa44   :  { %9570 = vcosq.f32 %v3674_v40 }
 0xa45   :  { %9572 = vsinq.f32 %v3674_v40 }
 0xa4e   :  { %v9571_v26 = vpop.eup %9570 }
 0xa4f   :  { %v9573_v39 = vpop.eup %9572  ;;  %v3685_v58 = vxor.u32 2147483648, %v9571_v26 }
 0xa50   :  { %v3682_v34 = vxor.u32 2147483648, %v9573_v39 }
 0xa51   :  { %v3686_v53 = vsel %vm3684_vm13, %v3685_v58, %v9573_v39  ;;  %v3790_v59 = vsel %vm3788_vm2, %v3685_v58, %v9573_v39 }
 0xa52   :  { %v3683_v12 = vsel %vm3681_vm12, %v9571_v26, %v3682_v34  ;;  %v3787_v11 = vsel %vm3785_vm1, %v9571_v26, %v3682_v34 }
 0xa53   :  { %v3687_v19 = vsel %vm3680_vm14, %v3683_v12, %v3686_v53  ;;  %v3791_v44 = vsel %vm3784_vm3, %v3787_v11, %v3790_v59 }
 0xa54   :  { %v3688_v35 = vsel %vm3678_vm15, nan, %v3687_v19  ;;  %v3792_v27 = vsel %vm3678_vm15, nan, %v3791_v44 }
 0xa55   :  { %v5768_v49 = vsub.f32 1.0, %v3688_v35  ;;  %v5776_v43 = vmul.f32 %v5808_v25, %v3688_v35 }
 0xa57   :  { %v5770_v16 = vmul.f32 %v12074_v1, %v5768_v49 }
 0xa59   :  { %v5771_v14 = vadd.f32 %v11130_v38, %v5770_v16 }
 0xa5b   :  { %v5777_v13 = vadd.f32 %v5776_v43, %v5771_v14 }
 0xae7   :  { %v5763_v47 = vpop.f32.mrb[6].mxu1 }
 0xae8   :  { %v5778_v56 = vmul.f32 %v5763_v47, %v3792_v27  ;;  %v8304_v30 = vpop.f32.mrb[7].mxu1 }
 0xaea   :  { %v5779_v8 = vadd.f32 %v5778_v56, %v5777_v13 }
 0xaec   :  { %5780 = vst [vmem:[%s12126_s3] sm:$0xff] %v5779_v8 }
 0xaed   :  { %5785 = vsyncpa [#allocation3], 1 }

</bundles_post_ra>
